<compile_context>
chip_gen: v5e
topology: v5e:2x2
jax: 0.10.0
libtpu: 0.0.40
codegen_flags: <defaults>
</compile_context>

<pallas_src>
import math

import jax
import jax.numpy as jnp
from jax.experimental import pallas as pl
from jax.experimental.pallas import tpu as pltpu

OUT_PAD = 128  # lane-dense padded output channel count (>= 4, multiple of 8)


# ----------------------------- kernel ---------------------------------------

def make_head_kernel(num_head_blocks, use_homogeneous, has_skip,
                     h_beta, max_inv_scale, min_inv_scale):
    """Fused Head forward kernel (channel-major, pixels on the lane axis).

    Ref order: x, [skip_w, skip_b], w_in, b_in, w_sq, b_sq, w_out, b_out,
               mean, out
    """

    def kernel(*refs):
        out_ref = refs[-1]
        it = iter(refs[:-1])

        x_ref = next(it)                           # (1, Cin, TP) f32
        if has_skip:
            w_skip = next(it)[...]                 # (C, Cin)  bf16
            b_skip = next(it)[...]                 # (C, 1)    f32
        w_in = next(it)[...]                       # (C, Cin)  bf16
        b_in = next(it)[...]                       # (C, 1)    bf16
        w_sq_ref = next(it)                        # (L, C, C) bf16
        b_sq_ref = next(it)                        # (L, C, 1) bf16
        w_out = next(it)[...]                      # (OUT_PAD, C) bf16
        b_out = next(it)[...]                      # (OUT_PAD, 1) f32
        mean = next(it)[...]                       # (OUT_PAD, 1) f32

        x_f32 = x_ref[0]                           # (Cin, TP) f32
        x_bf = x_f32.astype(jnp.bfloat16)

        def mm(w, a):
            # bf16 MXU matmul with f32 accumulation.
            return jnp.dot(w, a, preferred_element_type=jnp.float32)

        def lin_act(w, a, b):
            # Cast the f32 accumulator to bf16 first, then bias-add + ReLU
            # in bf16 (cheap VPU epilogue, bf16 activation feeds next MXU op).
            y = mm(w, a).astype(jnp.bfloat16) + b
            return jnp.maximum(y, 0)

        # ---- res3 block -----------------------------------------------------
        h = lin_act(w_in, x_bf, b_in)
        h = lin_act(w_sq_ref[0], h, b_sq_ref[0])
        h = lin_act(w_sq_ref[1], h, b_sq_ref[1])
        if has_skip:
            res = (mm(w_skip, x_bf) + b_skip) + h.astype(jnp.float32)
        else:
            res = x_f32 + h.astype(jnp.float32)    # f32 residual carrier

        # ---- residual blocks ------------------------------------------------
        layer = 2
        for _ in range(num_head_blocks):
            t = lin_act(w_sq_ref[layer], res.astype(jnp.bfloat16),
                        b_sq_ref[layer]); layer += 1
            t = lin_act(w_sq_ref[layer], t, b_sq_ref[layer]); layer += 1
            t = lin_act(w_sq_ref[layer], t, b_sq_ref[layer]); layer += 1
            res = res + t.astype(jnp.float32)

        # ---- fc1 / fc2 / fc3 (fc3 zero-padded to OUT_PAD rows) ---------------
        sc = lin_act(w_sq_ref[layer], res.astype(jnp.bfloat16),
                     b_sq_ref[layer]); layer += 1
        sc = lin_act(w_sq_ref[layer], sc, b_sq_ref[layer]); layer += 1
        sc = mm(w_out, sc) + b_out                 # (OUT_PAD, TP) f32

        if use_homogeneous:
            h_in = sc[3:4, :]                      # (1, TP)
            bx = h_beta * h_in
            # torch-style softplus(beta) with threshold at beta*x > 20
            sp = jnp.where(
                bx > 20.0,
                h_in,
                jnp.log1p(jnp.exp(jnp.minimum(bx, 20.0))) / h_beta,
            )
            h_slice = jnp.minimum(sp + max_inv_scale, min_inv_scale)
            inv = pl.reciprocal(h_slice, approx=False)   # (1, TP)
            sc = sc * inv                          # sublane-broadcast multiply

        out_ref[0] = sc + mean                     # (OUT_PAD, TP) f32

    return kernel


# ----------------------------- wrapper ---------------------------------------

def head_forward(x_nchw, params, mean, *, num_head_blocks, use_homogeneous,
                 homogeneous_min_scale=0.01, homogeneous_max_scale=4.0,
                 tile_px=1024):
    """Pallas implementation of Head.forward.

    x_nchw : (N, C_in, H, W) float32
    params : dict produced by init_head_params (f32 master weights; cast here)
    mean   : (3,) float32
    returns: (N, 3, H, W) float32
    """
    assert tile_px % 128 == 0, "tile_px must be a multiple of 128"
    N, C, H, W = x_nchw.shape
    P = H * W
    x_flat = x_nchw.reshape(N, C, P)               # free reshape, stays NCHW

    tp = min(tile_px, P)                            # lane tile (==P if P small)
    grid_p = pl.cdiv(P, tp)
    grid = (N, grid_p)
    # NOTE(v7x): with 2 TensorCores, an even total tile count (N*grid_p)
    # keeps both cores busy; the caller can tune tile_px for that.

    max_inv_scale = 1.0 / homogeneous_max_scale
    min_inv_scale = 1.0 / homogeneous_min_scale
    h_beta = math.log(2.0) / (1.0 - max_inv_scale)

    has_skip = params.get("skip") is not None
    out_pad = params["w_out"].shape[0]

    bf = lambda a: a.astype(jnp.bfloat16)
    f32 = lambda a: a.astype(jnp.float32)

    mean_col = jnp.zeros((out_pad, 1), jnp.float32)
    mean_col = mean_col.at[:3, 0].set(mean.astype(jnp.float32))

    kernel_inputs = [x_flat]
    if has_skip:
        kernel_inputs += [bf(params["skip"][0]), f32(params["skip"][1])]
    kernel_inputs += [bf(params["w_in"]), bf(params["b_in"]),
                      bf(params["w_sq"]), bf(params["b_sq"]),
                      bf(params["w_out"]), f32(params["b_out"]),
                      mean_col]

    kernel = make_head_kernel(num_head_blocks, use_homogeneous, has_skip,
                              h_beta, max_inv_scale, min_inv_scale)

    # ---- VMEM budget: clamp to the physical VMEM of the running chip --------
    try:
        vmem_cap = int(pltpu.get_tpu_info().vmem_capacity_bytes)
    except Exception:
        vmem_cap = 64 << 20                         # conservative (v7x per-TC)
    invariant_bytes = sum(int(a.size) * a.dtype.itemsize
                          for a in kernel_inputs[1:])
    io_tile_bytes = 2 * (C * tp * 4 + out_pad * tp * 4)   # double-buffered I/O
    act_bytes = 5 * C * tp * 4 + 2 * out_pad * tp * 4     # in-kernel live set
    vmem_est = 2 * invariant_bytes + io_tile_bytes + act_bytes + (4 << 20)
    vmem_limit = int(min(max(vmem_est, 32 << 20), int(0.85 * vmem_cap)))

    # ---- advisory cost estimate for XLA's scheduler -------------------------
    mac_per_px = int(params["w_in"].size) + int(params["w_sq"].size) \
        + int(params["w_out"].size)
    if has_skip:
        mac_per_px += int(params["skip"][0].size)
    cost = pl.CostEstimate(
        flops=int(2 * N * P * mac_per_px),
        transcendentals=int(2 * N * P) if use_homogeneous else 0,
        bytes_accessed=int(x_flat.size * 4 + invariant_bytes
                           + N * out_pad * P * 4),
    )

    def build_call(single_buffer_weights):
        def invariant_spec(arr):
            kwargs = {}
            if single_buffer_weights:
                # Grid-invariant block: keep a single resident copy in VMEM.
                kwargs["pipeline_mode"] = pl.Buffered(buffer_count=1)
            return pl.BlockSpec(arr.shape,
                                lambda n, p, _nd=arr.ndim: (0,) * _nd,
                                **kwargs)

        in_specs = [pl.BlockSpec((1, C, tp), lambda n, p: (n, 0, p))]
        in_specs += [invariant_spec(a) for a in kernel_inputs[1:]]
        return pl.pallas_call(
            kernel,
            out_shape=jax.ShapeDtypeStruct((N, out_pad, P), jnp.float32),
            grid_spec=pltpu.PrefetchScalarGridSpec(
                num_scalar_prefetch=0,
                grid=grid,
                in_specs=in_specs,
                out_specs=pl.BlockSpec((1, out_pad, tp), lambda n, p: (n, 0, p)),
            ),
            compiler_params=pltpu.CompilerParams(
                dimension_semantics=("parallel", "parallel"),
                vmem_limit_bytes=vmem_limit),
            cost_estimate=cost,
        )

    # Narrowed fallback: only construction / lowering errors from the
    # Buffered(1) request trigger a retry with default (double) buffering of
    # the weight blocks.  A genuine kernel bug fails both paths and surfaces.
    fallback_errors = [TypeError, ValueError, NotImplementedError,
                       pltpu.LoweringException]
    _jre = getattr(getattr(jax, "errors", None), "JaxRuntimeError", None)
    if isinstance(_jre, type):
        fallback_errors.append(_jre)
    fallback_errors = tuple(fallback_errors)

    try:
        out = build_call(True)(*kernel_inputs)
    except fallback_errors:
        out = build_call(False)(*kernel_inputs)

    # Drop the lane padding on the output channel axis; cheap (3/128 of slab).
    return out[:, :3, :].reshape(N, 3, H, W)


# ----------------------------- params ----------------------------------------

def init_head_params(key, in_channels, head_channels, num_head_blocks,
                     use_homogeneous, out_pad=OUT_PAD):
    """Deterministic synthetic weights (PyTorch-style uniform fan-in init).

    Weights are stored (Cout, Cin) (the native conv layout) so the kernel can
    compute W @ x with channels on sublanes.  All (C, C) layers are packed
    into one (L, C, C) slab (and (L, C, 1) bias slab) in order:
    res3_conv2, res3_conv3, blocks c0/c1/c2 ..., fc1, fc2.
    fc3 is zero-padded to `out_pad` output rows."""

    def conv(k, cin, cout):
        k1, k2 = jax.random.split(k)
        bound = 1.0 / math.sqrt(cin)
        w = jax.random.uniform(k1, (cout, cin), jnp.float32, -bound, bound)
        b = jax.random.uniform(k2, (cout, 1), jnp.float32, -bound, bound)
        return w, b

    has_skip = in_channels != head_channels
    n_square = 2 + 3 * num_head_blocks + 2
    n_convs = (1 if has_skip else 0) + 1 + n_square + 1
    keys = iter(jax.random.split(key, n_convs))

    params = {}
    params["skip"] = conv(next(keys), in_channels, head_channels) \
        if has_skip else None
    params["w_in"], params["b_in"] = conv(next(keys), in_channels,
                                          head_channels)       # res3_conv1
    w_list, b_list = [], []
    for _ in range(n_square):
        w, b = conv(next(keys), head_channels, head_channels)
        w_list.append(w)
        b_list.append(b)
    params["w_sq"] = jnp.stack(w_list)                          # (L, C, C)
    params["b_sq"] = jnp.stack(b_list)                          # (L, C, 1)

    out_c = 4 if use_homogeneous else 3
    w3, b3 = conv(next(keys), head_channels, out_c)             # fc3
    params["w_out"] = jnp.pad(w3, ((0, out_pad - out_c), (0, 0)))
    params["b_out"] = jnp.pad(b3, ((0, out_pad - out_c), (0, 0)))
    return params


# ----------------------------- references ------------------------------------

def head_forward_ref(x_nchw, params, mean, *, num_head_blocks, use_homogeneous,
                     homogeneous_min_scale=0.01, homogeneous_max_scale=4.0):
    """Reference with the same bf16-matmul / bf16-epilogue numerics as the kernel."""
    N, C, H, W = x_nchw.shape
    xf = jnp.transpose(x_nchw, (0, 2, 3, 1)).reshape(N * H * W, C)   # f32
    xb = xf.astype(jnp.bfloat16)

    max_inv_scale = 1.0 / homogeneous_max_scale
    min_inv_scale = 1.0 / homogeneous_min_scale
    h_beta = math.log(2.0) / (1.0 - max_inv_scale)
    bft = jnp.bfloat16

    def lin_act(a, w, b):
        acc = jnp.dot(a, w.astype(bft).T, preferred_element_type=jnp.float32)
        y = acc.astype(bft) + b.astype(bft).reshape(1, -1)
        return jnp.maximum(y, 0)

    def lin_f32(a, w, b):
        return jnp.dot(a, w.astype(bft).T, preferred_element_type=jnp.float32) \
            + b.astype(jnp.float32).reshape(1, -1)

    w_sq, b_sq = params["w_sq"], params["b_sq"]
    has_skip = params.get("skip") is not None

    h = lin_act(xb, params["w_in"], params["b_in"])
    h = lin_act(h, w_sq[0], b_sq[0])
    h = lin_act(h, w_sq[1], b_sq[1])
    if has_skip:
        res = lin_f32(xb, params["skip"][0], params["skip"][1]) \
            + h.astype(jnp.float32)
    else:
        res = xf + h.astype(jnp.float32)

    layer = 2
    for _ in range(num_head_blocks):
        t = lin_act(res.astype(bft), w_sq[layer], b_sq[layer]); layer += 1
        t = lin_act(t, w_sq[layer], b_sq[layer]); layer += 1
        t = lin_act(t, w_sq[layer], b_sq[layer]); layer += 1
        res = res + t.astype(jnp.float32)

    sc = lin_act(res.astype(bft), w_sq[layer], b_sq[layer]); layer += 1
    sc = lin_act(sc, w_sq[layer], b_sq[layer]); layer += 1
    sc = lin_f32(sc, params["w_out"], params["b_out"])

    if use_homogeneous:
        h_in = sc[:, 3:4]
        bx = h_beta * h_in
        sp = jnp.where(bx > 20.0, h_in,
                       jnp.log1p(jnp.exp(jnp.minimum(bx, 20.0))) / h_beta)
        h_slice = jnp.minimum(sp + max_inv_scale, min_inv_scale)
        sc = sc * (1.0 / h_slice)
    sc = sc[:, :3] + mean.reshape(1, 3)
    return jnp.transpose(sc.reshape(N, H, W, 3), (0, 3, 1, 2))


def head_forward_ref_f32(x_nchw, params, mean, *, num_head_blocks,
                         use_homogeneous, homogeneous_min_scale=0.01,
                         homogeneous_max_scale=4.0):
    """Pure-float32 reference (numerics of the original PyTorch module)."""
    N, C, H, W = x_nchw.shape
    x = jnp.transpose(x_nchw, (0, 2, 3, 1)).reshape(N * H * W, C)

    max_inv_scale = 1.0 / homogeneous_max_scale
    min_inv_scale = 1.0 / homogeneous_min_scale
    h_beta = math.log(2.0) / (1.0 - max_inv_scale)

    def lin(a, w, b):
        return jnp.dot(a, w.T, preferred_element_type=jnp.float32) \
            + b.reshape(1, -1)

    relu = jax.nn.relu
    w_sq, b_sq = params["w_sq"], params["b_sq"]
    has_skip = params.get("skip") is not None

    h = relu(lin(x, params["w_in"], params["b_in"]))
    h = relu(lin(h, w_sq[0], b_sq[0]))
    h = relu(lin(h, w_sq[1], b_sq[1]))
    res = lin(x, params["skip"][0], params["skip"][1]) + h if has_skip else x + h

    layer = 2
    for _ in range(num_head_blocks):
        t = relu(lin(res, w_sq[layer], b_sq[layer])); layer += 1
        t = relu(lin(t, w_sq[layer], b_sq[layer])); layer += 1
        t = relu(lin(t, w_sq[layer], b_sq[layer])); layer += 1
        res = res + t

    sc = relu(lin(res, w_sq[layer], b_sq[layer])); layer += 1
    sc = relu(lin(sc, w_sq[layer], b_sq[layer])); layer += 1
    sc = lin(sc, params["w_out"], params["b_out"])

    if use_homogeneous:
        h_in = sc[:, 3:4]
        bx = h_beta * h_in
        sp = jnp.where(bx > 20.0, h_in,
                       jnp.log1p(jnp.exp(jnp.minimum(bx, 20.0))) / h_beta)
        h_slice = jnp.minimum(sp + max_inv_scale, min_inv_scale)
        sc = sc[:, :3] / h_slice
    else:
        sc = sc[:, :3]
    sc = sc + mean.reshape(1, 3)
    return jnp.transpose(sc.reshape(N, H, W, 3), (0, 3, 1, 2))


# ----------------------------- main -------------------------------------------

if __name__ == "__main__":
    # Small test config.  The original module hardcodes head_channels=512; we
    # keep the same structure but use 128 channels for a small, fast test.
    N, H, W = 2, 16, 16
    in_channels = 128
    head_channels = 128            # == in_channels  => head_skip is Identity
    num_head_blocks = 1
    use_homogeneous = True

    key = jax.random.PRNGKey(0)
    k_x, k_w = jax.random.split(key)

    x = jax.random.normal(k_x, (N, in_channels, H, W), jnp.float32)
    params = init_head_params(
        k_w, in_channels, head_channels, num_head_blocks, use_homogeneous)
    mean = jnp.array([1.0, -2.0, 0.5], jnp.float32)

    out = head_forward(
        x, params, mean,
        num_head_blocks=num_head_blocks,
        use_homogeneous=use_homogeneous,
        tile_px=1024,              # clamped to P = H*W = 256 -> grid (2, 1)
    )
    out = jax.block_until_ready(out)
    assert out.shape == (N, 3, H, W), out.shape

    # Tight check: matched bf16 numerics.
    ref_m = head_forward_ref(
        x, params, mean,
        num_head_blocks=num_head_blocks, use_homogeneous=use_homogeneous)
    err_m = float(jnp.max(jnp.abs(out - ref_m)))
    assert jnp.allclose(out, ref_m, rtol=2e-2, atol=2e-2), err_m

    # Loose sanity check: pure-f32 reference (original module numerics).
    ref_f = head_forward_ref_f32(
        x, params, mean,
        num_head_blocks=num_head_blocks, use_homogeneous=use_homogeneous)
    err_f = float(jnp.max(jnp.abs(out - ref_f)))
    assert jnp.allclose(out, ref_f, rtol=1e-1, atol=1e-1), err_f

    print("KERNEL_OK")
</pallas_src>

<mosaic_0001>
module attributes {stable_mosaic.version = 11 : i64} {
  func.func @kernel(%arg0: i32, %arg1: i32, %arg2: memref<1x128x256xf32, #tpu.memory_space<vmem>>, %arg3: memref<128x128xbf16, #tpu.memory_space<vmem>>, %arg4: memref<128x1xbf16, #tpu.memory_space<vmem>>, %arg5: memref<7x128x128xbf16, #tpu.memory_space<vmem>>, %arg6: memref<7x128x1xbf16, #tpu.memory_space<vmem>>, %arg7: memref<128x128xbf16, #tpu.memory_space<vmem>>, %arg8: memref<128x1xf32, #tpu.memory_space<vmem>>, %arg9: memref<128x1xf32, #tpu.memory_space<vmem>>, %arg10: memref<1x128x256xf32, #tpu.memory_space<vmem>>) attributes {dimension_semantics = [#tpu.dimension_semantics<parallel>, #tpu.dimension_semantics<parallel>], iteration_bounds = array<i64: 2, 1>, scalar_prefetch = 0 : i64, scratch_operands = 0 : i64, tpu.core_type = #tpu.core_type<tc>, window_params = [{transform_indices = @transform_0, window_bounds = array<i64: 1, 128, 256>}, {pipeline_mode = #tpu.pipeline_mode<synchronous>, transform_indices = @transform_1, window_bounds = array<i64: 128, 128>}, {pipeline_mode = #tpu.pipeline_mode<synchronous>, transform_indices = @transform_2, window_bounds = array<i64: 128, 1>}, {pipeline_mode = #tpu.pipeline_mode<synchronous>, transform_indices = @transform_3, window_bounds = array<i64: 7, 128, 128>}, {pipeline_mode = #tpu.pipeline_mode<synchronous>, transform_indices = @transform_4, window_bounds = array<i64: 7, 128, 1>}, {pipeline_mode = #tpu.pipeline_mode<synchronous>, transform_indices = @transform_5, window_bounds = array<i64: 128, 128>}, {pipeline_mode = #tpu.pipeline_mode<synchronous>, transform_indices = @transform_6, window_bounds = array<i64: 128, 1>}, {pipeline_mode = #tpu.pipeline_mode<synchronous>, transform_indices = @transform_7, window_bounds = array<i64: 128, 1>}, {transform_indices = @transform_8, window_bounds = array<i64: 1, 128, 256>}]} {
    %c0 = arith.constant 0 : index
    %c0_0 = arith.constant 0 : index
    %0 = vector.load %arg3[%c0, %c0_0] : memref<128x128xbf16, #tpu.memory_space<vmem>>, vector<128x128xbf16>
    %c0_1 = arith.constant 0 : index
    %c0_2 = arith.constant 0 : index
    %1 = vector.load %arg4[%c0_1, %c0_2] : memref<128x1xbf16, #tpu.memory_space<vmem>>, vector<128x1xbf16>
    %c0_3 = arith.constant 0 : index
    %c0_4 = arith.constant 0 : index
    %2 = vector.load %arg7[%c0_3, %c0_4] : memref<128x128xbf16, #tpu.memory_space<vmem>>, vector<128x128xbf16>
    %c0_5 = arith.constant 0 : index
    %c0_6 = arith.constant 0 : index
    %3 = vector.load %arg8[%c0_5, %c0_6] : memref<128x1xf32, #tpu.memory_space<vmem>>, vector<128x1xf32>
    %c0_7 = arith.constant 0 : index
    %c0_8 = arith.constant 0 : index
    %4 = vector.load %arg9[%c0_7, %c0_8] : memref<128x1xf32, #tpu.memory_space<vmem>>, vector<128x1xf32>
    %c0_9 = arith.constant 0 : index
    %c0_10 = arith.constant 0 : index
    %c0_11 = arith.constant 0 : index
    %5 = vector.load %arg2[%c0_9, %c0_10, %c0_11] : memref<1x128x256xf32, #tpu.memory_space<vmem>>, vector<1x128x256xf32>
    %6 = vector.shape_cast %5 : vector<1x128x256xf32> to vector<128x256xf32>
    %7 = arith.truncf %6 : vector<128x256xf32> to vector<128x256xbf16>
    %cst = arith.constant dense<0.000000e+00> : vector<128x256xf32>
    %8 = tpu.matmul %0, %7, %cst {dimension_numbers = #tpu.dot_dimension_numbers<[1], [0], [0], [1], [0, 0, 1, 1], [], []>} : vector<128x128xbf16>, vector<128x256xbf16>, vector<128x256xf32> -> vector<128x256xf32>
    %9 = arith.truncf %8 : vector<128x256xf32> to vector<128x256xbf16>
    %10 = vector.broadcast %1 : vector<128x1xbf16> to vector<128x256xbf16>
    %11 = arith.addf %9, %10 : vector<128x256xbf16>
    %cst_12 = arith.constant 0.000000e+00 : bf16
    %12 = vector.broadcast %cst_12 : bf16 to vector<128x256xbf16>
    %13 = arith.maximumf %11, %12 : vector<128x256xbf16>
    %c0_13 = arith.constant 0 : index
    %c0_14 = arith.constant 0 : index
    %c0_15 = arith.constant 0 : index
    %14 = vector.load %arg5[%c0_13, %c0_14, %c0_15] : memref<7x128x128xbf16, #tpu.memory_space<vmem>>, vector<1x128x128xbf16>
    %15 = vector.shape_cast %14 : vector<1x128x128xbf16> to vector<128x128xbf16>
    %c0_16 = arith.constant 0 : index
    %c0_17 = arith.constant 0 : index
    %c0_18 = arith.constant 0 : index
    %16 = vector.load %arg6[%c0_16, %c0_17, %c0_18] : memref<7x128x1xbf16, #tpu.memory_space<vmem>>, vector<1x128x1xbf16>
    %17 = vector.shape_cast %16 : vector<1x128x1xbf16> to vector<128x1xbf16>
    %cst_19 = arith.constant dense<0.000000e+00> : vector<128x256xf32>
    %18 = tpu.matmul %15, %13, %cst_19 {dimension_numbers = #tpu.dot_dimension_numbers<[1], [0], [0], [1], [0, 0, 1, 1], [], []>} : vector<128x128xbf16>, vector<128x256xbf16>, vector<128x256xf32> -> vector<128x256xf32>
    %19 = arith.truncf %18 : vector<128x256xf32> to vector<128x256xbf16>
    %20 = vector.broadcast %17 : vector<128x1xbf16> to vector<128x256xbf16>
    %21 = arith.addf %19, %20 : vector<128x256xbf16>
    %cst_20 = arith.constant 0.000000e+00 : bf16
    %22 = vector.broadcast %cst_20 : bf16 to vector<128x256xbf16>
    %23 = arith.maximumf %21, %22 : vector<128x256xbf16>
    %c1 = arith.constant 1 : index
    %c0_21 = arith.constant 0 : index
    %c0_22 = arith.constant 0 : index
    %24 = vector.load %arg5[%c1, %c0_21, %c0_22] : memref<7x128x128xbf16, #tpu.memory_space<vmem>>, vector<1x128x128xbf16>
    %25 = vector.shape_cast %24 : vector<1x128x128xbf16> to vector<128x128xbf16>
    %c1_23 = arith.constant 1 : index
    %c0_24 = arith.constant 0 : index
    %c0_25 = arith.constant 0 : index
    %26 = vector.load %arg6[%c1_23, %c0_24, %c0_25] : memref<7x128x1xbf16, #tpu.memory_space<vmem>>, vector<1x128x1xbf16>
    %27 = vector.shape_cast %26 : vector<1x128x1xbf16> to vector<128x1xbf16>
    %cst_26 = arith.constant dense<0.000000e+00> : vector<128x256xf32>
    %28 = tpu.matmul %25, %23, %cst_26 {dimension_numbers = #tpu.dot_dimension_numbers<[1], [0], [0], [1], [0, 0, 1, 1], [], []>} : vector<128x128xbf16>, vector<128x256xbf16>, vector<128x256xf32> -> vector<128x256xf32>
    %29 = arith.truncf %28 : vector<128x256xf32> to vector<128x256xbf16>
    %30 = vector.broadcast %27 : vector<128x1xbf16> to vector<128x256xbf16>
    %31 = arith.addf %29, %30 : vector<128x256xbf16>
    %cst_27 = arith.constant 0.000000e+00 : bf16
    %32 = vector.broadcast %cst_27 : bf16 to vector<128x256xbf16>
    %33 = arith.maximumf %31, %32 : vector<128x256xbf16>
    %34 = arith.extf %33 : vector<128x256xbf16> to vector<128x256xf32>
    %35 = arith.addf %6, %34 : vector<128x256xf32>
    %c2 = arith.constant 2 : index
    %c0_28 = arith.constant 0 : index
    %c0_29 = arith.constant 0 : index
    %36 = vector.load %arg5[%c2, %c0_28, %c0_29] : memref<7x128x128xbf16, #tpu.memory_space<vmem>>, vector<1x128x128xbf16>
    %37 = vector.shape_cast %36 : vector<1x128x128xbf16> to vector<128x128xbf16>
    %38 = arith.truncf %35 : vector<128x256xf32> to vector<128x256xbf16>
    %c2_30 = arith.constant 2 : index
    %c0_31 = arith.constant 0 : index
    %c0_32 = arith.constant 0 : index
    %39 = vector.load %arg6[%c2_30, %c0_31, %c0_32] : memref<7x128x1xbf16, #tpu.memory_space<vmem>>, vector<1x128x1xbf16>
    %40 = vector.shape_cast %39 : vector<1x128x1xbf16> to vector<128x1xbf16>
    %cst_33 = arith.constant dense<0.000000e+00> : vector<128x256xf32>
    %41 = tpu.matmul %37, %38, %cst_33 {dimension_numbers = #tpu.dot_dimension_numbers<[1], [0], [0], [1], [0, 0, 1, 1], [], []>} : vector<128x128xbf16>, vector<128x256xbf16>, vector<128x256xf32> -> vector<128x256xf32>
    %42 = arith.truncf %41 : vector<128x256xf32> to vector<128x256xbf16>
    %43 = vector.broadcast %40 : vector<128x1xbf16> to vector<128x256xbf16>
    %44 = arith.addf %42, %43 : vector<128x256xbf16>
    %cst_34 = arith.constant 0.000000e+00 : bf16
    %45 = vector.broadcast %cst_34 : bf16 to vector<128x256xbf16>
    %46 = arith.maximumf %44, %45 : vector<128x256xbf16>
    %c3 = arith.constant 3 : index
    %c0_35 = arith.constant 0 : index
    %c0_36 = arith.constant 0 : index
    %47 = vector.load %arg5[%c3, %c0_35, %c0_36] : memref<7x128x128xbf16, #tpu.memory_space<vmem>>, vector<1x128x128xbf16>
    %48 = vector.shape_cast %47 : vector<1x128x128xbf16> to vector<128x128xbf16>
    %c3_37 = arith.constant 3 : index
    %c0_38 = arith.constant 0 : index
    %c0_39 = arith.constant 0 : index
    %49 = vector.load %arg6[%c3_37, %c0_38, %c0_39] : memref<7x128x1xbf16, #tpu.memory_space<vmem>>, vector<1x128x1xbf16>
    %50 = vector.shape_cast %49 : vector<1x128x1xbf16> to vector<128x1xbf16>
    %cst_40 = arith.constant dense<0.000000e+00> : vector<128x256xf32>
    %51 = tpu.matmul %48, %46, %cst_40 {dimension_numbers = #tpu.dot_dimension_numbers<[1], [0], [0], [1], [0, 0, 1, 1], [], []>} : vector<128x128xbf16>, vector<128x256xbf16>, vector<128x256xf32> -> vector<128x256xf32>
    %52 = arith.truncf %51 : vector<128x256xf32> to vector<128x256xbf16>
    %53 = vector.broadcast %50 : vector<128x1xbf16> to vector<128x256xbf16>
    %54 = arith.addf %52, %53 : vector<128x256xbf16>
    %cst_41 = arith.constant 0.000000e+00 : bf16
    %55 = vector.broadcast %cst_41 : bf16 to vector<128x256xbf16>
    %56 = arith.maximumf %54, %55 : vector<128x256xbf16>
    %c4 = arith.constant 4 : index
    %c0_42 = arith.constant 0 : index
    %c0_43 = arith.constant 0 : index
    %57 = vector.load %arg5[%c4, %c0_42, %c0_43] : memref<7x128x128xbf16, #tpu.memory_space<vmem>>, vector<1x128x128xbf16>
    %58 = vector.shape_cast %57 : vector<1x128x128xbf16> to vector<128x128xbf16>
    %c4_44 = arith.constant 4 : index
    %c0_45 = arith.constant 0 : index
    %c0_46 = arith.constant 0 : index
    %59 = vector.load %arg6[%c4_44, %c0_45, %c0_46] : memref<7x128x1xbf16, #tpu.memory_space<vmem>>, vector<1x128x1xbf16>
    %60 = vector.shape_cast %59 : vector<1x128x1xbf16> to vector<128x1xbf16>
    %cst_47 = arith.constant dense<0.000000e+00> : vector<128x256xf32>
    %61 = tpu.matmul %58, %56, %cst_47 {dimension_numbers = #tpu.dot_dimension_numbers<[1], [0], [0], [1], [0, 0, 1, 1], [], []>} : vector<128x128xbf16>, vector<128x256xbf16>, vector<128x256xf32> -> vector<128x256xf32>
    %62 = arith.truncf %61 : vector<128x256xf32> to vector<128x256xbf16>
    %63 = vector.broadcast %60 : vector<128x1xbf16> to vector<128x256xbf16>
    %64 = arith.addf %62, %63 : vector<128x256xbf16>
    %cst_48 = arith.constant 0.000000e+00 : bf16
    %65 = vector.broadcast %cst_48 : bf16 to vector<128x256xbf16>
    %66 = arith.maximumf %64, %65 : vector<128x256xbf16>
    %67 = arith.extf %66 : vector<128x256xbf16> to vector<128x256xf32>
    %68 = arith.addf %35, %67 : vector<128x256xf32>
    %c5 = arith.constant 5 : index
    %c0_49 = arith.constant 0 : index
    %c0_50 = arith.constant 0 : index
    %69 = vector.load %arg5[%c5, %c0_49, %c0_50] : memref<7x128x128xbf16, #tpu.memory_space<vmem>>, vector<1x128x128xbf16>
    %70 = vector.shape_cast %69 : vector<1x128x128xbf16> to vector<128x128xbf16>
    %71 = arith.truncf %68 : vector<128x256xf32> to vector<128x256xbf16>
    %c5_51 = arith.constant 5 : index
    %c0_52 = arith.constant 0 : index
    %c0_53 = arith.constant 0 : index
    %72 = vector.load %arg6[%c5_51, %c0_52, %c0_53] : memref<7x128x1xbf16, #tpu.memory_space<vmem>>, vector<1x128x1xbf16>
    %73 = vector.shape_cast %72 : vector<1x128x1xbf16> to vector<128x1xbf16>
    %cst_54 = arith.constant dense<0.000000e+00> : vector<128x256xf32>
    %74 = tpu.matmul %70, %71, %cst_54 {dimension_numbers = #tpu.dot_dimension_numbers<[1], [0], [0], [1], [0, 0, 1, 1], [], []>} : vector<128x128xbf16>, vector<128x256xbf16>, vector<128x256xf32> -> vector<128x256xf32>
    %75 = arith.truncf %74 : vector<128x256xf32> to vector<128x256xbf16>
    %76 = vector.broadcast %73 : vector<128x1xbf16> to vector<128x256xbf16>
    %77 = arith.addf %75, %76 : vector<128x256xbf16>
    %cst_55 = arith.constant 0.000000e+00 : bf16
    %78 = vector.broadcast %cst_55 : bf16 to vector<128x256xbf16>
    %79 = arith.maximumf %77, %78 : vector<128x256xbf16>
    %c6 = arith.constant 6 : index
    %c0_56 = arith.constant 0 : index
    %c0_57 = arith.constant 0 : index
    %80 = vector.load %arg5[%c6, %c0_56, %c0_57] : memref<7x128x128xbf16, #tpu.memory_space<vmem>>, vector<1x128x128xbf16>
    %81 = vector.shape_cast %80 : vector<1x128x128xbf16> to vector<128x128xbf16>
    %c6_58 = arith.constant 6 : index
    %c0_59 = arith.constant 0 : index
    %c0_60 = arith.constant 0 : index
    %82 = vector.load %arg6[%c6_58, %c0_59, %c0_60] : memref<7x128x1xbf16, #tpu.memory_space<vmem>>, vector<1x128x1xbf16>
    %83 = vector.shape_cast %82 : vector<1x128x1xbf16> to vector<128x1xbf16>
    %cst_61 = arith.constant dense<0.000000e+00> : vector<128x256xf32>
    %84 = tpu.matmul %81, %79, %cst_61 {dimension_numbers = #tpu.dot_dimension_numbers<[1], [0], [0], [1], [0, 0, 1, 1], [], []>} : vector<128x128xbf16>, vector<128x256xbf16>, vector<128x256xf32> -> vector<128x256xf32>
    %85 = arith.truncf %84 : vector<128x256xf32> to vector<128x256xbf16>
    %86 = vector.broadcast %83 : vector<128x1xbf16> to vector<128x256xbf16>
    %87 = arith.addf %85, %86 : vector<128x256xbf16>
    %cst_62 = arith.constant 0.000000e+00 : bf16
    %88 = vector.broadcast %cst_62 : bf16 to vector<128x256xbf16>
    %89 = arith.maximumf %87, %88 : vector<128x256xbf16>
    %cst_63 = arith.constant dense<0.000000e+00> : vector<128x256xf32>
    %90 = tpu.matmul %2, %89, %cst_63 {dimension_numbers = #tpu.dot_dimension_numbers<[1], [0], [0], [1], [0, 0, 1, 1], [], []>} : vector<128x128xbf16>, vector<128x256xbf16>, vector<128x256xf32> -> vector<128x256xf32>
    %91 = vector.broadcast %3 : vector<128x1xf32> to vector<128x256xf32>
    %92 = arith.addf %90, %91 : vector<128x256xf32>
    %93 = vector.extract_strided_slice %92 {offsets = [3, 0], sizes = [1, 256], strides = [1, 1]} : vector<128x256xf32> to vector<1x256xf32>
    %cst_64 = arith.constant 0.924196243 : f32
    %94 = vector.broadcast %cst_64 : f32 to vector<1x256xf32>
    %95 = arith.mulf %94, %93 : vector<1x256xf32>
    %cst_65 = arith.constant 2.000000e+01 : f32
    %96 = vector.broadcast %cst_65 : f32 to vector<1x256xf32>
    %97 = arith.cmpf ogt, %95, %96 : vector<1x256xf32>
    %cst_66 = arith.constant 2.000000e+01 : f32
    %98 = vector.broadcast %cst_66 : f32 to vector<1x256xf32>
    %99 = arith.minimumf %95, %98 : vector<1x256xf32>
    %100 = math.exp %99 : vector<1x256xf32>
    %101 = math.log1p %100 : vector<1x256xf32>
    %cst_67 = arith.constant 0.924196243 : f32
    %102 = vector.broadcast %cst_67 : f32 to vector<1x256xf32>
    %103 = arith.divf %101, %102 : vector<1x256xf32>
    %104 = arith.select %97, %93, %103 : vector<1x256xi1>, vector<1x256xf32>
    %cst_68 = arith.constant 2.500000e-01 : f32
    %105 = vector.broadcast %cst_68 : f32 to vector<1x256xf32>
    %106 = arith.addf %104, %105 : vector<1x256xf32>
    %cst_69 = arith.constant 1.000000e+02 : f32
    %107 = vector.broadcast %cst_69 : f32 to vector<1x256xf32>
    %108 = arith.minimumf %106, %107 : vector<1x256xf32>
    %109 = tpu.reciprocal %108 : vector<1x256xf32> -> vector<1x256xf32>
    %110 = vector.broadcast %109 : vector<1x256xf32> to vector<128x256xf32>
    %111 = arith.mulf %92, %110 : vector<128x256xf32>
    %112 = vector.broadcast %4 : vector<128x1xf32> to vector<128x256xf32>
    %113 = arith.addf %111, %112 : vector<128x256xf32>
    %c0_70 = arith.constant 0 : index
    %c0_71 = arith.constant 0 : index
    %c0_72 = arith.constant 0 : index
    %114 = vector.load %arg10[%c0_70, %c0_71, %c0_72] : memref<1x128x256xf32, #tpu.memory_space<vmem>>, vector<1x128x256xf32>
    %115 = vector.shape_cast %114 : vector<1x128x256xf32> to vector<128x256xf32>
    %116 = vector.shape_cast %113 : vector<128x256xf32> to vector<1x128x256xf32>
    tpu.vector_store %arg10[%c0_70, %c0_71, %c0_72], %116 {strides = array<i32>} : memref<1x128x256xf32, #tpu.memory_space<vmem>>, vector<1x128x256xf32>,
    return
  }
  func.func @transform_0(%arg0: i32, %arg1: i32) -> (i32, i32, i32) {
    %c0_i32 = arith.constant 0 : i32
    %c0_i32_0 = arith.constant 0 : i32
    return %arg0, %c0_i32, %arg1 : i32, i32, i32
  }
  func.func @transform_1(%arg0: i32, %arg1: i32) -> (i32, i32) {
    %c0_i32 = arith.constant 0 : i32
    %c0_i32_0 = arith.constant 0 : i32
    %c0_i32_1 = arith.constant 0 : i32
    return %c0_i32, %c0_i32_0 : i32, i32
  }
  func.func @transform_2(%arg0: i32, %arg1: i32) -> (i32, i32) {
    %c0_i32 = arith.constant 0 : i32
    %c0_i32_0 = arith.constant 0 : i32
    %c0_i32_1 = arith.constant 0 : i32
    return %c0_i32, %c0_i32_0 : i32, i32
  }
  func.func @transform_3(%arg0: i32, %arg1: i32) -> (i32, i32, i32) {
    %c0_i32 = arith.constant 0 : i32
    %c0_i32_0 = arith.constant 0 : i32
    %c0_i32_1 = arith.constant 0 : i32
    %c0_i32_2 = arith.constant 0 : i32
    return %c0_i32, %c0_i32_0, %c0_i32_1 : i32, i32, i32
  }
  func.func @transform_4(%arg0: i32, %arg1: i32) -> (i32, i32, i32) {
    %c0_i32 = arith.constant 0 : i32
    %c0_i32_0 = arith.constant 0 : i32
    %c0_i32_1 = arith.constant 0 : i32
    %c0_i32_2 = arith.constant 0 : i32
    return %c0_i32, %c0_i32_0, %c0_i32_1 : i32, i32, i32
  }
  func.func @transform_5(%arg0: i32, %arg1: i32) -> (i32, i32) {
    %c0_i32 = arith.constant 0 : i32
    %c0_i32_0 = arith.constant 0 : i32
    %c0_i32_1 = arith.constant 0 : i32
    return %c0_i32, %c0_i32_0 : i32, i32
  }
  func.func @transform_6(%arg0: i32, %arg1: i32) -> (i32, i32) {
    %c0_i32 = arith.constant 0 : i32
    %c0_i32_0 = arith.constant 0 : i32
    %c0_i32_1 = arith.constant 0 : i32
    return %c0_i32, %c0_i32_0 : i32, i32
  }
  func.func @transform_7(%arg0: i32, %arg1: i32) -> (i32, i32) {
    %c0_i32 = arith.constant 0 : i32
    %c0_i32_0 = arith.constant 0 : i32
    %c0_i32_1 = arith.constant 0 : i32
    return %c0_i32, %c0_i32_0 : i32, i32
  }
  func.func @transform_8(%arg0: i32, %arg1: i32) -> (i32, i32, i32) {
    %c0_i32 = arith.constant 0 : i32
    %c0_i32_0 = arith.constant 0 : i32
    return %arg0, %c0_i32, %arg1 : i32, i32, i32
  }
}

</mosaic_0001>

<bundles_post_ra>
// kernel: tpu_custom_call.1
= control target key start
LH: loop header
LB: loop body
LE: loop exit
PB: predicated region body
PF: predicated region fallthrough
CT: control target
= control target key end

     0   :  { %13 = vsyncpa [#allocation3], 0  ;;  %s8011_s0 = inlined_call_operand.vmem [shape: f32[2,128,256], index: 0, kind: input, shape index: {}]   ;;  %s8012_s1 = inlined_call_operand.vmem [shape: bf16[128,128], index: 1, kind: input, shape index: {}]   ;;  %s8013_s2 = inlined_call_operand.vmem [shape: bf16[128,1], index: 2, kind: input, shape index: {}]   ;;  %s8014_s3 = inlined_call_operand.hbm [shape: bf16[7,128,128], index: 3, kind: input, shape index: {}]   ;;  %s8015_s4 = inlined_call_operand.vmem [shape: bf16[7,128,1], index: 4, kind: input, shape index: {}]   ;;  %s8016_s5 = inlined_call_operand.vmem [shape: bf16[128,128], index: 5, kind: input, shape index: {}]   ;;  %s8017_s6 = inlined_call_operand.vmem [shape: f32[128,1], index: 6, kind: input, shape index: {}]   ;;  %s8018_s7 = inlined_call_operand.vmem [shape: f32[128,1], index: 7, kind: input, shape index: {}]   ;;  %s8019_s8 = inlined_call_operand.hbm [shape: f32[2,128,256], index: 8, kind: output, shape index: {}]  }
   0x1   :  { %14 = vsyncpa [#allocation4], 0 }
   0x2   :  { %16 = vsyncpa [#allocation4 + $0x1], 0  ;;  %s6094_s27 = smov 0   ;;  %s6096_s28 = smov 0  }
   0x3   :  { %s6098_s29 = smov 0   ;;  %s6100_s30 = smov 0  }
   0x4   :  { %s6102_s9 = smov 0   ;;  %s6104_s10 = smov 0  }
   0x5 LB: > { %s5316_s11 = sadd.s32 4294967295, %s6039_s10   ;;  %s5317_s12 = sadd.s32 4294967294, %s6039_s10   ;;  %s6039_s10 = sphi %s6104_s10, %s22_s10   ;;  %s6035_s9 = sphi %s6102_s9, %s8102_s9   ;;  %s6031_s30 = sphi %s6100_s30, %s8101_s30   ;;  %s6027_s29 = sphi %s6098_s29, %s8100_s29   ;;  %s6023_s28 = sphi %s6096_s28, %s8099_s28   ;;  %s6019_s27 = sphi %s6094_s27, %s8098_s27  }
   0x6   : > { %s34_s13 = sadd.s32 1, %s6035_s9  ;;  %s218_s14 = sadd.s32 1, %s6027_s29 }
   0x7   : > { %p36_p0 = scmp.ge.s32.totalorder %s34_s13, 2  ;;  %p228_p1 = scmp.ne.s32.totalorder %s6027_s29, %s6023_s28 }
   0x8   : > { %p229_p2 = scmp.eq.s32.totalorder %s5316_s11, 1  ;;  %p234_p3 = scmp.ne.s32.totalorder %s6023_s28, %s6019_s27 }
   0x9   : > { %s8104_s13 = smov (%p36_p0, %s34_s13), 0  ;;  %p235_p5 = scmp.eq.s32.totalorder %s5317_s12, 1 }
   0xa   : > { %p6134_p4 = por %p229_p2, %p228_p1  ;;  %s213_s16 = ssub.s32 %s6035_s9, %s8104_s13 }
   0xb   : > { %p5318_p6 = scmp.ge.s32.totalorder %s6039_s10, 1  ;;  %p216_p7 = scmp.eq.s32.totalorder %s213_s16, 0 }
   0xc   : > { %p6141_p8 = por %p235_p5, %p234_p3  ;;  %p242_p9 = scmp.lt.s32.totalorder %s6039_s10, 3 }
   0xd   : > { %s6147_s18 = scalar_select %p216_p7, %s6027_s29, %s218_s14  }
   0xe   : > { %p243_p10 = pnand %p5318_p6, %p242_p9  ;;  %p5819_p11 = scmp.eq.s32.totalorder %s5316_s11, 0 }
   0xf   : > { %s259_s21 = sshll.u32 %s8014_s3, 4  ;;  %s6041_s22 = smov [#allocation2]   ;;  %s260_s21 = int_to_ptr.hbm [resolvable:$true] %s259_s21 }
  0x10   : > { %p5811_p12 = pneg %p243_p10  ;;  %s261_s23 = sshll.u32 %s6041_s22, 4  ;;  %s262_s23 = int_to_ptr.vmem [resolvable:$true] %s261_s23 }
  0x11   : > { %s6042_s24 = smov 64   ;;  %s6043_s25 = smov 4  }
  0x12   : > { %p5812_p13 = pnand %p5819_p11, %p5811_p12  ;;  %302 = sbr.rel (%p243_p10) target bundleno = 2596 (0xa24), region = 52 }
  0x14   : > { %5814 = dma.hbm_to_vmem [thread:$0]  (!%p5812_p13), %s260_s21, 7168, %s262_s23, [#allocation3], %s6042_s24, %s6042_s24, %s6043_s25  }
  0x17   : > { %6010 = dma.done.wait (%p5819_p11), [#allocation3], 7168  }
  0x18   : > { %6012 = vsyncadd (%p5819_p11), [#allocation3], 4294960128  ;;  %p342_p0 = scmp.lt.s32.totalorder %s6031_s30, 1  ;;  %v6044_v0 = vmov 0   ;;  %v382_v1 = vld [vmem:[%s8013_s2 + $0x38] sm:$0xf] }
  0x19   : > { %5880 = vset.pattern.permute.xlu2 %v6044_v0  ;;  %5879 = vset.pattern.permute.xlu1 %v6044_v0  ;;  %v380_v2 = vld [vmem:[%s8013_s2 + $0x30] sm:$0xf]  ;;  %v378_v3 = vld [vmem:[%s8013_s2 + $0x28] sm:$0xf]  ;;  %v383_v20 = vld [vmem:[%s8013_s2 + $0x3c] sm:$0xf] }
  0x1a   : > { %5878 = vset.pattern.permute.xlu0 %v6044_v0  ;;  %s343_s26 = scalar_select %p342_p0, %s6031_s30, 1  ;;  %752 = vperm.xlu1 %5879, %v380_v2   ;;  %v381_v21 = vld [vmem:[%s8013_s2 + $0x34] sm:$0xf]  ;;  %v379_v22 = vld [vmem:[%s8013_s2 + $0x2c] sm:$0xf]  ;;  %v5716_v63 = vld [vmem:[%s8012_s1] sm:$0xff] }
  0x1b   : > { %770 = vperm.xlu0 %5878, %v382_v1   ;;  %734 = vperm.xlu2 %5880, %v378_v3   ;;  %v377_v35 = vld [vmem:[%s8013_s2 + $0x24] sm:$0xf]  ;;  %v376_v36 = vld [vmem:[%s8013_s2 + $0x20] sm:$0xf]  ;;  %v374_v37 = vld [vmem:[%s8013_s2 + $0x18] sm:$0xf] }
  0x1c   : > { %s5715_s11 = sshll.u32 %s343_s26, 8  ;;  %v375_v50 = vld [vmem:[%s8013_s2 + $0x1c] sm:$0xf]  ;;  %v372_v51 = vld [vmem:[%s8013_s2 + $0x10] sm:$0xf]  ;;  %v5720_v1 = vld [vmem:[%s8012_s1 + $0x20] sm:$0xff] }
  0x1d   : > { %s6157_s16 = scalar_lea.vmem %s8011_s0, %s5715_s11  ;;  %v373_v52 = vld [vmem:[%s8013_s2 + $0x14] sm:$0xf]  ;;  %v371_v61 = vld [vmem:[%s8013_s2 + $0xc] sm:$0xf]  ;;  %v370_v62 = vld [vmem:[%s8013_s2 + $0x8] sm:$0xf] }
  0x1e   : > { %v460_v4 = vld [vmem:[%s6157_s16 + $0xe0] sm:$0xff]  ;;  %v462_v5 = vld [vmem:[%s6157_s16 + $0xf0] sm:$0xff]  ;;  %v461_v6 = vld [vmem:[%s6157_s16 + $0xe8] sm:$0xff]  ;;  %s338_s12 = sand.u32 1, %s6023_s28   ;;  %s5788_s20 = sshll.u32 %s6031_s30, 8 }
  0x1f   : > { %v478_v7 = vpack.c.bf16 %v462_v5, %v460_v4  ;;  %v463_v8 = vld [vmem:[%s6157_s16 + $0xf8] sm:$0xff]  ;;  %v456_v9 = vld [vmem:[%s6157_s16 + $0xc0] sm:$0xff]  ;;  %v458_v10 = vld [vmem:[%s6157_s16 + $0xd0] sm:$0xff]  ;;  %s5323_s14 = sshll.u32 %s338_s12, 8  ;;  %s5221_s23 = scalar_lea.hbm %s8019_s8, %s5788_s20 }
  0x20   : > { %v479_v11 = vpack.c.bf16 %v463_v8, %v461_v6  ;;  %v457_v12 = vld [vmem:[%s6157_s16 + $0xc8] sm:$0xff]  ;;  %v459_v13 = vld [vmem:[%s6157_s16 + $0xd8] sm:$0xff]  ;;  %v476_v14 = vpack.c.bf16 %v458_v10, %v456_v9  ;;  %v452_v16 = vld [vmem:[%s6157_s16 + $0xa0] sm:$0xff]  ;;  %s7890_s19 = scalar_lea.vmem [#allocation5], %s5323_s14  ;;  %s5224_s30 = sshll.u32 %s5221_s23, 4  ;;  %s5225_s30 = int_to_ptr.hbm [resolvable:$true] %s5224_s30 }
  0x21   : > { %528 = vmatpush.bf16.msra.mxu0 %v478_v7  ;;  %5789 = vmatpush.bf16.msra.mxu2 %v478_v7  ;;  %v477_v15 = vpack.c.bf16 %v459_v13, %v457_v12  ;;  %v454_v17 = vld [vmem:[%s6157_s16 + $0xb0] sm:$0xff]  ;;  %v453_v18 = vld [vmem:[%s6157_s16 + $0xa8] sm:$0xff]  ;;  %v455_v19 = vld [vmem:[%s6157_s16 + $0xb8] sm:$0xff]  ;;  %s5222_s24 = sshll.u32 %s7890_s19, 4  ;;  %s5971_s25 = sshra.s32 %s5225_s30, 4  ;;  %s5223_s24 = int_to_ptr.vmem [resolvable:$true] %s5222_s24  ;;  %s5972_s25 = int_to_ptr.hbm [resolvable:$true] %s5971_s25 }
  0x22   : > { %577 = vmatpush.bf16.msra.mxu1 %v479_v11  ;;  %5797 = vmatpush.bf16.msra.mxu3 %v479_v11  ;;  %v474_v23 = vpack.c.bf16 %v454_v17, %v452_v16  ;;  %v475_v24 = vpack.c.bf16 %v455_v19, %v453_v18  ;;  %v448_v25 = vld [vmem:[%s6157_s16 + $0x80] sm:$0xff]  ;;  %v450_v26 = vld [vmem:[%s6157_s16 + $0x90] sm:$0xff]  ;;  %v449_v27 = vld [vmem:[%s6157_s16 + $0x88] sm:$0xff]  ;;  %s5973_s26 = scalar_lea.hbm %s5972_s25, 256  ;;  %s5977_s20 = scalar_lea.hbm %s8019_s8, 512 }
  0x23   : > { %779 = vperm.xlu0 %5878, %v383_v20   ;;  %761 = vperm.xlu1 %5879, %v381_v21   ;;  %v451_v28 = vld [vmem:[%s6157_s16 + $0x98] sm:$0xff]  ;;  %v472_v29 = vpack.c.bf16 %v450_v26, %v448_v25  ;;  %v444_v31 = vld [vmem:[%s6157_s16 + $0x60] sm:$0xff]  ;;  %v446_v32 = vld [vmem:[%s6157_s16 + $0x70] sm:$0xff]  ;;  %p5974_p1 = scmp.ne.s32.totalorder %s5972_s25, %s5973_s26  ;;  %p5978_p5 = scmp.lt.s32.totalorder %s5972_s25, %s8019_s8 }
  0x24   : > { %743 = vperm.xlu2 %5880, %v379_v22   ;;  %v473_v30 = vpack.c.bf16 %v451_v28, %v449_v27  ;;  %v445_v33 = vld [vmem:[%s6157_s16 + $0x68] sm:$0xff]  ;;  %v447_v34 = vld [vmem:[%s6157_s16 + $0x78] sm:$0xff]  ;;  %v470_v38 = vpack.c.bf16 %v446_v32, %v444_v31  ;;  %v440_v40 = vld [vmem:[%s6157_s16 + $0x40] sm:$0xff]  ;;  %p5979_p6 = scmp.lt.s32.totalorder %s5977_s20, %s5973_s26 }
  0x25   : > { %529 = vmatpush.bf16.msra.mxu0 %v476_v14  ;;  %5790 = vmatpush.bf16.msra.mxu2 %v476_v14  ;;  %v471_v39 = vpack.c.bf16 %v447_v34, %v445_v33  ;;  %v442_v41 = vld [vmem:[%s6157_s16 + $0x50] sm:$0xff]  ;;  %v441_v42 = vld [vmem:[%s6157_s16 + $0x48] sm:$0xff]  ;;  %v443_v43 = vld [vmem:[%s6157_s16 + $0x58] sm:$0xff]  ;;  %p5975_p2 = pnand %p5974_p1, %p6134_p4 }
  0x26   : > { %578 = vmatpush.bf16.msra.mxu1 %v477_v15  ;;  %5798 = vmatpush.bf16.msra.mxu3 %v477_v15  ;;  %v468_v44 = vpack.c.bf16 %v442_v41, %v440_v40  ;;  %v469_v45 = vpack.c.bf16 %v443_v43, %v441_v42  ;;  %v436_v46 = vld [vmem:[%s6157_s16 + $0x20] sm:$0xff]  ;;  %v438_v47 = vld [vmem:[%s6157_s16 + $0x30] sm:$0xff]  ;;  %v437_v48 = vld [vmem:[%s6157_s16 + $0x28] sm:$0xff]  ;;  %p5980_p7 = por %p5979_p6, %p5978_p5 }
  0x27   : > { %v439_v49 = vld [vmem:[%s6157_s16 + $0x38] sm:$0xff]  ;;  %v466_v53 = vpack.c.bf16 %v438_v47, %v436_v46  ;;  %v432_v55 = vld [vmem:[%s6157_s16] sm:$0xff]  ;;  %v434_v56 = vld [vmem:[%s6157_s16 + $0x10] sm:$0xff]  ;;  %p5976_p3 = pneg %p5975_p2 }
  0x28   : > { %v467_v54 = vpack.c.bf16 %v439_v49, %v437_v48  ;;  %v433_v57 = vld [vmem:[%s6157_s16 + $0x8] sm:$0xff]  ;;  %v435_v58 = vld [vmem:[%s6157_s16 + $0x18] sm:$0xff]  ;;  %v464_v59 = vpack.c.bf16 %v434_v56, %v432_v55  ;;  %v368_v0 = vld [vmem:[%s8013_s2] sm:$0xf] }
  0x29   : > { %530 = vmatpush.bf16.msra.mxu0 %v474_v23  ;;  %5791 = vmatpush.bf16.msra.mxu2 %v474_v23  ;;  %v465_v60 = vpack.c.bf16 %v435_v58, %v433_v57  ;;  %v992_v2 = vld [vmem:[%s8015_s4 + $0x38] sm:$0xf]  ;;  %v369_v3 = vld [vmem:[%s8013_s2 + $0x4] sm:$0xf]  ;;  %v993_v4 = vld [vmem:[%s8015_s4 + $0x3c] sm:$0xf]  ;;  %p5981_p9 = pnand %p5980_p7, %p5976_p3 }
  0x2a   : > { %579 = vmatpush.bf16.msra.mxu1 %v475_v24  ;;  %5799 = vmatpush.bf16.msra.mxu3 %v475_v24  ;;  %v991_v5 = vld [vmem:[%s8015_s4 + $0x34] sm:$0xf]  ;;  %v990_v6 = vld [vmem:[%s8015_s4 + $0x30] sm:$0xf]  ;;  %v5717_v7 = vld [vmem:[%s8012_s1 + $0x8] sm:$0xff] }
  0x2b   : > { %725 = vperm.xlu1 %5879, %v377_v35   ;;  %716 = vperm.xlu0 %5878, %v376_v36   ;;  %v988_v8 = vld [vmem:[%s8015_s4 + $0x28] sm:$0xf]  ;;  %v986_v10 = vld [vmem:[%s8015_s4 + $0x20] sm:$0xf]  ;;  %v989_v11 = vld [vmem:[%s8015_s4 + $0x2c] sm:$0xf] }
  0x2c   : > { %698 = vperm.xlu2 %5880, %v374_v37   ;;  %v5721_v9 = vld [vmem:[%s8012_s1 + $0x28] sm:$0xff]  ;;  %v987_v12 = vld [vmem:[%s8015_s4 + $0x24] sm:$0xf]  ;;  %v985_v13 = vld [vmem:[%s8015_s4 + $0x1c] sm:$0xf] }
  0x2d   : > { %531 = vmatpush.bf16.msra.mxu0 %v472_v29  ;;  %5792 = vmatpush.bf16.msra.mxu2 %v472_v29  ;;  %v984_v14 = vld [vmem:[%s8015_s4 + $0x18] sm:$0xf]  ;;  %v5718_v15 = vld [vmem:[%s8012_s1 + $0x10] sm:$0xff]  ;;  %v980_v18 = vld [vmem:[%s8015_s4 + $0x8] sm:$0xf] }
  0x2e   : > { %580 = vmatpush.bf16.msra.mxu1 %v473_v30  ;;  %5800 = vmatpush.bf16.msra.mxu3 %v473_v30  ;;  %v982_v16 = vld [vmem:[%s8015_s4 + $0x10] sm:$0xf]  ;;  %v983_v19 = vld [vmem:[%s8015_s4 + $0x14] sm:$0xf]  ;;  %v981_v20 = vld [vmem:[%s8015_s4 + $0xc] sm:$0xf] }
  0x2f   : > { %v5722_v17 = vld [vmem:[%s8012_s1 + $0x30] sm:$0xff]  ;;  %v979_v21 = vld [vmem:[%s8015_s4 + $0x4] sm:$0xf]  ;;  %v978_v22 = vld [vmem:[%s8015_s4] sm:$0xf] }
  0x30   : > { %v5719_v23 = vld [vmem:[%s8012_s1 + $0x18] sm:$0xff]  ;;  %v5402_v26 = vld [vmem:[%s8015_s4 + $0x70] sm:$0xf]  ;;  %v5403_v28 = vld [vmem:[%s8015_s4 + $0x74] sm:$0xf] }
  0x31   : > { %532 = vmatpush.bf16.msra.mxu0 %v470_v38  ;;  %5793 = vmatpush.bf16.msra.mxu2 %v470_v38  ;;  %v5404_v24 = vld [vmem:[%s8015_s4 + $0x78] sm:$0xf]  ;;  %v5405_v27 = vld [vmem:[%s8015_s4 + $0x7c] sm:$0xf]  ;;  %v5401_v29 = vld [vmem:[%s8015_s4 + $0x6c] sm:$0xf] }
  0x32   : > { %581 = vmatpush.bf16.msra.mxu1 %v471_v39  ;;  %5801 = vmatpush.bf16.msra.mxu3 %v471_v39  ;;  %v5723_v25 = vld [vmem:[%s8012_s1 + $0x38] sm:$0xff]  ;;  %v5400_v30 = vld [vmem:[%s8015_s4 + $0x68] sm:$0xf]  ;;  %v5398_v31 = vld [vmem:[%s8015_s4 + $0x60] sm:$0xf] }
  0x33   : > { %707 = vperm.xlu0 %5878, %v375_v50   ;;  %680 = vperm.xlu1 %5879, %v372_v51   ;;  %v5396_v32 = vld [vmem:[%s8015_s4 + $0x58] sm:$0xf]  ;;  %v5399_v33 = vld [vmem:[%s8015_s4 + $0x64] sm:$0xf]  ;;  %v5397_v34 = vld [vmem:[%s8015_s4 + $0x5c] sm:$0xf] }
  0x34   : > { %689 = vperm.xlu2 %5880, %v373_v52   ;;  %v5395_v35 = vld [vmem:[%s8015_s4 + $0x54] sm:$0xf]  ;;  %v5394_v36 = vld [vmem:[%s8015_s4 + $0x50] sm:$0xf]  ;;  %v5392_v37 = vld [vmem:[%s8015_s4 + $0x48] sm:$0xf] }
  0x35   : > { %533 = vmatpush.bf16.msra.mxu0 %v468_v44  ;;  %5794 = vmatpush.bf16.msra.mxu2 %v468_v44  ;;  %v5390_v38 = vld [vmem:[%s8015_s4 + $0x40] sm:$0xf]  ;;  %v5393_v39 = vld [vmem:[%s8015_s4 + $0x4c] sm:$0xf]  ;;  %v5391_v40 = vld [vmem:[%s8015_s4 + $0x44] sm:$0xf] }
  0x36   : > { %582 = vmatpush.bf16.msra.mxu1 %v469_v45  ;;  %5802 = vmatpush.bf16.msra.mxu3 %v469_v45  ;;  %v5453_v41 = vld [vmem:[%s8015_s4 + $0xbc] sm:$0xf]  ;;  %v5452_v42 = vld [vmem:[%s8015_s4 + $0xb8] sm:$0xf]  ;;  %v5450_v43 = vld [vmem:[%s8015_s4 + $0xb0] sm:$0xf] }
  0x37   : > { %v5448_v44 = vld [vmem:[%s8015_s4 + $0xa8] sm:$0xf]  ;;  %v5451_v45 = vld [vmem:[%s8015_s4 + $0xb4] sm:$0xf]  ;;  %v5449_v46 = vld [vmem:[%s8015_s4 + $0xac] sm:$0xf] }
  0x38   : > { %v5447_v47 = vld [vmem:[%s8015_s4 + $0xa4] sm:$0xf]  ;;  %v5446_v48 = vld [vmem:[%s8015_s4 + $0xa0] sm:$0xf]  ;;  %v5444_v49 = vld [vmem:[%s8015_s4 + $0x98] sm:$0xf] }
  0x39   : > { %534 = vmatpush.bf16.msra.mxu0 %v466_v53  ;;  %5795 = vmatpush.bf16.msra.mxu2 %v466_v53  ;;  %v5442_v50 = vld [vmem:[%s8015_s4 + $0x90] sm:$0xf]  ;;  %v5445_v51 = vld [vmem:[%s8015_s4 + $0x9c] sm:$0xf]  ;;  %v5443_v52 = vld [vmem:[%s8015_s4 + $0x94] sm:$0xf] }
  0x3a   : > { %583 = vmatpush.bf16.msra.mxu1 %v467_v54  ;;  %5803 = vmatpush.bf16.msra.mxu3 %v467_v54  ;;  %v5441_v53 = vld [vmem:[%s8015_s4 + $0x8c] sm:$0xf]  ;;  %v5440_v54 = vld [vmem:[%s8015_s4 + $0x88] sm:$0xf]  ;;  %v5438_v56 = vld [vmem:[%s8015_s4 + $0x80] sm:$0xf] }
  0x3b   : > { %671 = vperm.xlu1 %5879, %v371_v61   ;;  %662 = vperm.xlu0 %5878, %v370_v62   ;;  %v5439_v61 = vld [vmem:[%s8015_s4 + $0x84] sm:$0xf] }
  0x3c   : > { %644 = vperm.xlu2 %5880, %v368_v0  }
  0x3d   : > { %535 = vmatpush.bf16.msra.mxu0 %v464_v59  ;;  %5796 = vmatpush.bf16.msra.mxu2 %v464_v59 }
  0x3e   : > { %584 = vmatpush.bf16.msra.mxu1 %v465_v60  ;;  %5804 = vmatpush.bf16.msra.mxu3 %v465_v60  ;;  %v5500_v60 = vld [vmem:[%s8015_s4 + $0xf8] sm:$0xf] }
  0x40   : > { %536 = vmatmul.bf16.vlgmr.msra.gmra.mxu0 %v5716_v63  ;;  %556 = vmatmul.bf16.vlgmr.msra.gmra.mxu2 %v5720_v1 }
  0x41   : > { %585 = vmatmul.bf16.vlgmr.msra.gmra.mxu1 %v5716_v63  ;;  %605 = vmatmul.bf16.vlgmr.msra.gmra.mxu3 %v5720_v1  ;;  %v5501_v63 = vld [vmem:[%s8015_s4 + $0xfc] sm:$0xf] }
  0x43   : > { %1284 = vperm.xlu1 %5879, %v992_v2   ;;  %653 = vperm.xlu0 %5878, %v369_v3  }
  0x44   : > { %1293 = vperm.xlu2 %5880, %v993_v4   ;;  %v5499_v4 = vld [vmem:[%s8015_s4 + $0xf4] sm:$0xf] }
  0x4b   : > { %1275 = vperm.xlu1 %5879, %v991_v5   ;;  %1266 = vperm.xlu0 %5878, %v990_v6   ;;  %v5498_v5 = vld [vmem:[%s8015_s4 + $0xf0] sm:$0xf] }
  0x4c   : > { %1248 = vperm.xlu2 %5880, %v988_v8  }
  0x50   : > { %541 = vmatmul.bf16.gmra.mxu0 %v5717_v7  ;;  %561 = vmatmul.bf16.gmra.mxu2 %v5721_v9 }
  0x51   : > { %590 = vmatmul.bf16.gmra.mxu1 %v5717_v7  ;;  %610 = vmatmul.bf16.gmra.mxu3 %v5721_v9  ;;  %v5496_v7 = vld [vmem:[%s8015_s4 + $0xe8] sm:$0xf] }
  0x53   : > { %1230 = vperm.xlu1 %5879, %v986_v10   ;;  %1257 = vperm.xlu0 %5878, %v989_v11  }
  0x54   : > { %1239 = vperm.xlu2 %5880, %v987_v12  }
  0x5b   : > { %1221 = vperm.xlu1 %5879, %v985_v13   ;;  %1212 = vperm.xlu0 %5878, %v984_v14   ;;  %v5494_v14 = vld [vmem:[%s8015_s4 + $0xe0] sm:$0xf] }
  0x5c   : > { %1194 = vperm.xlu2 %5880, %v982_v16  }
  0x60   : > { %546 = vmatmul.bf16.gmra.mxu0 %v5718_v15  ;;  %566 = vmatmul.bf16.gmra.mxu2 %v5722_v17 }
  0x61   : > { %595 = vmatmul.bf16.gmra.mxu1 %v5718_v15  ;;  %615 = vmatmul.bf16.gmra.mxu3 %v5722_v17  ;;  %v5497_v15 = vld [vmem:[%s8015_s4 + $0xec] sm:$0xf]  ;;  %v5495_v17 = vld [vmem:[%s8015_s4 + $0xe4] sm:$0xf] }
  0x63   : > { %1176 = vperm.xlu1 %5879, %v980_v18   ;;  %1203 = vperm.xlu0 %5878, %v983_v19  }
  0x64   : > { %1185 = vperm.xlu2 %5880, %v981_v20  }
  0x6b   : > { %1167 = vperm.xlu1 %5879, %v979_v21   ;;  %1158 = vperm.xlu0 %5878, %v978_v22  }
  0x6c   : > { %1800 = vperm.xlu2 %5880, %v5404_v24   ;;  %v5493_v24 = vld [vmem:[%s8015_s4 + $0xdc] sm:$0xf] }
  0x70   : > { %551 = vmatmul.bf16.gmra.mxu0 %v5719_v23  ;;  %571 = vmatmul.bf16.gmra.mxu2 %v5723_v25 }
  0x71   : > { %600 = vmatmul.bf16.gmra.mxu1 %v5719_v23  ;;  %620 = vmatmul.bf16.gmra.mxu3 %v5723_v25  ;;  %v5492_v25 = vld [vmem:[%s8015_s4 + $0xd8] sm:$0xf] }
  0x73   : > { %1782 = vperm.xlu1 %5879, %v5402_v26   ;;  %1809 = vperm.xlu0 %5878, %v5405_v27   ;;  %v5490_v27 = vld [vmem:[%s8015_s4 + $0xd0] sm:$0xf] }
  0x74   : > { %1791 = vperm.xlu2 %5880, %v5403_v28  }
  0x75   : > { %v6434_v8 = vpop.permute.xlu2 %734 }
  0x7b   : > { %1773 = vperm.xlu1 %5879, %v5401_v29   ;;  %1764 = vperm.xlu0 %5878, %v5400_v30  }
  0x7c   : > { %1746 = vperm.xlu2 %5880, %v5398_v31  }
  0x7e   : > { %v744_v18 = vpop.permute.xlu2 %743 }
  0x83   : > { %1728 = vperm.xlu1 %5879, %v5396_v32   ;;  %1755 = vperm.xlu0 %5878, %v5399_v33   ;;  %v5488_v33 = vld [vmem:[%s8015_s4 + $0xc8] sm:$0xf] }
  0x84   : > { %1737 = vperm.xlu2 %5880, %v5397_v34   ;;  %v5491_v34 = vld [vmem:[%s8015_s4 + $0xd4] sm:$0xf] }
  0x86   : > { %v699_v28 = vpop.permute.xlu2 %698 }
  0x8b   : > { %1719 = vperm.xlu1 %5879, %v5395_v35   ;;  %1710 = vperm.xlu0 %5878, %v5394_v36  }
  0x8c   : > { %1692 = vperm.xlu2 %5880, %v5392_v37   ;;  %v6438_v10 = vpop.permute.xlu1 %752  ;;  %v5489_v37 = vld [vmem:[%s8015_s4 + $0xcc] sm:$0xf] }
  0x8d   : > { %v6436_v9 = vpop.permute.xlu0 %770 }
  0x93   : > { %1674 = vperm.xlu1 %5879, %v5390_v38   ;;  %1701 = vperm.xlu0 %5878, %v5393_v39   ;;  %v6045_v38 = vmov 839922192  }
  0x94   : > { %1683 = vperm.xlu2 %5880, %v5391_v40   ;;  %v648_v39 = vunpack.c.l.s4 %v6045_v38 }
  0x95   : > { %v6457_v19 = vpop.permute.xlu0 %779  ;;  %v6459_v20 = vpop.permute.xlu1 %761 }
  0x9b   : > { %2405 = vperm.xlu1 %5879, %v5453_v41   ;;  %2396 = vperm.xlu0 %5878, %v5452_v42   ;;  %v5487_v41 = vld [vmem:[%s8015_s4 + $0xc4] sm:$0xf]  ;;  %v5486_v42 = vld [vmem:[%s8015_s4 + $0xc0] sm:$0xf] }
  0x9c   : > { %2378 = vperm.xlu2 %5880, %v5450_v43   ;;  %v690_v43 = vpop.permute.xlu2 %689 }
  0x9d   : > { %v6478_v29 = vpop.permute.xlu1 %725  ;;  %v717_v30 = vpop.permute.xlu0 %716 }
  0xa3   : > { %2360 = vperm.xlu1 %5879, %v5448_v44   ;;  %2387 = vperm.xlu0 %5878, %v5451_v45   ;;  %v5548_v45 = vld [vmem:[%s8015_s4 + $0x138] sm:$0xf] }
  0xa4   : > { %2369 = vperm.xlu2 %5880, %v5449_v46  }
  0xa5   : > { %v708_v46 = vpop.permute.xlu0 %707 }
  0xab   : > { %2351 = vperm.xlu1 %5879, %v5447_v47   ;;  %2342 = vperm.xlu0 %5878, %v5446_v48   ;;  %v681_v47 = vpop.permute.xlu1 %680  ;;  %v6506_v48 = vunpack.c.0.s8 %v648_v39 }
  0xac   : > { %2324 = vperm.xlu2 %5880, %v5444_v49  }
  0xb3   : > { %2306 = vperm.xlu1 %5879, %v5442_v50   ;;  %2333 = vperm.xlu0 %5878, %v5445_v51   ;;  %v740_v51 = vperm.slane %v6434_v8, %v6506_v48  ;;  %v785_v8 = vperm.slane %v6457_v19, %v6506_v48  ;;  %v672_v19 = vpop.permute.xlu1 %671 }
  0xb4   : > { %2315 = vperm.xlu2 %5880, %v5443_v52   ;;  %v749_v52 = vperm.slane %v744_v18, %v6506_v48 }
  0xb5   : > { %v833_v39 = vunpack.c.l.bf16 %v785_v8 }
  0xbb   : > { %2297 = vperm.xlu1 %5879, %v5441_v53   ;;  %2288 = vperm.xlu0 %5878, %v5440_v54   ;;  %v704_v53 = vperm.slane %v699_v28, %v6506_v48  ;;  %v776_v54 = vperm.slane %v6436_v9, %v6506_v48  ;;  %v767_v9 = vperm.slane %v6459_v20, %v6506_v48  ;;  %v663_v28 = vpop.permute.xlu0 %662 }
  0xbc   : > { %2270 = vperm.xlu2 %5880, %v5438_v56   ;;  %v758_v56 = vperm.slane %v6438_v10, %v6506_v48 }
  0xbd   : > { %v537_v55 = vpop.f32.mrf.mxu0  ;;  %v832_v10 = vunpack.c.l.bf16 %v776_v54 }
  0xbe   : > { %v586_v57 = vpop.f32.mrf.mxu1 }
  0xbf   : > { %v6404_v58 = vpack.c.bf16 %v586_v57, %v537_v55  ;;  %v722_v55 = vperm.slane %v717_v30, %v6506_v48 }
  0xc3   : > { %v557_v59 = vpop.f32.mrf.mxu2  ;;  %2912 = vperm.xlu1 %5879, %v5500_v60   ;;  %2279 = vperm.xlu0 %5878, %v5439_v61   ;;  %v5549_v60 = vld [vmem:[%s8015_s4 + $0x13c] sm:$0xf]  ;;  %v6527_v61 = vunpack.c.l.bf16 %v740_v51 }
  0xc4   : > { %v606_v62 = vpop.f32.mrf.mxu3  ;;  %2921 = vperm.xlu2 %5880, %v5501_v63  }
  0xc5   : > { %v6415_v0 = vpack.c.bf16 %v606_v62, %v557_v59  ;;  %v6417_v1 = vpop.f32.mrf.mxu0  ;;  %v5546_v59 = vld [vmem:[%s8015_s4 + $0x130] sm:$0xf]  ;;  %v695_v62 = vperm.slane %v690_v43, %v6506_v48 }
  0xc6   : > { %v6419_v2 = vpop.f32.mrf.mxu1 }
  0xc7   : > { %v802_v18 = vunpack.c.l.bf16 %v6415_v0  ;;  %v6548_v20 = vunpack.c.l.bf16 %v695_v62  ;;  %v803_v43 = vunpack.c.h.bf16 %v6415_v0  ;;  %v5545_v0 = vld [vmem:[%s8015_s4 + $0x12c] sm:$0xf] }
  0xcb   : > { %v6421_v3 = vpop.f32.mrf.mxu2  ;;  %2903 = vperm.xlu1 %5879, %v5499_v4   ;;  %2894 = vperm.xlu0 %5878, %v5498_v5   ;;  %v5547_v4 = vld [vmem:[%s8015_s4 + $0x134] sm:$0xf]  ;;  %v6533_v5 = vunpack.c.l.bf16 %v749_v52 }
  0xcc   : > { %v6429_v6 = vpop.f32.mrf.mxu3  ;;  %2876 = vperm.xlu2 %5880, %v5496_v7   ;;  %v6535_v7 = vunpack.c.l.bf16 %v704_v53 }
  0xcd   : > { %v6440_v11 = vpop.f32.mrf.mxu0 }
  0xce   : > { %v6442_v12 = vpop.f32.mrf.mxu1 }
  0xd3   : > { %v6444_v13 = vpop.f32.mrf.mxu2  ;;  %2858 = vperm.xlu1 %5879, %v5494_v14   ;;  %2885 = vperm.xlu0 %5878, %v5497_v15   ;;  %v6541_v14 = vpop.permute.xlu2 %644  ;;  %v731_v15 = vperm.slane %v6478_v29, %v6506_v48  ;;  %v668_v29 = vperm.slane %v663_v28, %v6506_v48 }
  0xd4   : > { %v6452_v16 = vpop.f32.mrf.mxu3  ;;  %2867 = vperm.xlu2 %5880, %v5495_v17   ;;  %v826_v17 = vunpack.c.l.bf16 %v722_v55 }
  0xd5   : > { %v6461_v21 = vpop.f32.mrf.mxu0 }
  0xd6   : > { %v6463_v22 = vpop.f32.mrf.mxu1  ;;  %v6561_v51 = vadd.f32 %v826_v17, %v802_v18 }
  0xdb   : > { %v6465_v23 = vpop.f32.mrf.mxu2  ;;  %2849 = vperm.xlu1 %5879, %v5493_v24   ;;  %2840 = vperm.xlu0 %5878, %v5492_v25   ;;  %v830_v24 = vunpack.c.l.bf16 %v758_v56  ;;  %v713_v25 = vperm.slane %v708_v46, %v6506_v48 }
  0xdc   : > { %v6473_v26 = vpop.f32.mrf.mxu3  ;;  %2822 = vperm.xlu2 %5880, %v5490_v27   ;;  %v686_v27 = vperm.slane %v681_v47, %v6506_v48 }
  0xdd   : > { %v6480_v31 = vpop.f32.mrf.mxu0  ;;  %v637_v46 = vpack.c.bf16 %v6473_v26, %v6465_v23  ;;  %v5544_v23 = vld [vmem:[%s8015_s4 + $0x128] sm:$0xf] }
  0xde   : > { %v6490_v35 = vpop.f32.mrf.mxu1 }
  0xdf   : > { %v809_v28 = vunpack.c.h.bf16 %v637_v46 }
  0xe3   : > { %v6482_v32 = vpop.f32.mrf.mxu2  ;;  %2804 = vperm.xlu1 %5879, %v5488_v33   ;;  %2831 = vperm.xlu0 %5878, %v5491_v34   ;;  %v677_v33 = vperm.slane %v672_v19, %v6506_v48 }
  0xe4   : > { %v6492_v36 = vpop.f32.mrf.mxu3  ;;  %2813 = vperm.xlu2 %5880, %v5489_v37  }
  0xe5   : > { %v6508_v49 = vpop.f32.mrf.mxu0  ;;  %v638_v47 = vpack.c.bf16 %v6492_v36, %v6482_v32  ;;  %v6573_v26 = vunpack.c.l.bf16 %v677_v33  ;;  %v6575_v32 = vunpack.c.l.bf16 %v668_v29  ;;  %v635_v36 = vpack.c.bf16 %v6429_v6, %v6421_v3 }
  0xe6   : > { %v6510_v50 = vpop.f32.mrf.mxu1  ;;  %v930_v3 = vmax.f32 %v6561_v51, 0.0 }
  0xe7   : > { %v810_v8 = vunpack.c.l.bf16 %v638_v47  ;;  %v805_v19 = vunpack.c.h.bf16 %v635_v36 }
  0xeb   : > { %v569_v40 = vpop.f32.mrf.mxu2  ;;  %2795 = vperm.xlu1 %5879, %v5487_v41   ;;  %2786 = vperm.xlu0 %5878, %v5486_v42   ;;  %v831_v41 = vunpack.c.l.bf16 %v767_v9  ;;  %v650_v42 = vperm.slane %v6541_v14, %v6506_v48  ;;  %v811_v9 = vunpack.c.h.bf16 %v638_v47  ;;  %v5540_v47 = vld [vmem:[%s8015_s4 + $0x118] sm:$0xf] }
  0xec   : > { %v618_v44 = vpop.f32.mrf.mxu3  ;;  %3428 = vperm.xlu2 %5880, %v5548_v45   ;;  %v6555_v45 = vunpack.c.l.bf16 %v731_v15 }
  0xed   : > { %v639_v34 = vpack.c.bf16 %v618_v44, %v569_v40  ;;  %v552_v37 = vpop.f32.mrf.mxu0  ;;  %v6563_v40 = vunpack.c.l.bf16 %v713_v25  ;;  %v6565_v44 = vunpack.c.l.bf16 %v686_v27  ;;  %v804_v27 = vunpack.c.l.bf16 %v635_v36 }
  0xee   : > { %v601_v38 = vpop.f32.mrf.mxu1 }
  0xef   : > { %v812_v55 = vunpack.c.l.bf16 %v639_v34 }
  0xf3   : > { %v572_v57 = vpop.f32.mrf.mxu2  ;;  %3410 = vperm.xlu1 %5879, %v5546_v59   ;;  %3437 = vperm.xlu0 %5878, %v5549_v60   ;;  %v636_v59 = vpack.c.bf16 %v6452_v16, %v6444_v13  ;;  %v813_v60 = vunpack.c.h.bf16 %v639_v34  ;;  %v860_v13 = vadd.f32 %v831_v41, %v812_v55  ;;  %v857_v55 = vadd.f32 %v6533_v5, %v809_v28 }
  0xf4   : > { %v621_v63 = vpop.f32.mrf.mxu3  ;;  %3419 = vperm.xlu2 %5880, %v5547_v4   ;;  %v808_v4 = vunpack.c.l.bf16 %v637_v46 }
  0xf5   : > { %v640_v30 = vpack.c.bf16 %v621_v63, %v572_v57  ;;  %v5542_v57 = vld [vmem:[%s8015_s4 + $0x120] sm:$0xf]  ;;  %v6584_v63 = vadd.f32 %v826_v17, %v803_v43  ;;  %v806_v16 = vunpack.c.l.bf16 %v636_v59  ;;  %v861_v33 = vadd.f32 %v831_v41, %v813_v60  ;;  %v554_v34 = vpop.f32.mrf.mxu0 }
  0xf6   : > { %v807_v29 = vunpack.c.h.bf16 %v636_v59  ;;  %v603_v43 = vpop.f32.mrf.mxu1  ;;  %v632_v41 = vpack.c.bf16 %v601_v38, %v552_v37  ;;  %v940_v36 = vmax.f32 %v860_v13, 0.0  ;;  %v853_v37 = vadd.f32 %v6555_v45, %v805_v19 }
  0xf7   : > { %v814_v52 = vunpack.c.l.bf16 %v640_v30  ;;  %v815_v53 = vunpack.c.h.bf16 %v640_v30  ;;  %v630_v38 = vpack.c.bf16 %v6490_v35, %v6480_v31  ;;  %v937_v28 = vmax.f32 %v857_v55, 0.0 }
  0xf9   : > { %v862_v18 = vadd.f32 %v832_v10, %v814_v52  ;;  %v863_v25 = vadd.f32 %v832_v10, %v815_v53  ;;  %v856_v52 = vadd.f32 %v6533_v5, %v808_v4  ;;  %v854_v4 = vadd.f32 %v6527_v61, %v806_v16 }
  0xfa   : > { %v931_v5 = vmax.f32 %v6584_v63, 0.0  ;;  %v628_v63 = vpack.c.bf16 %v6442_v12, %v6440_v11 }
  0xfb   : > { %v574_v54 = vpop.f32.mrf.mxu2  ;;  %3401 = vperm.xlu1 %5879, %v5545_v0   ;;  %3392 = vperm.xlu0 %5878, %v5544_v23   ;;  %v859_v0 = vadd.f32 %v830_v24, %v811_v9  ;;  %v942_v10 = vmax.f32 %v862_v18, 0.0  ;;  %v943_v23 = vmax.f32 %v863_v25, 0.0  ;;  %v631_v18 = vpack.c.bf16 %v6510_v50, %v6508_v49  ;;  %v5539_v49 = vld [vmem:[%s8015_s4 + $0x114] sm:$0xf]  ;;  %v5538_v50 = vld [vmem:[%s8015_s4 + $0x110] sm:$0xf] }
  0xfc   : > { %v623_v56 = vpop.f32.mrf.mxu3  ;;  %3374 = vperm.xlu2 %5880, %v5542_v57   ;;  %v633_v57 = vpack.c.bf16 %v603_v43, %v554_v34  ;;  %v798_v25 = vunpack.c.l.bf16 %v632_v41  ;;  %v934_v31 = vmax.f32 %v854_v4, 0.0 }
  0xfd   : > { %v641_v62 = vpack.c.bf16 %v623_v56, %v574_v54  ;;  %v858_v54 = vadd.f32 %v830_v24, %v810_v8  ;;  %v852_v56 = vadd.f32 %v6555_v45, %v804_v27  ;;  %v5541_v24 = vld [vmem:[%s8015_s4 + $0x11c] sm:$0xf]  ;;  %v855_v8 = vadd.f32 %v6527_v61, %v807_v29 }
  0xfe   : > { %v799_v27 = vunpack.c.h.bf16 %v632_v41  ;;  %v800_v61 = vunpack.c.l.bf16 %v633_v57  ;;  %v801_v13 = vunpack.c.h.bf16 %v633_v57  ;;  %v933_v29 = vmax.f32 %v853_v37, 0.0 }
  0xff   : > { %v816_v6 = vunpack.c.l.bf16 %v641_v62  ;;  %v817_v15 = vunpack.c.h.bf16 %v641_v62  ;;  %v941_v62 = vmax.f32 %v861_v33, 0.0  ;;  %v938_v9 = vmax.f32 %v858_v54, 0.0 }
 0x100   : > { %v935_v35 = vmax.f32 %v855_v8, 0.0  ;;  %v932_v16 = vmax.f32 %v852_v56, 0.0  ;;  %v795_v33 = vunpack.c.h.bf16 %v630_v38  ;;  %v796_v11 = vunpack.c.l.bf16 %v631_v18 }
 0x101   : > { %v864_v30 = vadd.f32 %v833_v39, %v816_v6  ;;  %v865_v17 = vadd.f32 %v833_v39, %v817_v15  ;;  %v5543_v39 = vld [vmem:[%s8015_s4 + $0x124] sm:$0xf]  ;;  %v939_v6 = vmax.f32 %v859_v0, 0.0  ;;  %v936_v15 = vmax.f32 %v856_v52, 0.0 }
 0x102   : > { %v958_v45 = vpack.c.bf16 %v940_v36, %v938_v9  ;;  %v797_v12 = vunpack.c.h.bf16 %v631_v18  ;;  %v957_v43 = vpack.c.bf16 %v937_v28, %v935_v35  ;;  %v848_v54 = vadd.f32 %v6563_v40, %v800_v61  ;;  %v5597_v35 = vld [vmem:[%s8015_s4 + $0x17c] sm:$0xf] }
 0x103   : > { %v944_v53 = vmax.f32 %v864_v30, 0.0  ;;  %v945_v46 = vmax.f32 %v865_v17, 0.0  ;;  %3356 = vperm.xlu1 %5879, %v5540_v47   ;;  %3383 = vperm.xlu0 %5878, %v5543_v39   ;;  %v959_v19 = vpack.c.bf16 %v941_v62, %v939_v6  ;;  %v629_v30 = vpack.c.bf16 %v6463_v22, %v6461_v21  ;;  %v654_v47 = vpop.permute.xlu0 %653  ;;  %v5536_v21 = vld [vmem:[%s8015_s4 + $0x108] sm:$0xf] }
 0x104   : > { %3365 = vperm.xlu2 %5880, %v5541_v24   ;;  %v794_v17 = vunpack.c.l.bf16 %v630_v38  ;;  %v956_v34 = vpack.c.bf16 %v936_v15, %v934_v31  ;;  %v846_v22 = vadd.f32 %v6535_v7, %v798_v25  ;;  %v847_v0 = vadd.f32 %v6535_v7, %v799_v27  ;;  %v5535_v15 = vld [vmem:[%s8015_s4 + $0x104] sm:$0xf] }
 0x105   : > { %v960_v59 = vpack.c.bf16 %v944_v53, %v942_v10  ;;  %v961_v60 = vpack.c.bf16 %v945_v46, %v943_v23  ;;  %v849_v52 = vadd.f32 %v6563_v40, %v801_v13  ;;  %v659_v10 = vperm.slane %v654_v47, %v6506_v48  ;;  %v5592_v47 = vld [vmem:[%s8015_s4 + $0x168] sm:$0xf] }
 0x106   : > { %v627_v53 = vpack.c.bf16 %v6419_v2, %v6417_v1  ;;  %v790_v23 = vunpack.c.l.bf16 %v628_v63  ;;  %v791_v46 = vunpack.c.h.bf16 %v628_v63  ;;  %v792_v39 = vunpack.c.l.bf16 %v629_v30 }
 0x107   : > { %1042 = vmatpush.bf16.msrb.mxu2 %v960_v59  ;;  %1091 = vmatpush.bf16.msrb.mxu3 %v961_v60  ;;  %v793_v41 = vunpack.c.h.bf16 %v629_v30  ;;  %v954_v36 = vpack.c.bf16 %v932_v16, %v930_v3  ;;  %v955_v55 = vpack.c.bf16 %v933_v29, %v931_v5  ;;  %v842_v7 = vadd.f32 %v6565_v44, %v794_v17  ;;  %v5596_v16 = vld [vmem:[%s8015_s4 + $0x178] sm:$0xf] }
 0x108   : > { %v844_v40 = vadd.f32 %v6548_v20, %v796_v11  ;;  %v843_v56 = vadd.f32 %v6565_v44, %v795_v33  ;;  %v845_v1 = vadd.f32 %v6548_v20, %v797_v12  ;;  %v926_v2 = vmax.f32 %v846_v22, 0.0  ;;  %v5534_v20 = vld [vmem:[%s8015_s4 + $0x100] sm:$0xf]  ;;  %v5537_v44 = vld [vmem:[%s8015_s4 + $0x10c] sm:$0xf] }
 0x109   : > { %v928_v57 = vmax.f32 %v848_v54, 0.0  ;;  %v927_v59 = vmax.f32 %v847_v0, 0.0  ;;  %v929_v60 = vmax.f32 %v849_v52, 0.0  ;;  %v818_v24 = vunpack.c.l.bf16 %v650_v42  ;;  %v5593_v22 = vld [vmem:[%s8015_s4 + $0x16c] sm:$0xf] }
 0x10a   : > { %v819_v51 = vunpack.c.l.bf16 %v659_v10  ;;  %v786_v3 = vunpack.c.l.bf16 %v6404_v58  ;;  %v787_v62 = vunpack.c.h.bf16 %v6404_v58  ;;  %v788_v4 = vunpack.c.l.bf16 %v627_v53  ;;  %v5591_v54 = vld [vmem:[%s8015_s4 + $0x164] sm:$0xf]  ;;  %v5590_v0 = vld [vmem:[%s8015_s4 + $0x160] sm:$0xf]  ;;  %v5588_v52 = vld [vmem:[%s8015_s4 + $0x158] sm:$0xf] }
 0x10b   : > { %1043 = vmatpush.bf16.msrb.mxu2 %v958_v45  ;;  %1092 = vmatpush.bf16.msrb.mxu3 %v959_v19  ;;  %v789_v8 = vunpack.c.h.bf16 %v627_v53  ;;  %v838_v14 = vadd.f32 %v6575_v32, %v790_v23  ;;  %v839_v42 = vadd.f32 %v6575_v32, %v791_v46  ;;  %v922_v37 = vmax.f32 %v842_v7, 0.0  ;;  %v5733_v10 = vld [vmem:[#allocation2 + $0x8] sm:$0xff]  ;;  %v5586_v53 = vld [vmem:[%s8015_s4 + $0x150] sm:$0xf]  ;;  %v5589_v23 = vld [vmem:[%s8015_s4 + $0x15c] sm:$0xf] }
 0x10c   : > { %3347 = vperm.xlu1 %5879, %v5539_v49   ;;  %3338 = vperm.xlu0 %5878, %v5538_v50   ;;  %v923_v5 = vmax.f32 %v843_v56, 0.0  ;;  %v840_v58 = vadd.f32 %v6573_v26, %v792_v39  ;;  %v841_v38 = vadd.f32 %v6573_v26, %v793_v41  ;;  %v952_v9 = vpack.c.bf16 %v928_v57, %v926_v2  ;;  %v5594_v50 = vld [vmem:[%s8015_s4 + $0x170] sm:$0xf]  ;;  %v5587_v46 = vld [vmem:[%s8015_s4 + $0x154] sm:$0xf] }
 0x10d   : > { %3320 = vperm.xlu2 %5880, %v5536_v21   ;;  %v953_v6 = vpack.c.bf16 %v929_v60, %v927_v59  ;;  %v924_v18 = vmax.f32 %v844_v40, 0.0  ;;  %v925_v25 = vmax.f32 %v845_v1, 0.0  ;;  %v834_v27 = vadd.f32 %v818_v24, %v786_v3  ;;  %v5595_v21 = vld [vmem:[%s8015_s4 + $0x174] sm:$0xf]  ;;  %v5585_v39 = vld [vmem:[%s8015_s4 + $0x14c] sm:$0xf] }
 0x10e   : > { %v835_v32 = vadd.f32 %v818_v24, %v787_v62  ;;  %v918_v28 = vmax.f32 %v838_v14, 0.0  ;;  %v919_v61 = vmax.f32 %v839_v42, 0.0  ;;  %v836_v13 = vadd.f32 %v819_v51, %v788_v4  ;;  %v5584_v41 = vld [vmem:[%s8015_s4 + $0x148] sm:$0xf]  ;;  %v5644_v7 = vld [vmem:[%s8015_s4 + $0x1b8] sm:$0xf] }
 0x10f   : > { %1044 = vmatpush.bf16.msrb.mxu2 %v956_v34  ;;  %1093 = vmatpush.bf16.msrb.mxu3 %v957_v43  ;;  %v837_v45 = vadd.f32 %v819_v51, %v789_v8  ;;  %v950_v26 = vpack.c.bf16 %v924_v18, %v922_v37  ;;  %v951_v19 = vpack.c.bf16 %v925_v25, %v923_v5  ;;  %v920_v63 = vmax.f32 %v840_v58, 0.0  ;;  %v5732_v43 = vld [vmem:[#allocation2] sm:$0xff]  ;;  %v5645_v56 = vld [vmem:[%s8015_s4 + $0x1bc] sm:$0xf]  ;;  %v5643_v1 = vld [vmem:[%s8015_s4 + $0x1b4] sm:$0xf] }
 0x110   : > { %v921_v31 = vmax.f32 %v841_v38, 0.0  ;;  %v914_v30 = vmax.f32 %v834_v27, 0.0  ;;  %v915_v17 = vmax.f32 %v835_v32, 0.0  ;;  %v916_v29 = vmax.f32 %v836_v13, 0.0  ;;  %v5583_v40 = vld [vmem:[%s8015_s4 + $0x144] sm:$0xf] }
 0x111   : > { %v948_v33 = vpack.c.bf16 %v920_v63, %v918_v28  ;;  %v917_v11 = vmax.f32 %v837_v45, 0.0  ;;  %v5642_v2 = vld [vmem:[%s8015_s4 + $0x1b0] sm:$0xf]  ;;  %v5640_v57 = vld [vmem:[%s8015_s4 + $0x1a8] sm:$0xf]  ;;  %v5735_v59 = vld [vmem:[#allocation2 + $0x18] sm:$0xff] }
 0x112   : > { %v949_v49 = vpack.c.bf16 %v921_v31, %v919_v61  ;;  %v946_v12 = vpack.c.bf16 %v916_v29, %v914_v30  ;;  %v5638_v60 = vld [vmem:[%s8015_s4 + $0x1a0] sm:$0xf]  ;;  %v5641_v24 = vld [vmem:[%s8015_s4 + $0x1ac] sm:$0xf]  ;;  %v5639_v51 = vld [vmem:[%s8015_s4 + $0x1a4] sm:$0xf] }
 0x113   : > { %1045 = vmatpush.bf16.msrb.mxu2 %v954_v36  ;;  %1094 = vmatpush.bf16.msrb.mxu3 %v955_v55  ;;  %v947_v34 = vpack.c.bf16 %v917_v11, %v915_v17  ;;  %v5582_v36 = vld [vmem:[%s8015_s4 + $0x140] sm:$0xf]  ;;  %v5734_v55 = vld [vmem:[#allocation2 + $0x10] sm:$0xff]  ;;  %v5637_v3 = vld [vmem:[%s8015_s4 + $0x19c] sm:$0xf] }
 0x114   : > { %3302 = vperm.xlu1 %5879, %v5534_v20   ;;  %3329 = vperm.xlu0 %5878, %v5537_v44   ;;  %v5636_v62 = vld [vmem:[%s8015_s4 + $0x198] sm:$0xf]  ;;  %v5634_v4 = vld [vmem:[%s8015_s4 + $0x190] sm:$0xf]  ;;  %v5736_v8 = vld [vmem:[#allocation2 + $0x20] sm:$0xff] }
 0x115   : > { %3311 = vperm.xlu2 %5880, %v5535_v15   ;;  %v5632_v20 = vld [vmem:[%s8015_s4 + $0x188] sm:$0xf]  ;;  %v5635_v44 = vld [vmem:[%s8015_s4 + $0x194] sm:$0xf]  ;;  %v5633_v14 = vld [vmem:[%s8015_s4 + $0x18c] sm:$0xf] }
 0x116   : > { %v5631_v42 = vld [vmem:[%s8015_s4 + $0x184] sm:$0xf]  ;;  %v5630_v37 = vld [vmem:[%s8015_s4 + $0x180] sm:$0xf]  ;;  %v5737_v58 = vld [vmem:[#allocation2 + $0x28] sm:$0xff] }
 0x117   : > { %1046 = vmatpush.bf16.msrb.mxu2 %v952_v9  ;;  %1095 = vmatpush.bf16.msrb.mxu3 %v953_v6  ;;  %v400_v5 = vld [vmem:[%s8017_s6] sm:$0xff]  ;;  %v402_v38 = vld [vmem:[%s8017_s6 + $0x10] sm:$0xff]  ;;  %v401_v9 = vld [vmem:[%s8017_s6 + $0x8] sm:$0xff] }
 0x118   : > { %v403_v6 = vld [vmem:[%s8017_s6 + $0x18] sm:$0xff]  ;;  %v405_v15 = vld [vmem:[%s8017_s6 + $0x28] sm:$0xff]  ;;  %v404_v18 = vld [vmem:[%s8017_s6 + $0x20] sm:$0xff] }
 0x119   : > { %v406_v25 = vld [vmem:[%s8017_s6 + $0x30] sm:$0xff]  ;;  %v408_v32 = vld [vmem:[%s8017_s6 + $0x40] sm:$0xff]  ;;  %v407_v28 = vld [vmem:[%s8017_s6 + $0x38] sm:$0xff] }
 0x11a   : > { %v5738_v27 = vld [vmem:[#allocation2 + $0x30] sm:$0xff]  ;;  %v409_v61 = vld [vmem:[%s8017_s6 + $0x48] sm:$0xff]  ;;  %v411_v13 = vld [vmem:[%s8017_s6 + $0x58] sm:$0xff] }
 0x11b   : > { %1047 = vmatpush.bf16.msrb.mxu2 %v950_v26  ;;  %1096 = vmatpush.bf16.msrb.mxu3 %v951_v19  ;;  %v410_v45 = vld [vmem:[%s8017_s6 + $0x50] sm:$0xff]  ;;  %v412_v26 = vld [vmem:[%s8017_s6 + $0x60] sm:$0xff]  ;;  %v5739_v19 = vld [vmem:[#allocation2 + $0x38] sm:$0xff] }
 0x11c   : > { %4033 = vperm.xlu1 %5879, %v5597_v35   ;;  %4024 = vperm.xlu0 %5878, %v5596_v16   ;;  %v414_v63 = vld [vmem:[%s8017_s6 + $0x70] sm:$0xff]  ;;  %v413_v31 = vld [vmem:[%s8017_s6 + $0x68] sm:$0xff]  ;;  %v415_v35 = vld [vmem:[%s8017_s6 + $0x78] sm:$0xff] }
 0x11d   : > { %4006 = vperm.xlu2 %5880, %v5594_v50   ;;  %v417_v16 = vld [vmem:[%s8018_s7 + $0x8] sm:$0xff]  ;;  %v416_v30 = vld [vmem:[%s8018_s7] sm:$0xff]  ;;  %v418_v17 = vld [vmem:[%s8018_s7 + $0x10] sm:$0xff] }
 0x11e   : > { %v421_v50 = vld [vmem:[%s8018_s7 + $0x28] sm:$0xff] }
 0x11f   : > { %1048 = vmatpush.bf16.msrb.mxu2 %v948_v33  ;;  %1097 = vmatpush.bf16.msrb.mxu3 %v949_v49  ;;  %v420_v33 = vld [vmem:[%s8018_s7 + $0x20] sm:$0xff]  ;;  %v419_v49 = vld [vmem:[%s8018_s7 + $0x18] sm:$0xff] }
 0x123   : > { %1049 = vmatpush.bf16.msrb.mxu2 %v946_v12  ;;  %1098 = vmatpush.bf16.msrb.mxu3 %v947_v34  ;;  %v423_v34 = vld [vmem:[%s8018_s7 + $0x38] sm:$0xff] }
 0x124   : > { %3988 = vperm.xlu1 %5879, %v5592_v47   ;;  %4015 = vperm.xlu0 %5878, %v5595_v21   ;;  %v424_v47 = vld [vmem:[%s8018_s7 + $0x40] sm:$0xff] }
 0x125   : > { %3997 = vperm.xlu2 %5880, %v5593_v22  }
 0x126   : > { %1050 = vmatmul.bf16.vlgmr.msrb.gmra.mxu2 %v5732_v43  ;;  %1099 = vmatmul.bf16.vlgmr.msrb.gmra.mxu3 %v5732_v43  ;;  %v422_v43 = vld [vmem:[%s8018_s7 + $0x30] sm:$0xff] }
 0x12c   : > { %3979 = vperm.xlu1 %5879, %v5591_v54   ;;  %3970 = vperm.xlu0 %5878, %v5590_v0   ;;  %v426_v54 = vld [vmem:[%s8018_s7 + $0x50] sm:$0xff]  ;;  %v425_v0 = vld [vmem:[%s8018_s7 + $0x48] sm:$0xff] }
 0x12d   : > { %3952 = vperm.xlu2 %5880, %v5588_v52   ;;  %v427_v52 = vld [vmem:[%s8018_s7 + $0x58] sm:$0xff] }
 0x134   : > { %3934 = vperm.xlu1 %5879, %v5586_v53   ;;  %3961 = vperm.xlu0 %5878, %v5589_v23  }
 0x135   : > { %3943 = vperm.xlu2 %5880, %v5587_v46   ;;  %v429_v46 = vld [vmem:[%s8018_s7 + $0x68] sm:$0xff] }
 0x136   : > { %1055 = vmatmul.bf16.gmra.mxu2 %v5733_v10  ;;  %1104 = vmatmul.bf16.gmra.mxu3 %v5733_v10 }
 0x13c   : > { %3925 = vperm.xlu1 %5879, %v5585_v39   ;;  %3916 = vperm.xlu0 %5878, %v5584_v41   ;;  %v428_v39 = vld [vmem:[%s8018_s7 + $0x60] sm:$0xff]  ;;  %v430_v41 = vld [vmem:[%s8018_s7 + $0x70] sm:$0xff] }
 0x13d   : > { %3898 = vperm.xlu2 %5880, %v5582_v36  }
 0x144   : > { %4540 = vperm.xlu1 %5879, %v5644_v7   ;;  %3907 = vperm.xlu0 %5878, %v5583_v40   ;;  %v431_v7 = vld [vmem:[%s8018_s7 + $0x78] sm:$0xff] }
 0x145   : > { %4549 = vperm.xlu2 %5880, %v5645_v56  }
 0x146   : > { %1060 = vmatmul.bf16.gmra.mxu2 %v5734_v55  ;;  %1109 = vmatmul.bf16.gmra.mxu3 %v5734_v55 }
 0x14c   : > { %4531 = vperm.xlu1 %5879, %v5643_v1   ;;  %4522 = vperm.xlu0 %5878, %v5642_v2  }
 0x14d   : > { %4504 = vperm.xlu2 %5880, %v5640_v57  }
 0x154   : > { %4486 = vperm.xlu1 %5879, %v5638_v60   ;;  %4513 = vperm.xlu0 %5878, %v5641_v24  }
 0x155   : > { %4495 = vperm.xlu2 %5880, %v5639_v51  }
 0x156   : > { %1065 = vmatmul.bf16.gmra.mxu2 %v5735_v59  ;;  %1114 = vmatmul.bf16.gmra.mxu3 %v5735_v59 }
 0x15c   : > { %4477 = vperm.xlu1 %5879, %v5637_v3   ;;  %4468 = vperm.xlu0 %5878, %v5636_v62  }
 0x15d   : > { %4450 = vperm.xlu2 %5880, %v5634_v4  }
 0x164   : > { %4432 = vperm.xlu1 %5879, %v5632_v20   ;;  %4459 = vperm.xlu0 %5878, %v5635_v44  }
 0x165   : > { %4441 = vperm.xlu2 %5880, %v5633_v14   ;;  %v1294_v14 = vpop.permute.xlu2 %1293 }
 0x166   : > { %1070 = vmatmul.bf16.gmra.mxu2 %v5736_v8  ;;  %1119 = vmatmul.bf16.gmra.mxu3 %v5736_v8 }
 0x16c   : > { %4423 = vperm.xlu1 %5879, %v5631_v42   ;;  %4414 = vperm.xlu0 %5878, %v5630_v37  }
 0x16d   : > { %4734 = vperm.xlu2 %5880, %v400_v5   ;;  %v1285_v5 = vpop.permute.xlu1 %1284 }
 0x174   : > { %4744 = vperm.xlu1 %5879, %v402_v38   ;;  %4739 = vperm.xlu0 %5878, %v401_v9  }
 0x175   : > { %4749 = vperm.xlu2 %5880, %v403_v6   ;;  %v1276_v6 = vpop.permute.xlu1 %1275 }
 0x176   : > { %1075 = vmatmul.bf16.gmra.mxu2 %v5737_v58  ;;  %1124 = vmatmul.bf16.gmra.mxu3 %v5737_v58  ;;  %v1249_v58 = vpop.permute.xlu2 %1248 }
 0x17c   : > { %4759 = vperm.xlu1 %5879, %v405_v15   ;;  %4754 = vperm.xlu0 %5878, %v404_v18   ;;  %v1267_v18 = vpop.permute.xlu0 %1266 }
 0x17d   : > { %4764 = vperm.xlu2 %5880, %v406_v25  }
 0x17e   : > { %v1240_v15 = vpop.permute.xlu2 %1239 }
 0x184   : > { %4774 = vperm.xlu1 %5879, %v408_v32   ;;  %4769 = vperm.xlu0 %5878, %v407_v28   ;;  %v1231_v32 = vpop.permute.xlu1 %1230 }
 0x185   : > { %4779 = vperm.xlu2 %5880, %v409_v61  }
 0x186   : > { %1080 = vmatmul.bf16.gmra.mxu2 %v5738_v27  ;;  %1129 = vmatmul.bf16.gmra.mxu3 %v5738_v27  ;;  %v1195_v28 = vpop.permute.xlu2 %1194 }
 0x18c   : > { %4789 = vperm.xlu1 %5879, %v411_v13   ;;  %4784 = vperm.xlu0 %5878, %v410_v45   ;;  %v1258_v45 = vpop.permute.xlu0 %1257 }
 0x18d   : > { %4794 = vperm.xlu2 %5880, %v412_v26   ;;  %v1222_v26 = vpop.permute.xlu1 %1221 }
 0x194   : > { %4804 = vperm.xlu1 %5879, %v414_v63   ;;  %4799 = vperm.xlu0 %5878, %v413_v31  }
 0x195   : > { %4809 = vperm.xlu2 %5880, %v415_v35   ;;  %v1254_v35 = vperm.slane %v1249_v58, %v6506_v48 }
 0x196   : > { %1085 = vmatmul.bf16.gmra.mxu2 %v5739_v19  ;;  %1134 = vmatmul.bf16.gmra.mxu3 %v5739_v19  ;;  %v1299_v19 = vperm.slane %v1294_v14, %v6506_v48 }
 0x19c   : > { %5070 = vperm.xlu1 %5879, %v417_v16   ;;  %5065 = vperm.xlu0 %5878, %v416_v30   ;;  %v1245_v16 = vperm.slane %v1240_v15, %v6506_v48  ;;  %v1290_v30 = vperm.slane %v1285_v5, %v6506_v48 }
 0x19d   : > { %5075 = vperm.xlu2 %5880, %v418_v17   ;;  %v1200_v17 = vperm.slane %v1195_v28, %v6506_v48 }
 0x1a4   : > { %5085 = vperm.xlu1 %5879, %v420_v33   ;;  %5080 = vperm.xlu0 %5878, %v419_v49   ;;  %v1281_v33 = vperm.slane %v1276_v6, %v6506_v48  ;;  %v1186_v49 = vpop.permute.xlu2 %1185 }
 0x1a5   : > { %5090 = vperm.xlu2 %5880, %v421_v50   ;;  %v1272_v50 = vperm.slane %v1267_v18, %v6506_v48 }
 0x1a9   : > { %v1051_v29 = vpop.f32.mrf.mxu2  ;;  %v1100_v11 = vpop.f32.mrf.mxu3 }
 0x1aa   : > { %v6813_v12 = vpack.c.bf16 %v1100_v11, %v1051_v29  ;;  %v1191_v29 = vperm.slane %v1186_v49, %v6506_v48 }
 0x1ac   : > { %5100 = vperm.xlu1 %5879, %v423_v34   ;;  %5095 = vperm.xlu0 %5878, %v422_v43   ;;  %v1347_v34 = vunpack.c.l.bf16 %v1299_v19  ;;  %v1236_v43 = vperm.slane %v1231_v32, %v6506_v48  ;;  %v1177_v32 = vpop.permute.xlu1 %1176 }
 0x1ad   : > { %5105 = vperm.xlu2 %5880, %v424_v47   ;;  %v1263_v47 = vperm.slane %v1258_v45, %v6506_v48 }
 0x1af   : > { %v1343_v14 = vunpack.c.l.bf16 %v1263_v47 }
 0x1b1   : > { %v6824_v21 = vpop.f32.mrf.mxu2  ;;  %v6826_v22 = vpop.f32.mrf.mxu3 }
 0x1b4   : > { %5115 = vperm.xlu1 %5879, %v426_v54   ;;  %5110 = vperm.xlu0 %5878, %v425_v0   ;;  %v1227_v54 = vperm.slane %v1222_v26, %v6506_v48  ;;  %v1213_v0 = vpop.permute.xlu0 %1212 }
 0x1b5   : > { %5120 = vperm.xlu2 %5880, %v427_v52   ;;  %v6884_v52 = vunpack.c.l.bf16 %v1254_v35 }
 0x1b6   : > { %v6895_v5 = vunpack.c.l.bf16 %v1227_v54 }
 0x1b9   : > { %v1056_v10 = vpop.f32.mrf.mxu2  ;;  %v1105_v53 = vpop.f32.mrf.mxu3 }
 0x1ba   : > { %v6837_v23 = vpack.c.bf16 %v1105_v53, %v1056_v10  ;;  %v6886_v10 = vunpack.c.l.bf16 %v1245_v16  ;;  %v1218_v53 = vperm.slane %v1213_v0, %v6506_v48 }
 0x1bc   : > { %5130 = vperm.xlu1 %5879, %v429_v46   ;;  %5125 = vperm.xlu0 %5878, %v428_v39   ;;  %v1346_v39 = vunpack.c.l.bf16 %v1290_v30  ;;  %v6897_v18 = vunpack.c.l.bf16 %v1218_v53 }
 0x1bd   : > { %5135 = vperm.xlu2 %5880, %v430_v41   ;;  %v6889_v41 = vunpack.c.l.bf16 %v1200_v17 }
 0x1c1   : > { %v6848_v36 = vpop.f32.mrf.mxu2  ;;  %v6850_v55 = vpop.f32.mrf.mxu3 }
 0x1c4   : > { %5140 = vperm.xlu0 %5878, %v431_v7   ;;  %v1345_v7 = vunpack.c.l.bf16 %v1281_v33 }
 0x1c9   : > { %v1061_v40 = vpop.f32.mrf.mxu2  ;;  %v1110_v56 = vpop.f32.mrf.mxu3 }
 0x1ca   : > { %v6855_v1 = vpack.c.bf16 %v1110_v56, %v1061_v40  ;;  %v1344_v56 = vunpack.c.l.bf16 %v1272_v50 }
 0x1d1   : > { %v6857_v2 = vpop.f32.mrf.mxu2  ;;  %v6859_v57 = vpop.f32.mrf.mxu3 }
 0x1d9   : > { %v1066_v59 = vpop.f32.mrf.mxu2  ;;  %v1115_v60 = vpop.f32.mrf.mxu3 }
 0x1da   : > { %v6861_v24 = vpack.c.bf16 %v1115_v60, %v1066_v59  ;;  %v6891_v59 = vunpack.c.l.bf16 %v1191_v29 }
 0x1e1   : > { %v6863_v51 = vpop.f32.mrf.mxu2  ;;  %v6865_v3 = vpop.f32.mrf.mxu3 }
 0x1e9   : > { %v1071_v62 = vpop.f32.mrf.mxu2  ;;  %v1120_v4 = vpop.f32.mrf.mxu3 }
 0x1ea   : > { %v6867_v8 = vpack.c.bf16 %v1120_v4, %v1071_v62  ;;  %v6893_v4 = vunpack.c.l.bf16 %v1236_v43 }
 0x1f1   : > { %v6869_v20 = vpop.f32.mrf.mxu2  ;;  %v6871_v44 = vpop.f32.mrf.mxu3 }
 0x1f9   : > { %v1076_v42 = vpop.f32.mrf.mxu2  ;;  %v1125_v37 = vpop.f32.mrf.mxu3 }
 0x201   : > { %v1078_v38 = vpop.f32.mrf.mxu2  ;;  %v1127_v9 = vpop.f32.mrf.mxu3 }
 0x202   : > { %v1151_v58 = vpack.c.bf16 %v1127_v9, %v1078_v38  ;;  %v1147_v38 = vpack.c.bf16 %v6865_v3, %v6863_v51  ;;  %v1149_v9 = vpack.c.bf16 %v6871_v44, %v6869_v20 }
 0x204   : > { %v1322_v16 = vunpack.c.l.bf16 %v1151_v58  ;;  %v1323_v30 = vunpack.c.h.bf16 %v1151_v58  ;;  %v1318_v53 = vunpack.c.l.bf16 %v1149_v9 }
 0x206   : > { %v1370_v51 = vadd.f32 %v1343_v14, %v1322_v16  ;;  %v1371_v3 = vadd.f32 %v1343_v14, %v1323_v30 }
 0x209   : > { %v1081_v25 = vpop.f32.mrf.mxu2  ;;  %v1130_v27 = vpop.f32.mrf.mxu3 }
 0x20a   : > { %v1152_v40 = vpack.c.bf16 %v1130_v27, %v1081_v25  ;;  %v1182_v25 = vperm.slane %v1177_v32, %v6506_v48  ;;  %v1150_v27 = vpack.c.bf16 %v1125_v37, %v1076_v42  ;;  %v1314_v32 = vunpack.c.l.bf16 %v1147_v38 }
 0x20c   : > { %v1324_v45 = vunpack.c.l.bf16 %v1152_v40  ;;  %v1325_v26 = vunpack.c.h.bf16 %v1152_v40  ;;  %v1320_v29 = vunpack.c.l.bf16 %v1150_v27  ;;  %v1321_v42 = vunpack.c.h.bf16 %v1150_v27 }
 0x20e   : > { %v1372_v37 = vadd.f32 %v1344_v56, %v1324_v45  ;;  %v1368_v14 = vadd.f32 %v6884_v52, %v1320_v29  ;;  %v1451_v45 = vmax.f32 %v1371_v3, 0.0  ;;  %v1304_v3 = vunpack.c.l.bf16 %v6837_v23 }
 0x210   : > { %v1452_v58 = vmax.f32 %v1372_v37, 0.0 }
 0x211   : > { %v1083_v61 = vpop.f32.mrf.mxu2  ;;  %v1132_v13 = vpop.f32.mrf.mxu3 }
 0x212   : > { %v1153_v46 = vpack.c.bf16 %v1132_v13, %v1083_v61 }
 0x214   : > { %v1326_v28 = vunpack.c.l.bf16 %v1153_v46  ;;  %v1327_v61 = vunpack.c.h.bf16 %v1153_v46  ;;  %v1319_v46 = vunpack.c.h.bf16 %v1149_v9 }
 0x216   : > { %v1374_v49 = vadd.f32 %v1345_v7, %v1326_v28  ;;  %v1375_v50 = vadd.f32 %v1345_v7, %v1327_v61  ;;  %v1145_v7 = vpack.c.bf16 %v6859_v57, %v6857_v2  ;;  %v1315_v28 = vunpack.c.h.bf16 %v1147_v38 }
 0x217   : > { %v1366_v61 = vadd.f32 %v6886_v10, %v1318_v53  ;;  %v1450_v57 = vmax.f32 %v1370_v51, 0.0 }
 0x218   : > { %v1454_v40 = vmax.f32 %v1374_v49, 0.0  ;;  %v1310_v38 = vunpack.c.l.bf16 %v1145_v7  ;;  %v1311_v9 = vunpack.c.h.bf16 %v1145_v7  ;;  %v1363_v16 = vadd.f32 %v6895_v5, %v1315_v28 }
 0x219   : > { %v1086_v63 = vpop.f32.mrf.mxu2  ;;  %v1135_v31 = vpop.f32.mrf.mxu3  ;;  %v1308_v49 = vunpack.c.l.bf16 %v6855_v1 }
 0x21a   : > { %v1154_v11 = vpack.c.bf16 %v1135_v31, %v1086_v63  ;;  %v1472_v27 = vpack.c.bf16 %v1454_v40, %v1452_v58 }
 0x21c   : > { %v1328_v60 = vunpack.c.l.bf16 %v1154_v11  ;;  %v1329_v62 = vunpack.c.h.bf16 %v1154_v11  ;;  %v1373_v11 = vadd.f32 %v1344_v56, %v1325_v26  ;;  %v1316_v56 = vunpack.c.l.bf16 %v6867_v8 }
 0x21d   : > { %v6913_v26 = vunpack.c.l.bf16 %v1182_v25  ;;  %v1362_v25 = vadd.f32 %v6895_v5, %v1314_v32  ;;  %v1301_v32 = vunpack.c.h.bf16 %v6813_v12 }
 0x21e   : > { %v1376_v31 = vadd.f32 %v1346_v39, %v1328_v60  ;;  %v1377_v35 = vadd.f32 %v1346_v39, %v1329_v62  ;;  %v1204_v39 = vpop.permute.xlu0 %1203  ;;  %v1455_v60 = vmax.f32 %v1375_v50, 0.0  ;;  %v1317_v62 = vunpack.c.h.bf16 %v6867_v8 }
 0x21f   : > { %v1143_v8 = vpack.c.bf16 %v6850_v55, %v6848_v36  ;;  %v1446_v55 = vmax.f32 %v1366_v61, 0.0  ;;  %v1309_v50 = vunpack.c.h.bf16 %v6855_v1 }
 0x220   : > { %v1456_v43 = vmax.f32 %v1376_v31, 0.0  ;;  %v1457_v54 = vmax.f32 %v1377_v35, 0.0  ;;  %v1364_v35 = vadd.f32 %v6893_v4, %v1316_v56 }
 0x221   : > { %v1088_v6 = vpop.f32.mrf.mxu2  ;;  %v1137_v15 = vpop.f32.mrf.mxu3  ;;  %v1306_v37 = vunpack.c.l.bf16 %v1143_v8  ;;  %v1357_v40 = vadd.f32 %v6889_v41, %v1309_v50  ;;  %v5746_v50 = vld [vmem:[#allocation2 + $0x70] sm:$0xff] }
 0x222   : > { %v1155_v13 = vpack.c.bf16 %v1137_v15, %v1088_v6  ;;  %v1453_v6 = vmax.f32 %v1373_v11, 0.0  ;;  %v1369_v15 = vadd.f32 %v6884_v52, %v1321_v42  ;;  %v1448_v52 = vmax.f32 %v1368_v14, 0.0 }
 0x223   : > { %v1307_v11 = vunpack.c.h.bf16 %v1143_v8  ;;  %v1354_v7 = vadd.f32 %v6891_v59, %v1306_v37  ;;  %v1437_v61 = vmax.f32 %v1357_v40, 0.0 }
 0x224   : > { %v1330_v19 = vunpack.c.l.bf16 %v1155_v13  ;;  %v1331_v63 = vunpack.c.h.bf16 %v1155_v13  ;;  %v1367_v13 = vadd.f32 %v6886_v10, %v1319_v46  ;;  %v1473_v2 = vpack.c.bf16 %v1455_v60, %v1453_v6 }
 0x225   : > { %v1449_v31 = vmax.f32 %v1369_v15, 0.0  ;;  %v1365_v10 = vadd.f32 %v6893_v4, %v1317_v62  ;;  %v1470_v30 = vpack.c.bf16 %v1450_v57, %v1448_v52  ;;  %v1444_v4 = vmax.f32 %v1364_v35, 0.0 }
 0x226   : > { %v1378_v17 = vadd.f32 %v1347_v34, %v1330_v19  ;;  %v1379_v33 = vadd.f32 %v1347_v34, %v1331_v63  ;;  %v1209_v34 = vperm.slane %v1204_v39, %v6506_v48  ;;  %v1312_v19 = vunpack.c.l.bf16 %v6861_v24 }
 0x227   : > { %v1313_v63 = vunpack.c.h.bf16 %v6861_v24  ;;  %v1471_v36 = vpack.c.bf16 %v1451_v45, %v1449_v31  ;;  %v1141_v24 = vpack.c.bf16 %v6826_v22, %v6824_v21  ;;  %v1445_v29 = vmax.f32 %v1365_v10, 0.0 }
 0x228   : > { %v1458_v47 = vmax.f32 %v1378_v17, 0.0  ;;  %v1459_v0 = vmax.f32 %v1379_v33, 0.0  ;;  %v1447_v17 = vmax.f32 %v1367_v13, 0.0  ;;  %v1337_v33 = vunpack.c.l.bf16 %v1209_v34 }
 0x229   : > { %v1360_v42 = vadd.f32 %v6897_v18, %v1312_v19  ;;  %v1361_v5 = vadd.f32 %v6897_v18, %v1313_v63  ;;  %v1468_v53 = vpack.c.bf16 %v1446_v55, %v1444_v4  ;;  %v1442_v22 = vmax.f32 %v1362_v25, 0.0  ;;  %v5741_v55 = vld [vmem:[#allocation2 + $0x48] sm:$0xff]  ;;  %v5747_v4 = vld [vmem:[#allocation2 + $0x78] sm:$0xff] }
 0x22a   : > { %v1474_v20 = vpack.c.bf16 %v1458_v47, %v1456_v43  ;;  %v1475_v44 = vpack.c.bf16 %v1459_v0, %v1457_v54  ;;  %v1358_v43 = vadd.f32 %v1337_v33, %v1310_v38  ;;  %v1359_v47 = vadd.f32 %v1337_v33, %v1311_v9  ;;  %v1168_v54 = vpop.permute.xlu1 %1167  ;;  %v1159_v0 = vpop.permute.xlu0 %1158  ;;  %v5743_v33 = vld [vmem:[#allocation2 + $0x58] sm:$0xff] }
 0x22b   : > { %v1469_v21 = vpack.c.bf16 %v1447_v17, %v1445_v29  ;;  %v1443_v46 = vmax.f32 %v1363_v16, 0.0  ;;  %v1173_v1 = vperm.slane %v1168_v54, %v6506_v48  ;;  %v1164_v51 = vperm.slane %v1159_v0, %v6506_v48  ;;  %v5742_v17 = vld [vmem:[#allocation2 + $0x50] sm:$0xff] }
 0x22c   : > { %1558 = vmatpush.bf16.msrb.mxu0 %v1474_v20  ;;  %1607 = vmatpush.bf16.msrb.mxu1 %v1475_v44  ;;  %v1305_v39 = vunpack.c.h.bf16 %v6837_v23  ;;  %v1440_v18 = vmax.f32 %v1360_v42, 0.0  ;;  %v1441_v20 = vmax.f32 %v1361_v5, 0.0  ;;  %v1356_v44 = vadd.f32 %v6889_v41, %v1308_v49  ;;  %v5745_v49 = vld [vmem:[#allocation2 + $0x68] sm:$0xff] }
 0x22d   : > { %v1302_v60 = vunpack.c.l.bf16 %v1141_v24  ;;  %v1303_v34 = vunpack.c.h.bf16 %v1141_v24  ;;  %v1355_v56 = vadd.f32 %v6891_v59, %v1307_v11  ;;  %v1438_v6 = vmax.f32 %v1358_v43, 0.0  ;;  %v5744_v24 = vld [vmem:[#allocation2 + $0x60] sm:$0xff] }
 0x22e   : > { %v1466_v62 = vpack.c.bf16 %v1442_v22, %v1440_v18  ;;  %v1467_v58 = vpack.c.bf16 %v1443_v46, %v1441_v20  ;;  %v1439_v14 = vmax.f32 %v1359_v47, 0.0  ;;  %v1333_v15 = vunpack.c.l.bf16 %v1173_v1  ;;  %v1801_v18 = vpop.permute.xlu2 %1800 }
 0x22f   : > { %v1300_v23 = vunpack.c.l.bf16 %v6813_v12  ;;  %v1436_v28 = vmax.f32 %v1356_v44, 0.0  ;;  %v1352_v41 = vadd.f32 %v6913_v26, %v1304_v3  ;;  %v1353_v13 = vadd.f32 %v6913_v26, %v1305_v39 }
 0x230   : > { %1559 = vmatpush.bf16.msrb.mxu0 %v1472_v27  ;;  %1608 = vmatpush.bf16.msrb.mxu1 %v1473_v2  ;;  %v1332_v27 = vunpack.c.l.bf16 %v1164_v51  ;;  %v1350_v2 = vadd.f32 %v1333_v15, %v1302_v60  ;;  %v1351_v59 = vadd.f32 %v1333_v15, %v1303_v34  ;;  %v1465_v45 = vpack.c.bf16 %v1439_v14, %v1437_v61 }
 0x231   : > { %v1464_v57 = vpack.c.bf16 %v1438_v6, %v1436_v28  ;;  %v1434_v8 = vmax.f32 %v1354_v7, 0.0  ;;  %v1435_v19 = vmax.f32 %v1355_v56, 0.0  ;;  %v1432_v63 = vmax.f32 %v1352_v41, 0.0 }
 0x232   : > { %v1433_v52 = vmax.f32 %v1353_v13, 0.0  ;;  %v1348_v12 = vadd.f32 %v1332_v27, %v1300_v23  ;;  %v1349_v31 = vadd.f32 %v1332_v27, %v1301_v32  ;;  %v1430_v38 = vmax.f32 %v1350_v2, 0.0  ;;  %v1783_v34 = vpop.permute.xlu1 %1782  ;;  %v1810_v7 = vpop.permute.xlu0 %1809 }
 0x233   : > { %v1462_v35 = vpack.c.bf16 %v1434_v8, %v1432_v63  ;;  %v1431_v9 = vmax.f32 %v1351_v59, 0.0 }
 0x234   : > { %1560 = vmatpush.bf16.msrb.mxu0 %v1470_v30  ;;  %1609 = vmatpush.bf16.msrb.mxu1 %v1471_v36  ;;  %v1463_v10 = vpack.c.bf16 %v1435_v19, %v1433_v52  ;;  %v1428_v26 = vmax.f32 %v1348_v12, 0.0  ;;  %v1429_v25 = vmax.f32 %v1349_v31, 0.0  ;;  %v5740_v36 = vld [vmem:[#allocation2 + $0x40] sm:$0xff]  ;;  %v1806_v19 = vperm.slane %v1801_v18, %v6506_v48 }
 0x236   : > { %v1460_v16 = vpack.c.bf16 %v1430_v38, %v1428_v26  ;;  %v1461_v30 = vpack.c.bf16 %v1431_v9, %v1429_v25  ;;  %v1792_v60 = vpop.permute.xlu2 %1791  ;;  %v1815_v38 = vperm.slane %v1810_v7, %v6506_v48  ;;  %v6985_v25 = vunpack.c.l.bf16 %v1806_v19 }
 0x237   : > { %v1797_v12 = vperm.slane %v1792_v60, %v6506_v48 }
 0x238   : > { %1561 = vmatpush.bf16.msrb.mxu0 %v1468_v53  ;;  %1610 = vmatpush.bf16.msrb.mxu1 %v1469_v21 }
 0x23a   : > { %v1774_v14 = vpop.permute.xlu1 %1773  ;;  %v1765_v15 = vpop.permute.xlu0 %1764 }
 0x23b   : > { %v1779_v26 = vperm.slane %v1774_v14, %v6506_v48 }
 0x23c   : > { %1562 = vmatpush.bf16.msrb.mxu0 %v1466_v62  ;;  %1611 = vmatpush.bf16.msrb.mxu1 %v1467_v58 }
 0x23e   : > { %v1747_v6 = vpop.permute.xlu2 %1746 }
 0x23f   : > { %v1752_v31 = vperm.slane %v1747_v6, %v6506_v48 }
 0x240   : > { %1563 = vmatpush.bf16.msrb.mxu0 %v1464_v57  ;;  %1612 = vmatpush.bf16.msrb.mxu1 %v1465_v45 }
 0x242   : > { %v1729_v61 = vpop.permute.xlu1 %1728  ;;  %v1756_v27 = vpop.permute.xlu0 %1755 }
 0x244   : > { %1564 = vmatpush.bf16.msrb.mxu0 %v1462_v35  ;;  %1613 = vmatpush.bf16.msrb.mxu1 %v1463_v10  ;;  %v1788_v10 = vperm.slane %v1783_v34, %v6506_v48 }
 0x246   : > { %v1738_v28 = vpop.permute.xlu2 %1737 }
 0x247   : > { %v1743_v35 = vperm.slane %v1738_v28, %v6506_v48 }
 0x248   : > { %1565 = vmatpush.bf16.msrb.mxu0 %v1460_v16  ;;  %1614 = vmatpush.bf16.msrb.mxu1 %v1461_v30  ;;  %v1770_v16 = vperm.slane %v1765_v15, %v6506_v48 }
 0x24a   : > { %v1720_v45 = vpop.permute.xlu1 %1719  ;;  %v1711_v8 = vpop.permute.xlu0 %1710 }
 0x24b   : > { %1566 = vmatmul.bf16.vlgmr.msrb.gmra.mxu0 %v5740_v36  ;;  %1615 = vmatmul.bf16.vlgmr.msrb.gmra.mxu1 %v5740_v36  ;;  %v1716_v18 = vperm.slane %v1711_v8, %v6506_v48 }
 0x24e   : > { %v1693_v57 = vpop.permute.xlu2 %1692 }
 0x24f   : > { %v1698_v9 = vperm.slane %v1693_v57, %v6506_v48 }
 0x252   : > { %v1675_v36 = vpop.permute.xlu1 %1674 }
 0x256   : > { %v1684_v30 = vpop.permute.xlu2 %1683 }
 0x25b   : > { %1571 = vmatmul.bf16.gmra.mxu0 %v5741_v55  ;;  %1620 = vmatmul.bf16.gmra.mxu1 %v5741_v55  ;;  %v6988_v55 = vunpack.c.l.bf16 %v1797_v12 }
 0x26b   : > { %1576 = vmatmul.bf16.gmra.mxu0 %v5742_v17  ;;  %1625 = vmatmul.bf16.gmra.mxu1 %v5742_v17  ;;  %v6990_v17 = vunpack.c.l.bf16 %v1752_v31 }
 0x27b   : > { %1581 = vmatmul.bf16.gmra.mxu0 %v5743_v33  ;;  %1630 = vmatmul.bf16.gmra.mxu1 %v5743_v33  ;;  %v6992_v33 = vunpack.c.l.bf16 %v1743_v35 }
 0x28b   : > { %1586 = vmatmul.bf16.gmra.mxu0 %v5744_v24  ;;  %1635 = vmatmul.bf16.gmra.mxu1 %v5744_v24  ;;  %v1689_v24 = vperm.slane %v1684_v30, %v6506_v48 }
 0x29b   : > { %1591 = vmatmul.bf16.gmra.mxu0 %v5745_v49  ;;  %1640 = vmatmul.bf16.gmra.mxu1 %v5745_v49  ;;  %v6995_v49 = vunpack.c.l.bf16 %v1788_v10 }
 0x2ab   : > { %1596 = vmatmul.bf16.gmra.mxu0 %v5746_v50  ;;  %1645 = vmatmul.bf16.gmra.mxu1 %v5746_v50  ;;  %v1734_v50 = vperm.slane %v1729_v61, %v6506_v48 }
 0x2ad   : > { %v1854_v6 = vunpack.c.l.bf16 %v1734_v50 }
 0x2bb   : > { %1601 = vmatmul.bf16.gmra.mxu0 %v5747_v4  ;;  %1650 = vmatmul.bf16.gmra.mxu1 %v5747_v4  ;;  %v1761_v4 = vperm.slane %v1756_v27, %v6506_v48 }
 0x2bd   : > { %v7013_v14 = vunpack.c.l.bf16 %v1761_v4 }
 0x2c8   : > { %v1567_v29 = vpop.f32.mrf.mxu0  ;;  %v1616_v42 = vpop.f32.mrf.mxu1 }
 0x2c9   : > { %v6941_v5 = vpack.c.bf16 %v1616_v42, %v1567_v29  ;;  %v1702_v29 = vpop.permute.xlu0 %1701 }
 0x2d0   : > { %v1569_v37 = vpop.f32.mrf.mxu0  ;;  %v1618_v11 = vpop.f32.mrf.mxu1 }
 0x2d1   : > { %v1657_v42 = vpack.c.bf16 %v1618_v11, %v1569_v37  ;;  %v1707_v37 = vperm.slane %v1702_v29, %v6506_v48  ;;  %v1816_v11 = vunpack.c.l.bf16 %v6941_v5 }
 0x2d3   : > { %v1818_v15 = vunpack.c.l.bf16 %v1657_v42  ;;  %v1819_v27 = vunpack.c.h.bf16 %v1657_v42  ;;  %v1851_v12 = vunpack.c.l.bf16 %v1707_v37 }
 0x2d8   : > { %v1572_v43 = vpop.f32.mrf.mxu0  ;;  %v1621_v47 = vpop.f32.mrf.mxu1 }
 0x2d9   : > { %v6943_v54 = vpack.c.bf16 %v1621_v47, %v1572_v43  ;;  %v6999_v43 = vunpack.c.l.bf16 %v1815_v38  ;;  %v1850_v47 = vunpack.c.l.bf16 %v1698_v9 }
 0x2e0   : > { %v6945_v0 = vpop.f32.mrf.mxu0  ;;  %v6947_v53 = vpop.f32.mrf.mxu1 }
 0x2e1   : > { %v1659_v60 = vpack.c.bf16 %v6947_v53, %v6945_v0  ;;  %v1820_v0 = vunpack.c.l.bf16 %v6943_v54  ;;  %v1821_v53 = vunpack.c.h.bf16 %v6943_v54 }
 0x2e3   : > { %v1822_v8 = vunpack.c.l.bf16 %v1659_v60  ;;  %v1823_v19 = vunpack.c.h.bf16 %v1659_v60  ;;  %v7033_v9 = vadd.f32 %v1850_v47, %v1820_v0 }
 0x2e5   : > { %v7037_v30 = vadd.f32 %v1851_v12, %v1822_v8 }
 0x2e8   : > { %v1577_v21 = vpop.f32.mrf.mxu0  ;;  %v1626_v22 = vpop.f32.mrf.mxu1 }
 0x2e9   : > { %v6949_v46 = vpack.c.bf16 %v1626_v22, %v1577_v21  ;;  %v7001_v21 = vunpack.c.l.bf16 %v1779_v26  ;;  %v1680_v22 = vperm.slane %v1675_v36, %v6506_v48  ;;  %v7035_v26 = vadd.f32 %v1850_v47, %v1821_v53 }
 0x2ea   : > { %v7039_v36 = vadd.f32 %v1851_v12, %v1823_v19 }
 0x2eb   : > { %v1848_v61 = vunpack.c.l.bf16 %v1680_v22  ;;  %v1824_v35 = vunpack.c.l.bf16 %v6949_v46 }
 0x2ed   : > { %v7019_v31 = vadd.f32 %v1848_v61, %v1816_v11 }
 0x2f0   : > { %v6951_v1 = vpop.f32.mrf.mxu0  ;;  %v6953_v51 = vpop.f32.mrf.mxu1 }
 0x2f1   : > { %v1661_v28 = vpack.c.bf16 %v6953_v51, %v6951_v1  ;;  %v1825_v1 = vunpack.c.h.bf16 %v6949_v46 }
 0x2f3   : > { %v1826_v51 = vunpack.c.l.bf16 %v1661_v28 }
 0x2f8   : > { %v1582_v3 = vpop.f32.mrf.mxu0  ;;  %v1631_v39 = vpop.f32.mrf.mxu1 }
 0x2f9   : > { %v6955_v20 = vpack.c.bf16 %v1631_v39, %v1582_v3  ;;  %v7004_v3 = vunpack.c.l.bf16 %v1770_v16  ;;  %v1725_v39 = vperm.slane %v1720_v45, %v6506_v48  ;;  %v1852_v45 = vunpack.c.l.bf16 %v1716_v18 }
 0x2fb   : > { %v1853_v57 = vunpack.c.l.bf16 %v1725_v39  ;;  %v7042_v29 = vadd.f32 %v1852_v45, %v1824_v35  ;;  %v7046_v22 = vadd.f32 %v1852_v45, %v1825_v1 }
 0x2fd   : > { %v7048_v47 = vadd.f32 %v1853_v57, %v1826_v51 }
 0x300   : > { %v6957_v44 = vpop.f32.mrf.mxu0  ;;  %v6959_v40 = vpop.f32.mrf.mxu1 }
 0x301   : > { %v7029_v38 = vpack.c.bf16 %v6959_v40, %v6957_v44  ;;  %v1828_v44 = vunpack.c.l.bf16 %v6955_v20  ;;  %v1829_v40 = vunpack.c.h.bf16 %v6955_v20 }
 0x303   : > { %v1830_v39 = vunpack.c.l.bf16 %v7029_v38  ;;  %v7057_v11 = vadd.f32 %v1854_v6, %v1828_v44 }
 0x305   : > { %v7067_v0 = vadd.f32 %v6992_v33, %v1830_v39 }
 0x308   : > { %v1587_v56 = vpop.f32.mrf.mxu0  ;;  %v1636_v62 = vpop.f32.mrf.mxu1 }
 0x309   : > { %v6961_v58 = vpack.c.bf16 %v1636_v62, %v1587_v56  ;;  %v1849_v56 = vunpack.c.l.bf16 %v1689_v24  ;;  %v1817_v62 = vunpack.c.h.bf16 %v6941_v5  ;;  %v1827_v24 = vunpack.c.h.bf16 %v1661_v28 }
 0x30b   : > { %v7021_v5 = vadd.f32 %v1848_v61, %v1817_v62  ;;  %v7024_v10 = vadd.f32 %v1849_v56, %v1818_v15  ;;  %v7031_v54 = vadd.f32 %v1849_v56, %v1819_v27  ;;  %v7059_v62 = vadd.f32 %v1854_v6, %v1829_v40 }
 0x310   : > { %v6963_v23 = vpop.f32.mrf.mxu0  ;;  %v6965_v32 = vpop.f32.mrf.mxu1 }
 0x318   : > { %v6967_v41 = vpop.f32.mrf.mxu0  ;;  %v6969_v13 = vpop.f32.mrf.mxu1 }
 0x319   : > { %v1666_v56 = vpack.c.bf16 %v6969_v13, %v6967_v41  ;;  %v1832_v41 = vunpack.c.l.bf16 %v6961_v58 }
 0x31b   : > { %v1836_v53 = vunpack.c.l.bf16 %v1666_v56 }
 0x320   : > { %v6971_v2 = vpop.f32.mrf.mxu0  ;;  %v6973_v59 = vpop.f32.mrf.mxu1 }
 0x321   : > { %v1667_v18 = vpack.c.bf16 %v6973_v59, %v6971_v2  ;;  %v1831_v2 = vunpack.c.h.bf16 %v7029_v38  ;;  %v1665_v59 = vpack.c.bf16 %v6965_v32, %v6963_v23  ;;  %v1833_v23 = vunpack.c.h.bf16 %v6961_v58 }
 0x322   : > { %v1880_v58 = vadd.f32 %v6990_v17, %v1832_v41 }
 0x323   : > { %v1838_v61 = vunpack.c.l.bf16 %v1667_v18  ;;  %v1839_v27 = vunpack.c.h.bf16 %v1667_v18  ;;  %v1834_v1 = vunpack.c.l.bf16 %v1665_v59  ;;  %v1835_v51 = vunpack.c.h.bf16 %v1665_v59 }
 0x325   : > { %v1886_v38 = vadd.f32 %v7001_v21, %v1838_v61  ;;  %v1958_v61 = vmax.f32 %v7067_v0, 0.0 }
 0x328   : > { %v6976_v63 = vpop.f32.mrf.mxu0  ;;  %v1646_v52 = vpop.f32.mrf.mxu1 }
 0x329   : > { %v1668_v50 = vpack.c.bf16 %v1646_v52, %v6976_v63 }
 0x32b   : > { %v1840_v20 = vunpack.c.l.bf16 %v1668_v50  ;;  %v1841_v37 = vunpack.c.h.bf16 %v1668_v50 }
 0x32d   : > { %v1889_v45 = vadd.f32 %v6995_v49, %v1841_v37  ;;  %v1881_v37 = vadd.f32 %v6990_v17, %v1833_v23 }
 0x32f   : > { %v1969_v40 = vmax.f32 %v1889_v45, 0.0 }
 0x330   : > { %v1599_v34 = vpop.f32.mrf.mxu0  ;;  %v1648_v7 = vpop.f32.mrf.mxu1 }
 0x331   : > { %v1669_v16 = vpack.c.bf16 %v1648_v7, %v1599_v34  ;;  %v7053_v7 = vadd.f32 %v1853_v57, %v1827_v24  ;;  %v1837_v57 = vunpack.c.h.bf16 %v1666_v56 }
 0x333   : > { %v1842_v60 = vunpack.c.l.bf16 %v1669_v16  ;;  %v1843_v63 = vunpack.c.h.bf16 %v1669_v16  ;;  %v1887_v16 = vadd.f32 %v7001_v21, %v1839_v27  ;;  %v1883_v21 = vadd.f32 %v7013_v14, %v1835_v51  ;;  %v5898_v51 = vld [vmem:[%s6157_s16 + $0xf8] sm:$0xff] }
 0x335   : > { %v1890_v13 = vadd.f32 %v6988_v55, %v1842_v60  ;;  %v1891_v6 = vadd.f32 %v6988_v55, %v1843_v63  ;;  %v1882_v60 = vadd.f32 %v7013_v14, %v1834_v1  ;;  %v1966_v63 = vmax.f32 %v1886_v38, 0.0 }
 0x336   : > { %v1960_v14 = vmax.f32 %v1880_v58, 0.0 }
 0x337   : > { %v1970_v55 = vmax.f32 %v1890_v13, 0.0  ;;  %v1971_v24 = vmax.f32 %v1891_v6, 0.0  ;;  %v1962_v13 = vmax.f32 %v1882_v60, 0.0  ;;  %v1963_v6 = vmax.f32 %v1883_v21, 0.0  ;;  %v5901_v21 = vld [vmem:[%s6157_s16 + $0xc0] sm:$0xff] }
 0x338   : > { %v1602_v46 = vpop.f32.mrf.mxu0  ;;  %v1651_v4 = vpop.f32.mrf.mxu1 }
 0x339   : > { %v1670_v42 = vpack.c.bf16 %v1651_v4, %v1602_v46  ;;  %v1884_v4 = vadd.f32 %v7004_v3, %v1836_v53  ;;  %v1989_v56 = vpack.c.bf16 %v1971_v24, %v1970_v55  ;;  %v1985_v55 = vpack.c.bf16 %v1963_v6, %v1962_v13  ;;  %v5905_v13 = vld [vmem:[%s6157_s16 + $0xa0] sm:$0xff] }
 0x33b   : > { %v1844_v52 = vunpack.c.l.bf16 %v1670_v42  ;;  %v1845_v34 = vunpack.c.h.bf16 %v1670_v42  ;;  %v2019_v17 = vunpack.c.h.bf16 %v1989_v56 }
 0x33d   : > { %v1892_v15 = vadd.f32 %v6985_v25, %v1844_v52  ;;  %v1893_v28 = vadd.f32 %v6985_v25, %v1845_v34  ;;  %v1888_v25 = vadd.f32 %v6995_v49, %v1840_v20  ;;  %v1885_v49 = vadd.f32 %v7004_v3, %v1837_v57 }
 0x33e   : > { %v1967_v52 = vmax.f32 %v1887_v16, 0.0  ;;  %v1879_v34 = vadd.f32 %v6992_v33, %v1831_v2  ;;  %v2018_v57 = vunpack.c.l.bf16 %v1989_v56 }
 0x33f   : > { %v1972_v32 = vmax.f32 %v1892_v15, 0.0  ;;  %v1973_v12 = vmax.f32 %v1893_v28, 0.0  ;;  %v1968_v44 = vmax.f32 %v1888_v25, 0.0  ;;  %v1964_v15 = vmax.f32 %v1884_v4, 0.0 }
 0x340   : > { %v1604_v8 = vpop.f32.mrf.mxu0  ;;  %v1653_v19 = vpop.f32.mrf.mxu1  ;;  %v1965_v28 = vmax.f32 %v1885_v49, 0.0  ;;  %v1987_v33 = vpack.c.bf16 %v1967_v52, %v1966_v63  ;;  %v1961_v25 = vmax.f32 %v1881_v37, 0.0  ;;  %v1959_v16 = vmax.f32 %v1879_v34, 0.0  ;;  %v5899_v49 = vld [vmem:[%s6157_s16 + $0xd0] sm:$0xff]  ;;  %v5902_v52 = vld [vmem:[%s6157_s16 + $0xc8] sm:$0xff] }
 0x341   : > { %v1671_v35 = vpack.c.bf16 %v1653_v19, %v1604_v8  ;;  %v1990_v42 = vpack.c.bf16 %v1973_v12, %v1972_v32  ;;  %v1988_v59 = vpack.c.bf16 %v1969_v40, %v1968_v44  ;;  %v5895_v19 = vld [vmem:[%s6157_s16 + $0xe0] sm:$0xff]  ;;  %v5896_v32 = vld [vmem:[%s6157_s16 + $0xf0] sm:$0xff]  ;;  %v7104_v44 = vadd.f32 %v5899_v49, %v2018_v57  ;;  %v5900_v40 = vld [vmem:[%s6157_s16 + $0xd8] sm:$0xff] }
 0x342   : > { %v1986_v45 = vpack.c.bf16 %v1965_v28, %v1964_v15  ;;  %v2014_v24 = vunpack.c.l.bf16 %v1987_v33  ;;  %v7107_v58 = vadd.f32 %v5900_v40, %v2019_v17  ;;  %v1984_v60 = vpack.c.bf16 %v1961_v25, %v1960_v14  ;;  %v5903_v28 = vld [vmem:[%s6157_s16 + $0xb0] sm:$0xff] }
 0x343   : > { %v1846_v50 = vunpack.c.l.bf16 %v1671_v35  ;;  %v1847_v46 = vunpack.c.h.bf16 %v1671_v35  ;;  %v2021_v27 = vunpack.c.h.bf16 %v1990_v42  ;;  %v2016_v8 = vunpack.c.l.bf16 %v1988_v59  ;;  %v5897_v35 = vld [vmem:[%s6157_s16 + $0xe8] sm:$0xff] }
 0x344   : > { %v2017_v0 = vunpack.c.h.bf16 %v1988_v59  ;;  %v2012_v56 = vunpack.c.l.bf16 %v1986_v45  ;;  %v7124_v59 = vadd.f32 %v5903_v28, %v2014_v24  ;;  %v2009_v57 = vunpack.c.h.bf16 %v1984_v60 }
 0x345   : > { %v1894_v39 = vadd.f32 %v6999_v43, %v1846_v50  ;;  %v1895_v18 = vadd.f32 %v6999_v43, %v1847_v46  ;;  %v2020_v43 = vunpack.c.l.bf16 %v1990_v42  ;;  %v7094_v1 = vadd.f32 %v5897_v35, %v2021_v27 }
 0x346   : > { %v2015_v50 = vunpack.c.h.bf16 %v1987_v33  ;;  %v1954_v42 = vmax.f32 %v7048_v47, 0.0  ;;  %v7113_v63 = vadd.f32 %v5901_v21, %v2016_v8  ;;  %v7116_v34 = vadd.f32 %v5902_v52, %v2017_v0  ;;  %8048 = vst [vmem:[#allocation9_spill] sm:$0xff] %v7124_v59  ;;  %v5906_v33 = vld [vmem:[%s6157_s16 + $0xa8] sm:$0xff]  ;;  %v5907_v8 = vld [vmem:[%s6157_s16 + $0x90] sm:$0xff]  ;;  %v5912_v21 = vld [vmem:[%s6157_s16 + $0x78] sm:$0xff] }
 0x347   : > { %v1974_v20 = vmax.f32 %v1894_v39, 0.0  ;;  %v1975_v3 = vmax.f32 %v1895_v18, 0.0  ;;  %v7088_v23 = vadd.f32 %v5895_v19, %v2020_v43  ;;  %v1956_v39 = vmax.f32 %v7057_v11, 0.0  ;;  %v5904_v43 = vld [vmem:[%s6157_s16 + $0xb8] sm:$0xff] }
 0x348   : > { %v1957_v18 = vmax.f32 %v7059_v62, 0.0  ;;  %8047 = vst [vmem:[#allocation8_spill] sm:$0xff] %v7116_v34  ;;  %v1983_v47 = vpack.c.bf16 %v1959_v16, %v1958_v61  ;;  %v2010_v11 = vunpack.c.l.bf16 %v1985_v55  ;;  %v2011_v62 = vunpack.c.h.bf16 %v1985_v55  ;;  %v5908_v19 = vld [vmem:[%s6157_s16 + $0x98] sm:$0xff]  ;;  %v5909_v55 = vld [vmem:[%s6157_s16 + $0x80] sm:$0xff] }
 0x349   : > { %v1991_v41 = vpack.c.bf16 %v1975_v3, %v1974_v20  ;;  %v2013_v20 = vunpack.c.h.bf16 %v1986_v45  ;;  %v1955_v3 = vmax.f32 %v7053_v7, 0.0  ;;  %v2085_v37 = vpack.c.bf16 %v7104_v44, %v7113_v63 }
 0x34a   : > { %v2086_v15 = vpack.c.bf16 %v7107_v58, %v7116_v34  ;;  %v7127_v27 = vadd.f32 %v5904_v43, %v2015_v50  ;;  %v1952_v7 = vmax.f32 %v7042_v29, 0.0  ;;  %v1953_v61 = vmax.f32 %v7046_v22, 0.0  ;;  %v5910_v50 = vld [vmem:[%s6157_s16 + $0x88] sm:$0xff] }
 0x34b   : > { %v2022_v2 = vunpack.c.l.bf16 %v1991_v41  ;;  %v2023_v53 = vunpack.c.h.bf16 %v1991_v41  ;;  %v1950_v41 = vmax.f32 %v7037_v30, 0.0  ;;  %v1982_v14 = vpack.c.bf16 %v1957_v18, %v1956_v39  ;;  %v5911_v18 = vld [vmem:[%s6157_s16 + $0x70] sm:$0xff] }
 0x34c   : > { %8049 = vst [vmem:[#allocation10_spill] sm:$0xff] %v7127_v27  ;;  %v7133_v6 = vadd.f32 %v5905_v13, %v2012_v56  ;;  %v1951_v17 = vmax.f32 %v7039_v36, 0.0  ;;  %v1981_v30 = vpack.c.bf16 %v1955_v3, %v1954_v42  ;;  %v2006_v29 = vunpack.c.l.bf16 %v1983_v47  ;;  %v5913_v3 = vld [vmem:[%s6157_s16 + $0x60] sm:$0xff] }
 0x34d   : > { %v7091_v12 = vadd.f32 %v5896_v32, %v2022_v2  ;;  %v7097_v38 = vadd.f32 %v5898_v51, %v2023_v53  ;;  %v7136_v2 = vadd.f32 %v5906_v33, %v2013_v20  ;;  %v2008_v53 = vunpack.c.l.bf16 %v1984_v60 }
 0x34e   : > { %8050 = vst [vmem:[#allocation11_spill] sm:$0xff] %v7133_v6  ;;  %v2007_v22 = vunpack.c.h.bf16 %v1983_v47  ;;  %v2083_v25 = vpack.c.bf16 %v7124_v59, %v7133_v6  ;;  %v7144_v0 = vadd.f32 %v5907_v8, %v2010_v11  ;;  %v7147_v32 = vadd.f32 %v5908_v19, %v2011_v62  ;;  %v5914_v11 = vld [vmem:[%s6157_s16 + $0x68] sm:$0xff] }
 0x34f   : > { %v2087_v46 = vpack.c.bf16 %v7091_v12, %v7088_v23  ;;  %v2088_v4 = vpack.c.bf16 %v7097_v38, %v7094_v1  ;;  %8051 = vst [vmem:[#allocation12_spill] sm:$0xff] %v7136_v2  ;;  %v2084_v45 = vpack.c.bf16 %v7127_v27, %v7136_v2  ;;  %v1946_v35 = vmax.f32 %v7024_v10, 0.0 }
 0x350   : > { %8052 = vst [vmem:[#allocation13_spill] sm:$0xff] %v7144_v0  ;;  %v1948_v36 = vmax.f32 %v7033_v9, 0.0  ;;  %v1949_v51 = vmax.f32 %v7035_v26, 0.0  ;;  %v1980_v16 = vpack.c.bf16 %v1953_v61, %v1952_v7  ;;  %v7153_v24 = vadd.f32 %v5909_v55, %v2008_v53  ;;  %v5915_v7 = vld [vmem:[%s6157_s16 + $0x50] sm:$0xff]  ;;  %v5917_v53 = vld [vmem:[%s6157_s16 + $0x40] sm:$0xff] }
 0x351   : > { %2154 = vmatpush.bf16.msra.mxu2 %v2087_v46  ;;  %2203 = vmatpush.bf16.msra.mxu3 %v2088_v4  ;;  %8053 = vst [vmem:[#allocation14_spill] sm:$0xff] %v7147_v32  ;;  %v7156_v46 = vadd.f32 %v5910_v50, %v2009_v57  ;;  %v2004_v4 = vunpack.c.l.bf16 %v1982_v14  ;;  %v2005_v49 = vunpack.c.h.bf16 %v1982_v14  ;;  %v1947_v10 = vmax.f32 %v7031_v54, 0.0  ;;  %v5916_v14 = vld [vmem:[%s6157_s16 + $0x58] sm:$0xff]  ;;  %v5921_v55 = vld [vmem:[%s6157_s16 + $0x20] sm:$0xff] }
 0x352   : > { %8054 = vst [vmem:[#allocation15_spill] sm:$0xff] %v7153_v24  ;;  %v1979_v40 = vpack.c.bf16 %v1951_v17, %v1950_v41  ;;  %v2002_v9 = vunpack.c.l.bf16 %v1981_v30  ;;  %v2003_v26 = vunpack.c.h.bf16 %v1981_v30  ;;  %v2081_v42 = vpack.c.bf16 %v7144_v0, %v7153_v24  ;;  %v5918_v17 = vld [vmem:[%s6157_s16 + $0x48] sm:$0xff] }
 0x353   : > { %8055 = vst [vmem:[#allocation16_spill] sm:$0xff] %v7156_v46  ;;  %v2082_v39 = vpack.c.bf16 %v7147_v32, %v7156_v46  ;;  %v7164_v60 = vadd.f32 %v5911_v18, %v2006_v29  ;;  %v7167_v52 = vadd.f32 %v5912_v21, %v2007_v22  ;;  %v1944_v56 = vmax.f32 %v7019_v31, 0.0  ;;  %v5924_v18 = vld [vmem:[%s6157_s16 + $0x18] sm:$0xff] }
 0x354   : > { %v1945_v54 = vmax.f32 %v7021_v5, 0.0  ;;  %v1978_v20 = vpack.c.bf16 %v1949_v51, %v1948_v36  ;;  %v7172_v47 = vadd.f32 %v5913_v3, %v2004_v4  ;;  %v7175_v62 = vadd.f32 %v5914_v11, %v2005_v49  ;;  %v5920_v51 = vld [vmem:[%s6157_s16 + $0x38] sm:$0xff]  ;;  %v5922_v4 = vld [vmem:[%s6157_s16 + $0x28] sm:$0xff] }
 0x355   : > { %2155 = vmatpush.bf16.msra.mxu2 %v2085_v37  ;;  %2204 = vmatpush.bf16.msra.mxu3 %v2086_v15  ;;  %8056 = vst [vmem:[#allocation17_spill] sm:$0xff] %v7164_v60  ;;  %v2000_v37 = vunpack.c.l.bf16 %v1980_v16  ;;  %v2001_v15 = vunpack.c.h.bf16 %v1980_v16  ;;  %v1977_v28 = vpack.c.bf16 %v1947_v10, %v1946_v35  ;;  %v1998_v43 = vunpack.c.l.bf16 %v1979_v40  ;;  %v5919_v35 = vld [vmem:[%s6157_s16 + $0x30] sm:$0xff] }
 0x356   : > { %8057 = vst [vmem:[#allocation18_spill] sm:$0xff] %v7167_v52  ;;  %v1999_v31 = vunpack.c.h.bf16 %v1979_v40  ;;  %v2079_v5 = vpack.c.bf16 %v7164_v60, %v7172_v47  ;;  %v2080_v41 = vpack.c.bf16 %v7167_v52, %v7175_v62  ;;  %v7182_v61 = vadd.f32 %v5915_v7, %v2002_v9  ;;  %v5754_v7 = vld [vmem:[#allocation2 + $0xb0] sm:$0xff] }
 0x357   : > { %8058 = vst [vmem:[#allocation19_spill] sm:$0xff] %v7172_v47  ;;  %v7185_v13 = vadd.f32 %v5916_v14, %v2003_v26  ;;  %v1976_v33 = vpack.c.bf16 %v1945_v54, %v1944_v56  ;;  %v7188_v57 = vadd.f32 %v5917_v53, %v2000_v37  ;;  %v7191_v30 = vadd.f32 %v5918_v17, %v2001_v15  ;;  %v5925_v56 = vld [vmem:[%s6157_s16] sm:$0xff]  ;;  %v5755_v14 = vld [vmem:[#allocation2 + $0xb8] sm:$0xff] }
 0x358   : > { %8059 = vst [vmem:[#allocation20_spill] sm:$0xff] %v7175_v62  ;;  %v1996_v29 = vunpack.c.l.bf16 %v1978_v20  ;;  %v1997_v22 = vunpack.c.h.bf16 %v1978_v20  ;;  %v7198_v36 = vadd.f32 %v5919_v35, %v1998_v43  ;;  %v7201_v16 = vadd.f32 %v5920_v51, %v1999_v31  ;;  %v5926_v20 = vld [vmem:[%s6157_s16 + $0x8] sm:$0xff]  ;;  %v5748_v15 = vld [vmem:[#allocation2 + $0x80] sm:$0xff]  ;;  %v5750_v43 = vld [vmem:[#allocation2 + $0x90] sm:$0xff] }
 0x359   : > { %2156 = vmatpush.bf16.msra.mxu2 %v2083_v25  ;;  %2205 = vmatpush.bf16.msra.mxu3 %v2084_v45  ;;  %8060 = vst [vmem:[#allocation21_spill] sm:$0xff] %v7182_v61  ;;  %v1994_v25 = vunpack.c.l.bf16 %v1977_v28  ;;  %v1995_v45 = vunpack.c.h.bf16 %v1977_v28  ;;  %v2077_v8 = vpack.c.bf16 %v7182_v61, %v7188_v57  ;;  %v2078_v19 = vpack.c.bf16 %v7185_v13, %v7191_v30  ;;  %v5749_v28 = vld [vmem:[#allocation2 + $0x88] sm:$0xff]  ;;  %v5751_v31 = vld [vmem:[#allocation2 + $0x98] sm:$0xff] }
 0x35a   : > { %8061 = vst [vmem:[#allocation22_spill] sm:$0xff] %v7185_v13  ;;  %v7204_v50 = vadd.f32 %v5921_v55, %v1996_v29  ;;  %v7207_v49 = vadd.f32 %v5922_v4, %v1997_v22  ;;  %v1992_v10 = vunpack.c.l.bf16 %v1976_v33  ;;  %v1993_v40 = vunpack.c.h.bf16 %v1976_v33 }
 0x35b   : > { %8062 = vst [vmem:[#allocation23_spill] sm:$0xff] %v7188_v57  ;;  %v7217_v21 = vadd.f32 %v5924_v18, %v1995_v45 }
 0x35c   : > { %8063 = vst [vmem:[#allocation24_spill] sm:$0xff] %v7191_v30  ;;  %v2075_v9 = vpack.c.bf16 %v7198_v36, %v7204_v50  ;;  %v2076_v26 = vpack.c.bf16 %v7201_v16, %v7207_v49  ;;  %v7220_v54 = vadd.f32 %v5925_v56, %v1992_v10  ;;  %v7223_v3 = vadd.f32 %v5926_v20, %v1993_v40 }
 0x35d   : > { %2157 = vmatpush.bf16.msra.mxu2 %v2081_v42  ;;  %2206 = vmatpush.bf16.msra.mxu3 %v2082_v39  ;;  %8064 = vst [vmem:[#allocation25_spill] sm:$0xff] %v7198_v36  ;;  %v5923_v42 = vld [vmem:[%s6157_s16 + $0x10] sm:$0xff]  ;;  %s5208_s16 = scalar_lea.sflag [#allocation4], %s338_s12 }
 0x35e   : > { %8065 = vst [vmem:[#allocation26_spill] sm:$0xff] %v7201_v16  ;;  %v7214_v39 = vadd.f32 %v5923_v42, %v1994_v25  ;;  %v2074_v37 = vpack.c.bf16 %v7217_v21, %v7223_v3 }
 0x35f   : > { %8066 = vst [vmem:[#allocation27_spill] sm:$0xff] %v7204_v50 }
 0x360   : > { %8067 = vst [vmem:[#allocation28_spill] sm:$0xff] %v7207_v49  ;;  %v2073_v11 = vpack.c.bf16 %v7214_v39, %v7220_v54 }
 0x361   : > { %2158 = vmatpush.bf16.msra.mxu2 %v2079_v5  ;;  %2207 = vmatpush.bf16.msra.mxu3 %v2080_v41  ;;  %8068 = vst [vmem:[#allocation29_spill] sm:$0xff] %v7214_v39  ;;  %v5752_v5 = vld [vmem:[#allocation2 + $0xa0] sm:$0xff]  ;;  %v5753_v41 = vld [vmem:[#allocation2 + $0xa8] sm:$0xff] }
 0x362   : > { %8069 = vst [vmem:[#allocation30_spill] sm:$0xff] %v7217_v21 }
 0x363   : > { %8070 = vst [vmem:[#allocation31_spill] sm:$0xff] %v7220_v54 }
 0x364   : > { %8071 = vst [vmem:[#allocation32_spill] sm:$0xff] %v7223_v3 }
 0x365   : > { %2159 = vmatpush.bf16.msra.mxu2 %v2077_v8  ;;  %2208 = vmatpush.bf16.msra.mxu3 %v2078_v19 }
 0x369   : > { %2160 = vmatpush.bf16.msra.mxu2 %v2075_v9  ;;  %2209 = vmatpush.bf16.msra.mxu3 %v2076_v26 }
 0x36d   : > { %2161 = vmatpush.bf16.msra.mxu2 %v2073_v11  ;;  %2210 = vmatpush.bf16.msra.mxu3 %v2074_v37 }
 0x370   : > { %2162 = vmatmul.bf16.vlgmr.msra.gmra.mxu2 %v5748_v15  ;;  %2211 = vmatmul.bf16.vlgmr.msra.gmra.mxu3 %v5748_v15 }
 0x380   : > { %2167 = vmatmul.bf16.gmra.mxu2 %v5749_v28  ;;  %2216 = vmatmul.bf16.gmra.mxu3 %v5749_v28 }
 0x390   : > { %2172 = vmatmul.bf16.gmra.mxu2 %v5750_v43  ;;  %2221 = vmatmul.bf16.gmra.mxu3 %v5750_v43  ;;  %v2379_v43 = vpop.permute.xlu2 %2378 }
 0x391   : > { %v2384_v21 = vperm.slane %v2379_v43, %v6506_v48 }
 0x393   : > { %v2456_v61 = vunpack.c.l.bf16 %v2384_v21 }
 0x3a0   : > { %2177 = vmatmul.bf16.gmra.mxu2 %v5751_v31  ;;  %2226 = vmatmul.bf16.gmra.mxu3 %v5751_v31 }
 0x3b0   : > { %2182 = vmatmul.bf16.gmra.mxu2 %v5752_v5  ;;  %2231 = vmatmul.bf16.gmra.mxu3 %v5752_v5 }
 0x3c0   : > { %2187 = vmatmul.bf16.gmra.mxu2 %v5753_v41  ;;  %2236 = vmatmul.bf16.gmra.mxu3 %v5753_v41  ;;  %v2406_v41 = vpop.permute.xlu1 %2405 }
 0x3c1   : > { %v2411_v36 = vperm.slane %v2406_v41, %v6506_v48 }
 0x3d0   : > { %2192 = vmatmul.bf16.gmra.mxu2 %v5754_v7  ;;  %2241 = vmatmul.bf16.gmra.mxu3 %v5754_v7  ;;  %v2370_v7 = vpop.permute.xlu2 %2369 }
 0x3d1   : > { %v2375_v39 = vperm.slane %v2370_v7, %v6506_v48 }
 0x3d3   : > { %v2455_v60 = vunpack.c.l.bf16 %v2375_v39 }
 0x3e0   : > { %2197 = vmatmul.bf16.gmra.mxu2 %v5755_v14  ;;  %2246 = vmatmul.bf16.gmra.mxu3 %v5755_v14  ;;  %v2397_v14 = vpop.permute.xlu0 %2396 }
 0x3e1   : > { %v2402_v30 = vperm.slane %v2397_v14, %v6506_v48  ;;  %v2459_v14 = vunpack.c.l.bf16 %v2411_v36 }
 0x3e3   : > { %v2458_v21 = vunpack.c.l.bf16 %v2402_v30 }
 0x3f3   : > { %v2163_v33 = vpop.f32.mrf.mxu2  ;;  %v2212_v53 = vpop.f32.mrf.mxu3 }
 0x3f4   : > { %v7229_v17 = vpack.c.bf16 %v2212_v53, %v2163_v33 }
 0x3fb   : > { %v7231_v29 = vpop.f32.mrf.mxu2  ;;  %v7233_v22 = vpop.f32.mrf.mxu3 }
 0x403   : > { %v2168_v25 = vpop.f32.mrf.mxu2  ;;  %v2217_v45 = vpop.f32.mrf.mxu3 }
 0x404   : > { %v7235_v8 = vpack.c.bf16 %v2217_v45, %v2168_v25  ;;  %v2361_v25 = vpop.permute.xlu1 %2360  ;;  %v2325_v45 = vpop.permute.xlu2 %2324 }
 0x405   : > { %v2330_v16 = vperm.slane %v2325_v45, %v6506_v48  ;;  %v2366_v62 = vperm.slane %v2361_v25, %v6506_v48 }
 0x407   : > { %v7271_v41 = vunpack.c.l.bf16 %v2330_v16  ;;  %v2454_v39 = vunpack.c.l.bf16 %v2366_v62 }
 0x40b   : > { %v7237_v19 = vpop.f32.mrf.mxu2  ;;  %v7239_v35 = vpop.f32.mrf.mxu3 }
 0x40c   : > { %v2316_v54 = vpop.permute.xlu2 %2315 }
 0x40d   : > { %v2321_v57 = vperm.slane %v2316_v54, %v6506_v48 }
 0x40f   : > { %v7274_v32 = vunpack.c.l.bf16 %v2321_v57 }
 0x413   : > { %v2173_v51 = vpop.f32.mrf.mxu2  ;;  %v2222_v55 = vpop.f32.mrf.mxu3 }
 0x414   : > { %v7241_v4 = vpack.c.bf16 %v2222_v55, %v2173_v51  ;;  %v2388_v51 = vpop.permute.xlu0 %2387  ;;  %v7267_v7 = vpop.permute.xlu2 %2270 }
 0x415   : > { %v2393_v43 = vperm.slane %v2388_v51, %v6506_v48 }
 0x417   : > { %v2457_v0 = vunpack.c.l.bf16 %v2393_v43 }
 0x41b   : > { %v7243_v10 = vpop.f32.mrf.mxu2  ;;  %v7245_v40 = vpop.f32.mrf.mxu3 }
 0x41c   : > { %v2343_v3 = vpop.permute.xlu0 %2342 }
 0x41d   : > { %v2348_v45 = vperm.slane %v2343_v3, %v6506_v48 }
 0x41f   : > { %v7279_v16 = vunpack.c.l.bf16 %v2348_v45 }
 0x423   : > { %v2178_v9 = vpop.f32.mrf.mxu2  ;;  %v2227_v26 = vpop.f32.mrf.mxu3 }
 0x424   : > { %v7247_v42 = vpack.c.bf16 %v2227_v26, %v2178_v9  ;;  %v2352_v26 = vpop.permute.xlu1 %2351  ;;  %v2334_v47 = vpop.permute.xlu0 %2333 }
 0x425   : > { %v2357_v46 = vperm.slane %v2352_v26, %v6506_v48 }
 0x427   : > { %v2453_v3 = vunpack.c.l.bf16 %v2357_v46 }
 0x42b   : > { %v7249_v18 = vpop.f32.mrf.mxu2  ;;  %v7251_v56 = vpop.f32.mrf.mxu3 }
 0x42c   : > { %v2307_v13 = vpop.permute.xlu1 %2306  ;;  %v2259_v46 = vpack.c.bf16 %v7251_v56, %v7249_v18 }
 0x42d   : > { %v2312_v54 = vperm.slane %v2307_v13, %v6506_v48 }
 0x433   : > { %v2183_v20 = vpop.f32.mrf.mxu2  ;;  %v2232_v11 = vpop.f32.mrf.mxu3 }
 0x434   : > { %v7253_v37 = vpack.c.bf16 %v2232_v11, %v2183_v20 }
 0x43b   : > { %v7255_v15 = vpop.f32.mrf.mxu2  ;;  %v7257_v28 = vpop.f32.mrf.mxu3 }
 0x443   : > { %v2188_v31 = vpop.f32.mrf.mxu2  ;;  %v2237_v5 = vpop.f32.mrf.mxu3 }
 0x444   : > { %v2262_v62 = vpack.c.bf16 %v2237_v5, %v2188_v31 }
 0x446   : > { %v2433_v31 = vunpack.c.h.bf16 %v2262_v62 }
 0x44b   : > { %v2190_v33 = vpop.f32.mrf.mxu2  ;;  %v2239_v53 = vpop.f32.mrf.mxu3 }
 0x44c   : > { %v2263_v36 = vpack.c.bf16 %v2239_v53, %v2190_v33  ;;  %v2261_v33 = vpack.c.bf16 %v7257_v28, %v7255_v15  ;;  %v2289_v15 = vpop.permute.xlu0 %2288 }
 0x44e   : > { %v2434_v53 = vunpack.c.l.bf16 %v2263_v36  ;;  %v2435_v45 = vunpack.c.h.bf16 %v2263_v36  ;;  %v2430_v59 = vunpack.c.l.bf16 %v2261_v33  ;;  %v2431_v18 = vunpack.c.h.bf16 %v2261_v33 }
 0x450   : > { %v2482_v56 = vadd.f32 %v2455_v60, %v2434_v53  ;;  %v2483_v34 = vadd.f32 %v2455_v60, %v2435_v45  ;;  %v2426_v60 = vunpack.c.l.bf16 %v2259_v46 }
 0x452   : > { %v2562_v45 = vmax.f32 %v2482_v56, 0.0 }
 0x453   : > { %v2193_v55 = vpop.f32.mrf.mxu2  ;;  %v2242_v9 = vpop.f32.mrf.mxu3 }
 0x45b   : > { %v2195_v20 = vpop.f32.mrf.mxu2  ;;  %v2244_v11 = vpop.f32.mrf.mxu3 }
 0x45c   : > { %v2265_v24 = vpack.c.bf16 %v2244_v11, %v2195_v20  ;;  %v7281_v20 = vunpack.c.l.bf16 %v2312_v54 }
 0x45e   : > { %v2438_v57 = vunpack.c.l.bf16 %v2265_v24  ;;  %v2439_v30 = vunpack.c.h.bf16 %v2265_v24 }
 0x460   : > { %v2486_v54 = vadd.f32 %v2457_v0, %v2438_v57  ;;  %v2487_v24 = vadd.f32 %v2457_v0, %v2439_v30  ;;  %v2257_v30 = vpack.c.bf16 %v7245_v40, %v7243_v10  ;;  %v2294_v10 = vperm.slane %v2289_v15, %v6506_v48 }
 0x461   : > { %v2255_v40 = vpack.c.bf16 %v7239_v35, %v7237_v19 }
 0x462   : > { %v2566_v57 = vmax.f32 %v2486_v54, 0.0  ;;  %v2567_v0 = vmax.f32 %v2487_v24, 0.0  ;;  %v2563_v54 = vmax.f32 %v2483_v34, 0.0 }
 0x463   : > { %v2198_v49 = vpop.f32.mrf.mxu2  ;;  %v2247_v50 = vpop.f32.mrf.mxu3  ;;  %v2419_v15 = vunpack.c.h.bf16 %v2255_v40 }
 0x464   : > { %v2266_v52 = vpack.c.bf16 %v2247_v50, %v2198_v49  ;;  %v2339_v50 = vperm.slane %v2334_v47, %v6506_v48  ;;  %v2264_v49 = vpack.c.bf16 %v2242_v9, %v2193_v55 }
 0x466   : > { %v2440_v51 = vunpack.c.l.bf16 %v2266_v52  ;;  %v2441_v26 = vunpack.c.h.bf16 %v2266_v52  ;;  %v7283_v47 = vunpack.c.l.bf16 %v2339_v50  ;;  %v2436_v55 = vunpack.c.l.bf16 %v2264_v49 }
 0x467   : > { %v2437_v9 = vunpack.c.h.bf16 %v2264_v49 }
 0x468   : > { %v2488_v25 = vadd.f32 %v2458_v21, %v2440_v51  ;;  %v2489_v6 = vadd.f32 %v2458_v21, %v2441_v26  ;;  %v2484_v5 = vadd.f32 %v2456_v61, %v2436_v55  ;;  %v2298_v51 = vpop.permute.xlu1 %2297  ;;  %v2474_v34 = vadd.f32 %v7283_v47, %v2426_v60 }
 0x469   : > { %v2485_v49 = vadd.f32 %v2456_v61, %v2437_v9  ;;  %v2428_v61 = vunpack.c.l.bf16 %v7253_v37 }
 0x46a   : > { %v2568_v21 = vmax.f32 %v2488_v25, 0.0  ;;  %v2569_v26 = vmax.f32 %v2489_v6, 0.0  ;;  %v2429_v6 = vunpack.c.h.bf16 %v7253_v37  ;;  %v2564_v55 = vmax.f32 %v2484_v5, 0.0 }
 0x46b   : > { %v2200_v2 = vpop.f32.mrf.mxu2  ;;  %v2249_v13 = vpop.f32.mrf.mxu3  ;;  %v2565_v9 = vmax.f32 %v2485_v49, 0.0  ;;  %v2424_v37 = vunpack.c.l.bf16 %v7247_v42  ;;  %v2476_v24 = vadd.f32 %v7279_v16, %v2428_v61 }
 0x46c   : > { %v2267_v11 = vpack.c.bf16 %v2249_v13, %v2200_v2  ;;  %v2432_v13 = vunpack.c.l.bf16 %v2262_v62  ;;  %v2481_v62 = vadd.f32 %v2454_v39, %v2433_v31  ;;  %v2584_v33 = vpack.c.bf16 %v2566_v57, %v2564_v55 }
 0x46d   : > { %v2585_v53 = vpack.c.bf16 %v2567_v0, %v2565_v9  ;;  %v2554_v57 = vmax.f32 %v2474_v34, 0.0 }
 0x46e   : > { %v2442_v52 = vunpack.c.l.bf16 %v2267_v11  ;;  %v2443_v43 = vunpack.c.h.bf16 %v2267_v11  ;;  %v2480_v25 = vadd.f32 %v2454_v39, %v2432_v13  ;;  %v2425_v39 = vunpack.c.h.bf16 %v7247_v42 }
 0x46f   : > { %v2253_v42 = vpack.c.bf16 %v7233_v22, %v7231_v29 }
 0x470   : > { %v2490_v2 = vadd.f32 %v2459_v14, %v2442_v52  ;;  %v2491_v50 = vadd.f32 %v2459_v14, %v2443_v43  ;;  %v2303_v14 = vperm.slane %v2298_v51, %v6506_v48  ;;  %v2427_v52 = vunpack.c.h.bf16 %v2259_v46 }
 0x471   : > { %v2479_v43 = vadd.f32 %v2453_v3, %v2431_v18  ;;  %v2560_v46 = vmax.f32 %v2480_v25, 0.0  ;;  %v2421_v51 = vunpack.c.h.bf16 %v7241_v4  ;;  %v2556_v18 = vmax.f32 %v2476_v24, 0.0 }
 0x472   : > { %v2570_v11 = vmax.f32 %v2490_v2, 0.0  ;;  %v2571_v27 = vmax.f32 %v2491_v50, 0.0  ;;  %v2477_v2 = vadd.f32 %v7279_v16, %v2429_v6  ;;  %v2423_v50 = vunpack.c.h.bf16 %v2257_v30 }
 0x473   : > { %v2475_v13 = vadd.f32 %v7283_v47, %v2427_v52  ;;  %v2582_v31 = vpack.c.bf16 %v2562_v45, %v2560_v46  ;;  %v2559_v5 = vmax.f32 %v2479_v43, 0.0  ;;  %v2447_v49 = vunpack.c.l.bf16 %v2303_v14 }
 0x474   : > { %v2586_v28 = vpack.c.bf16 %v2570_v11, %v2568_v21  ;;  %v2587_v36 = vpack.c.bf16 %v2571_v27, %v2569_v26  ;;  %v2478_v27 = vadd.f32 %v2453_v3, %v2430_v59  ;;  %v2561_v59 = vmax.f32 %v2481_v62, 0.0  ;;  %v2280_v21 = vpop.permute.xlu0 %2279 }
 0x475   : > { %v2422_v3 = vunpack.c.l.bf16 %v2257_v30  ;;  %v2420_v16 = vunpack.c.l.bf16 %v7241_v4  ;;  %v2472_v26 = vadd.f32 %v7271_v41, %v2424_v37  ;;  %v2473_v11 = vadd.f32 %v7271_v41, %v2425_v39 }
 0x476   : > { %2670 = vmatpush.bf16.msra.mxu0 %v2586_v28  ;;  %2719 = vmatpush.bf16.msra.mxu1 %v2587_v36  ;;  %v2583_v19 = vpack.c.bf16 %v2563_v54, %v2561_v59  ;;  %v2558_v35 = vmax.f32 %v2478_v27, 0.0  ;;  %v2557_v56 = vmax.f32 %v2477_v2, 0.0  ;;  %v2418_v47 = vunpack.c.l.bf16 %v2255_v40 }
 0x477   : > { %v2470_v28 = vadd.f32 %v7274_v32, %v2422_v3  ;;  %v2471_v36 = vadd.f32 %v7274_v32, %v2423_v50  ;;  %v2555_v0 = vmax.f32 %v2475_v13, 0.0  ;;  %v2446_v4 = vunpack.c.l.bf16 %v2294_v10 }
 0x478   : > { %v2580_v29 = vpack.c.bf16 %v2558_v35, %v2556_v18  ;;  %v2581_v22 = vpack.c.bf16 %v2559_v5, %v2557_v56  ;;  %v2285_v14 = vperm.slane %v2280_v21, %v6506_v48  ;;  %v2416_v30 = vunpack.c.l.bf16 %v7235_v8  ;;  %v5756_v21 = vld [vmem:[#allocation2 + $0xc0] sm:$0xff]  ;;  %v5759_v18 = vld [vmem:[#allocation2 + $0xd8] sm:$0xff] }
 0x479   : > { %v2417_v41 = vunpack.c.h.bf16 %v7235_v8  ;;  %v2468_v61 = vadd.f32 %v7281_v20, %v2420_v16  ;;  %v2469_v6 = vadd.f32 %v7281_v20, %v2421_v51  ;;  %v2552_v25 = vmax.f32 %v2472_v26, 0.0  ;;  %v5757_v26 = vld [vmem:[#allocation2 + $0xc8] sm:$0xff]  ;;  %v5760_v56 = vld [vmem:[#allocation2 + $0xe0] sm:$0xff] }
 0x47a   : > { %2671 = vmatpush.bf16.msra.mxu0 %v2584_v33  ;;  %2720 = vmatpush.bf16.msra.mxu1 %v2585_v53  ;;  %v2553_v62 = vmax.f32 %v2473_v11, 0.0  ;;  %v2414_v32 = vunpack.c.l.bf16 %v2253_v42  ;;  %v2415_v55 = vunpack.c.h.bf16 %v2253_v42  ;;  %v2466_v9 = vadd.f32 %v2447_v49, %v2418_v47  ;;  %v5758_v11 = vld [vmem:[#allocation2 + $0xd0] sm:$0xff]  ;;  %v5761_v47 = vld [vmem:[#allocation2 + $0xe8] sm:$0xff] }
 0x47b   : > { %v2467_v60 = vadd.f32 %v2447_v49, %v2419_v15  ;;  %v2578_v52 = vpack.c.bf16 %v2554_v57, %v2552_v25  ;;  %v2550_v43 = vmax.f32 %v2470_v28, 0.0  ;;  %v2551_v33 = vmax.f32 %v2471_v36, 0.0  ;;  %v5762_v15 = vld [vmem:[#allocation2 + $0xf0] sm:$0xff]  ;;  %v5763_v28 = vld [vmem:[#allocation2 + $0xf8] sm:$0xff] }
 0x47c   : > { %v2579_v27 = vpack.c.bf16 %v2555_v0, %v2553_v62  ;;  %v2445_v53 = vunpack.c.l.bf16 %v2285_v14  ;;  %v2412_v45 = vunpack.c.l.bf16 %v7229_v17  ;;  %v2413_v8 = vunpack.c.h.bf16 %v7229_v17 }
 0x47d   : > { %v2464_v54 = vadd.f32 %v2446_v4, %v2416_v30  ;;  %v2465_v10 = vadd.f32 %v2446_v4, %v2417_v41  ;;  %v2548_v20 = vmax.f32 %v2468_v61, 0.0  ;;  %v2549_v40 = vmax.f32 %v2469_v6, 0.0 }
 0x47e   : > { %2672 = vmatpush.bf16.msra.mxu0 %v2582_v31  ;;  %2721 = vmatpush.bf16.msra.mxu1 %v2583_v19  ;;  %v8072_v37 = vperm.slane %v7267_v7, %v6506_v48  ;;  %v2462_v24 = vadd.f32 %v2445_v53, %v2414_v32  ;;  %v2463_v2 = vadd.f32 %v2445_v53, %v2415_v55  ;;  %v2546_v3 = vmax.f32 %v2466_v9, 0.0 }
 0x47f   : > { %v2576_v46 = vpack.c.bf16 %v2550_v43, %v2548_v20  ;;  %v2577_v59 = vpack.c.bf16 %v2551_v33, %v2549_v40  ;;  %v2547_v50 = vmax.f32 %v2467_v60, 0.0  ;;  %v2544_v31 = vmax.f32 %v2464_v54, 0.0  ;;  %v2913_v20 = vpop.permute.xlu1 %2912 }
 0x480   : > { %v2444_v39 = vunpack.c.l.bf16 %v8072_v37  ;;  %v2545_v17 = vmax.f32 %v2465_v10, 0.0  ;;  %v2542_v5 = vmax.f32 %v2462_v24, 0.0  ;;  %v2543_v49 = vmax.f32 %v2463_v2, 0.0 }
 0x481   : > { %v2574_v19 = vpack.c.bf16 %v2546_v3, %v2544_v31  ;;  %v2895_v3 = vpop.permute.xlu0 %2894 }
 0x482   : > { %2673 = vmatpush.bf16.msra.mxu0 %v2580_v29  ;;  %2722 = vmatpush.bf16.msra.mxu1 %v2581_v22  ;;  %v2460_v34 = vadd.f32 %v2444_v39, %v2412_v45  ;;  %v2461_v13 = vadd.f32 %v2444_v39, %v2413_v8  ;;  %v2575_v35 = vpack.c.bf16 %v2547_v50, %v2545_v17  ;;  %v2922_v8 = vpop.permute.xlu2 %2921 }
 0x484   : > { %v2540_v42 = vmax.f32 %v2460_v34, 0.0  ;;  %v2541_v16 = vmax.f32 %v2461_v13, 0.0 }
 0x486   : > { %2674 = vmatpush.bf16.msra.mxu0 %v2578_v52  ;;  %2723 = vmatpush.bf16.msra.mxu1 %v2579_v27  ;;  %v2572_v7 = vpack.c.bf16 %v2542_v5, %v2540_v42  ;;  %v2573_v51 = vpack.c.bf16 %v2543_v49, %v2541_v16  ;;  %v2927_v42 = vperm.slane %v2922_v8, %v6506_v48 }
 0x489   : > { %v2886_v17 = vpop.permute.xlu0 %2885 }
 0x48a   : > { %2675 = vmatpush.bf16.msra.mxu0 %v2576_v46  ;;  %2724 = vmatpush.bf16.msra.mxu1 %v2577_v59  ;;  %v2877_v39 = vpop.permute.xlu2 %2876  ;;  %v2904_v46 = vpop.permute.xlu1 %2903 }
 0x48e   : > { %2676 = vmatpush.bf16.msra.mxu0 %v2574_v19  ;;  %2725 = vmatpush.bf16.msra.mxu1 %v2575_v35 }
 0x492   : > { %2677 = vmatpush.bf16.msra.mxu0 %v2572_v7  ;;  %2726 = vmatpush.bf16.msra.mxu1 %v2573_v51  ;;  %v2868_v59 = vpop.permute.xlu2 %2867  ;;  %v2859_v13 = vpop.permute.xlu1 %2858  ;;  %v2882_v51 = vperm.slane %v2877_v39, %v6506_v48 }
 0x495   : > { %2678 = vmatmul.bf16.vlgmr.msra.gmra.mxu0 %v5756_v21  ;;  %2727 = vmatmul.bf16.vlgmr.msra.gmra.mxu1 %v5756_v21  ;;  %v2873_v21 = vperm.slane %v2868_v59, %v6506_v48 }
 0x49a   : > { %v2823_v31 = vpop.permute.xlu2 %2822  ;;  %v2850_v5 = vpop.permute.xlu1 %2849 }
 0x4a2   : > { %v2814_v49 = vpop.permute.xlu2 %2813  ;;  %v7369_v59 = vpop.permute.xlu1 %2804 }
 0x4a5   : > { %2683 = vmatmul.bf16.gmra.mxu0 %v5757_v26  ;;  %2732 = vmatmul.bf16.gmra.mxu1 %v5757_v26  ;;  %v2918_v26 = vperm.slane %v2913_v20, %v6506_v48 }
 0x4b5   : > { %2688 = vmatmul.bf16.gmra.mxu0 %v5758_v11  ;;  %2737 = vmatmul.bf16.gmra.mxu1 %v5758_v11  ;;  %v2828_v11 = vperm.slane %v2823_v31, %v6506_v48 }
 0x4c5   : > { %2693 = vmatmul.bf16.gmra.mxu0 %v5759_v18  ;;  %2742 = vmatmul.bf16.gmra.mxu1 %v5759_v18  ;;  %v2909_v18 = vperm.slane %v2904_v46, %v6506_v48 }
 0x4c7   : > { %v2973_v8 = vunpack.c.l.bf16 %v2909_v18 }
 0x4d5   : > { %2698 = vmatmul.bf16.gmra.mxu0 %v5760_v56  ;;  %2747 = vmatmul.bf16.gmra.mxu1 %v5760_v56  ;;  %v2841_v56 = vpop.permute.xlu0 %2840 }
 0x4e5   : > { %2703 = vmatmul.bf16.gmra.mxu0 %v5761_v47  ;;  %2752 = vmatmul.bf16.gmra.mxu1 %v5761_v47  ;;  %v2900_v47 = vperm.slane %v2895_v3, %v6506_v48 }
 0x4e7   : > { %v2972_v39 = vunpack.c.l.bf16 %v2900_v47 }
 0x4f5   : > { %2708 = vmatmul.bf16.gmra.mxu0 %v5762_v15  ;;  %2757 = vmatmul.bf16.gmra.mxu1 %v5762_v15  ;;  %v2819_v15 = vperm.slane %v2814_v49, %v6506_v48 }
 0x4f7   : > { %v7367_v46 = vunpack.c.l.bf16 %v2819_v15 }
 0x505   : > { %2713 = vmatmul.bf16.gmra.mxu0 %v5763_v28  ;;  %2762 = vmatmul.bf16.gmra.mxu1 %v5763_v28 }
 0x512   : > { %v2679_v36 = vpop.f32.mrf.mxu0  ;;  %v2728_v29 = vpop.f32.mrf.mxu1 }
 0x513   : > { %v7321_v22 = vpack.c.bf16 %v2728_v29, %v2679_v36  ;;  %v2975_v36 = vunpack.c.l.bf16 %v2927_v42  ;;  %v2864_v29 = vperm.slane %v2859_v13, %v6506_v48 }
 0x515   : > { %v7371_v31 = vunpack.c.l.bf16 %v2864_v29 }
 0x51a   : > { %v7323_v57 = vpop.f32.mrf.mxu0  ;;  %v7325_v0 = vpop.f32.mrf.mxu1 }
 0x522   : > { %v2684_v4 = vpop.f32.mrf.mxu0  ;;  %v2733_v14 = vpop.f32.mrf.mxu1 }
 0x523   : > { %v7327_v30 = vpack.c.bf16 %v2733_v14, %v2684_v4  ;;  %v2891_v4 = vperm.slane %v2886_v17, %v6506_v48  ;;  %v2855_v14 = vperm.slane %v2850_v5, %v6506_v48 }
 0x525   : > { %v2971_v17 = vunpack.c.l.bf16 %v2891_v4  ;;  %v7373_v5 = vunpack.c.l.bf16 %v2855_v14 }
 0x52a   : > { %v7329_v41 = vpop.f32.mrf.mxu0  ;;  %v7331_v61 = vpop.f32.mrf.mxu1 }
 0x532   : > { %v2689_v6 = vpop.f32.mrf.mxu0  ;;  %v2738_v25 = vpop.f32.mrf.mxu1 }
 0x533   : > { %v7333_v62 = vpack.c.bf16 %v2738_v25, %v2689_v6  ;;  %v2970_v6 = vunpack.c.l.bf16 %v2882_v51  ;;  %v7362_v25 = vunpack.c.l.bf16 %v2873_v21 }
 0x53a   : > { %v7335_v32 = vpop.f32.mrf.mxu0  ;;  %v7337_v55 = vpop.f32.mrf.mxu1 }
 0x542   : > { %v2694_v9 = vpop.f32.mrf.mxu0  ;;  %v2743_v60 = vpop.f32.mrf.mxu1 }
 0x543   : > { %v7339_v52 = vpack.c.bf16 %v2743_v60, %v2694_v9  ;;  %v2846_v9 = vperm.slane %v2841_v56, %v6506_v48 }
 0x54a   : > { %v7341_v27 = vpop.f32.mrf.mxu0  ;;  %v7343_v43 = vpop.f32.mrf.mxu1 }
 0x552   : > { %v2699_v33 = vpop.f32.mrf.mxu0  ;;  %v2748_v53 = vpop.f32.mrf.mxu1 }
 0x553   : > { %v7345_v45 = vpack.c.bf16 %v2748_v53, %v2699_v33  ;;  %v2974_v33 = vunpack.c.l.bf16 %v2918_v26  ;;  %v7365_v53 = vunpack.c.l.bf16 %v2828_v11 }
 0x55a   : > { %v7347_v54 = vpop.f32.mrf.mxu0  ;;  %v7349_v10 = vpop.f32.mrf.mxu1 }
 0x562   : > { %v2704_v40 = vpop.f32.mrf.mxu0  ;;  %v2753_v37 = vpop.f32.mrf.mxu1 }
 0x563   : > { %v2778_v51 = vpack.c.bf16 %v2753_v37, %v2704_v40 }
 0x565   : > { %v2949_v40 = vunpack.c.h.bf16 %v2778_v51 }
 0x56a   : > { %v2706_v24 = vpop.f32.mrf.mxu0  ;;  %v2755_v2 = vpop.f32.mrf.mxu1 }
 0x56b   : > { %v2779_v49 = vpack.c.bf16 %v2755_v2, %v2706_v24  ;;  %v2775_v24 = vpack.c.bf16 %v7343_v43, %v7341_v27  ;;  %v2777_v2 = vpack.c.bf16 %v7349_v10, %v7347_v54 }
 0x56d   : > { %v2950_v15 = vunpack.c.l.bf16 %v2779_v49  ;;  %v2947_v27 = vunpack.c.h.bf16 %v2777_v2 }
 0x56f   : > { %v2998_v43 = vadd.f32 %v2971_v17, %v2950_v15 }
 0x572   : > { %v2709_v50 = vpop.f32.mrf.mxu0  ;;  %v2758_v34 = vpop.f32.mrf.mxu1 }
 0x573   : > { %v2780_v20 = vpack.c.bf16 %v2758_v34, %v2709_v50  ;;  %v2810_v34 = vperm.slane %v7369_v59, %v6506_v48  ;;  %v2832_v59 = vpop.permute.xlu0 %2831 }
 0x575   : > { %v2952_v21 = vunpack.c.l.bf16 %v2780_v20  ;;  %v2953_v26 = vunpack.c.h.bf16 %v2780_v20 }
 0x577   : > { %v3000_v37 = vadd.f32 %v2972_v39, %v2952_v21  ;;  %v3001_v20 = vadd.f32 %v2972_v39, %v2953_v26  ;;  %v2944_v39 = vunpack.c.l.bf16 %v7345_v45  ;;  %v2997_v21 = vadd.f32 %v2970_v6, %v2949_v40 }
 0x579   : > { %v3080_v26 = vmax.f32 %v3000_v37, 0.0 }
 0x57a   : > { %v2711_v19 = vpop.f32.mrf.mxu0  ;;  %v2760_v35 = vpop.f32.mrf.mxu1 }
 0x57b   : > { %v2781_v60 = vpack.c.bf16 %v2760_v35, %v2711_v19  ;;  %v7375_v35 = vunpack.c.l.bf16 %v2846_v9 }
 0x582   : > { %v2714_v16 = vpop.f32.mrf.mxu0  ;;  %v2763_v7 = vpop.f32.mrf.mxu1 }
 0x583   : > { %v2782_v28 = vpack.c.bf16 %v2763_v7, %v2714_v16  ;;  %v2954_v16 = vunpack.c.l.bf16 %v2781_v60  ;;  %v2955_v7 = vunpack.c.h.bf16 %v2781_v60  ;;  %v2948_v60 = vunpack.c.l.bf16 %v2778_v51 }
 0x585   : > { %v2956_v3 = vunpack.c.l.bf16 %v2782_v28  ;;  %v2957_v13 = vunpack.c.h.bf16 %v2782_v28  ;;  %v2951_v28 = vunpack.c.h.bf16 %v2779_v49  ;;  %v3002_v29 = vadd.f32 %v2973_v8, %v2954_v16 }
 0x586   : > { %v3003_v4 = vadd.f32 %v2973_v8, %v2955_v7  ;;  %v2837_v8 = vperm.slane %v2832_v59, %v6506_v48  ;;  %v2945_v7 = vunpack.c.h.bf16 %v7345_v45  ;;  %v2996_v51 = vadd.f32 %v2970_v6, %v2948_v60 }
 0x587   : > { %v3004_v11 = vadd.f32 %v2974_v33, %v2956_v3  ;;  %v3005_v18 = vadd.f32 %v2974_v33, %v2957_v13  ;;  %v3082_v49 = vmax.f32 %v3002_v29, 0.0  ;;  %v2771_v45 = vpack.c.bf16 %v7331_v61, %v7329_v41 }
 0x588   : > { %v3083_v16 = vmax.f32 %v3003_v4, 0.0  ;;  %v2940_v6 = vunpack.c.l.bf16 %v7339_v52  ;;  %v2941_v29 = vunpack.c.h.bf16 %v7339_v52  ;;  %v2992_v4 = vadd.f32 %v7371_v31, %v2944_v39 }
 0x589   : > { %v3084_v33 = vmax.f32 %v3004_v11, 0.0  ;;  %v3085_v3 = vmax.f32 %v3005_v18, 0.0  ;;  %v3081_v11 = vmax.f32 %v3001_v20, 0.0  ;;  %v2943_v18 = vunpack.c.h.bf16 %v2775_v24 }
 0x58a   : > { %v2716_v42 = vpop.f32.mrf.mxu0  ;;  %v2765_v19 = vpop.f32.mrf.mxu1  ;;  %v2965_v59 = vunpack.c.l.bf16 %v2837_v8  ;;  %v2769_v52 = vpack.c.bf16 %v7325_v0, %v7323_v57 }
 0x58b   : > { %v2783_v50 = vpack.c.bf16 %v2765_v19, %v2716_v42  ;;  %v2946_v19 = vunpack.c.l.bf16 %v2777_v2  ;;  %v3100_v2 = vpack.c.bf16 %v3082_v49, %v3080_v26  ;;  %v3101_v15 = vpack.c.bf16 %v3083_v16, %v3081_v11 }
 0x58c   : > { %v2930_v26 = vunpack.c.l.bf16 %v2769_v52  ;;  %v2931_v11 = vunpack.c.h.bf16 %v2769_v52 }
 0x58d   : > { %v2958_v56 = vunpack.c.l.bf16 %v2783_v50  ;;  %v2959_v47 = vunpack.c.h.bf16 %v2783_v50  ;;  %v2999_v50 = vadd.f32 %v2971_v17, %v2951_v28  ;;  %v2942_v17 = vunpack.c.l.bf16 %v2775_v24 }
 0x58e   : > { %v3078_v28 = vmax.f32 %v2998_v43, 0.0  ;;  %v2993_v24 = vadd.f32 %v7371_v31, %v2945_v7  ;;  %v2936_v31 = vunpack.c.l.bf16 %v7333_v62  ;;  %v2934_v43 = vunpack.c.l.bf16 %v2771_v45 }
 0x58f   : > { %v3006_v14 = vadd.f32 %v2975_v36, %v2958_v56  ;;  %v3007_v9 = vadd.f32 %v2975_v36, %v2959_v47  ;;  %v2773_v36 = vpack.c.bf16 %v7337_v55, %v7335_v32  ;;  %v2994_v56 = vadd.f32 %v7362_v25, %v2946_v19 }
 0x590   : > { %v2995_v47 = vadd.f32 %v7362_v25, %v2947_v27  ;;  %v3079_v32 = vmax.f32 %v2999_v50, 0.0  ;;  %v2962_v55 = vunpack.c.l.bf16 %v2810_v34  ;;  %v2990_v40 = vadd.f32 %v7373_v5, %v2942_v17 }
 0x591   : > { %v3086_v13 = vmax.f32 %v3006_v14, 0.0  ;;  %v3087_v42 = vmax.f32 %v3007_v9, 0.0  ;;  %v3076_v14 = vmax.f32 %v2996_v51, 0.0  ;;  %v3077_v9 = vmax.f32 %v2997_v21, 0.0 }
 0x592   : > { %v2938_v25 = vunpack.c.l.bf16 %v2773_v36  ;;  %v2939_v60 = vunpack.c.h.bf16 %v2773_v36  ;;  %v2991_v34 = vadd.f32 %v7373_v5, %v2943_v18  ;;  %v3074_v61 = vmax.f32 %v2994_v56, 0.0 }
 0x593   : > { %v3102_v54 = vpack.c.bf16 %v3086_v13, %v3084_v33  ;;  %v3103_v10 = vpack.c.bf16 %v3087_v42, %v3085_v3  ;;  %v3098_v37 = vpack.c.bf16 %v3078_v28, %v3076_v14  ;;  %v3099_v41 = vpack.c.bf16 %v3079_v32, %v3077_v9  ;;  %v2796_v3 = vpop.permute.xlu1 %2795  ;;  %v2787_v13 = vpop.permute.xlu0 %2786 }
 0x594   : > { %v3075_v20 = vmax.f32 %v2995_v47, 0.0  ;;  %v2937_v33 = vunpack.c.h.bf16 %v7333_v62  ;;  %v2988_v42 = vadd.f32 %v7375_v35, %v2940_v6  ;;  %v2989_v19 = vadd.f32 %v7375_v35, %v2941_v29 }
 0x595   : > { %3186 = vmatpush.bf16.msrb.mxu2 %v3102_v54  ;;  %3235 = vmatpush.bf16.msrb.mxu3 %v3103_v10  ;;  %v3072_v27 = vmax.f32 %v2992_v4, 0.0  ;;  %v3073_v5 = vmax.f32 %v2993_v24, 0.0  ;;  %v2935_v50 = vunpack.c.h.bf16 %v2771_v45  ;;  %v2986_v54 = vadd.f32 %v2965_v59, %v2938_v25 }
 0x596   : > { %v2987_v10 = vadd.f32 %v2965_v59, %v2939_v60  ;;  %v3070_v0 = vmax.f32 %v2990_v40, 0.0  ;;  %v3071_v16 = vmax.f32 %v2991_v34, 0.0  ;;  %v2801_v62 = vperm.slane %v2796_v3, %v6506_v48  ;;  %v5764_v3 = vld [vmem:[#allocation2 + $0x100] sm:$0xff] }
 0x597   : > { %v3096_v49 = vpack.c.bf16 %v3074_v61, %v3072_v27  ;;  %v3097_v57 = vpack.c.bf16 %v3075_v20, %v3073_v5  ;;  %v2792_v8 = vperm.slane %v2787_v13, %v6506_v48  ;;  %v2932_v36 = vunpack.c.l.bf16 %v7327_v30  ;;  %v5765_v13 = vld [vmem:[#allocation2 + $0x108] sm:$0xff]  ;;  %v5768_v27 = vld [vmem:[#allocation2 + $0x120] sm:$0xff] }
 0x598   : > { %v2933_v35 = vunpack.c.h.bf16 %v7327_v30  ;;  %v2984_v39 = vadd.f32 %v7365_v53, %v2936_v31  ;;  %v2985_v7 = vadd.f32 %v7365_v53, %v2937_v33  ;;  %v3068_v51 = vmax.f32 %v2988_v42, 0.0  ;;  %v5766_v42 = vld [vmem:[#allocation2 + $0x110] sm:$0xff]  ;;  %v5769_v5 = vld [vmem:[#allocation2 + $0x128] sm:$0xff] }
 0x599   : > { %3187 = vmatpush.bf16.msrb.mxu2 %v3100_v2  ;;  %3236 = vmatpush.bf16.msrb.mxu3 %v3101_v15  ;;  %v3069_v21 = vmax.f32 %v2989_v19, 0.0  ;;  %v2982_v17 = vadd.f32 %v7367_v46, %v2934_v43  ;;  %v2983_v18 = vadd.f32 %v7367_v46, %v2935_v50  ;;  %v3066_v2 = vmax.f32 %v2986_v54, 0.0  ;;  %v5767_v19 = vld [vmem:[#allocation2 + $0x118] sm:$0xff]  ;;  %v5770_v43 = vld [vmem:[#allocation2 + $0x130] sm:$0xff] }
 0x59a   : > { %v3094_v56 = vpack.c.bf16 %v3070_v0, %v3068_v51  ;;  %v3067_v15 = vmax.f32 %v2987_v10, 0.0  ;;  %v2961_v28 = vunpack.c.l.bf16 %v2801_v62  ;;  %v2928_v30 = vunpack.c.l.bf16 %v7321_v22  ;;  %v5771_v50 = vld [vmem:[#allocation2 + $0x138] sm:$0xff] }
 0x59b   : > { %v3095_v47 = vpack.c.bf16 %v3071_v16, %v3069_v21  ;;  %v2929_v32 = vunpack.c.h.bf16 %v7321_v22  ;;  %v2980_v53 = vadd.f32 %v2962_v55, %v2932_v36  ;;  %v2981_v45 = vadd.f32 %v2962_v55, %v2933_v35 }
 0x59c   : > { %v3064_v6 = vmax.f32 %v2984_v39, 0.0  ;;  %v3065_v29 = vmax.f32 %v2985_v7, 0.0  ;;  %v2960_v4 = vunpack.c.l.bf16 %v2792_v8  ;;  %v2978_v24 = vadd.f32 %v2961_v28, %v2930_v26 }
 0x59d   : > { %3188 = vmatpush.bf16.msrb.mxu2 %v3098_v37  ;;  %3237 = vmatpush.bf16.msrb.mxu3 %v3099_v41  ;;  %v2979_v14 = vadd.f32 %v2961_v28, %v2931_v11  ;;  %v3062_v25 = vmax.f32 %v2982_v17, 0.0  ;;  %v3063_v60 = vmax.f32 %v2983_v18, 0.0  ;;  %v3060_v37 = vmax.f32 %v2980_v53, 0.0  ;;  %v3429_v11 = vpop.permute.xlu2 %3428  ;;  %v3411_v28 = vpop.permute.xlu1 %3410 }
 0x59e   : > { %v3092_v9 = vpack.c.bf16 %v3066_v2, %v3064_v6  ;;  %v3093_v46 = vpack.c.bf16 %v3067_v15, %v3065_v29  ;;  %v2976_v40 = vadd.f32 %v2960_v4, %v2928_v30  ;;  %v2977_v34 = vadd.f32 %v2960_v4, %v2929_v32  ;;  %v3438_v30 = vpop.permute.xlu0 %3437 }
 0x59f   : > { %v3061_v41 = vmax.f32 %v2981_v45, 0.0  ;;  %v3090_v22 = vpack.c.bf16 %v3062_v25, %v3060_v37  ;;  %v3058_v55 = vmax.f32 %v2978_v24, 0.0  ;;  %v3059_v20 = vmax.f32 %v2979_v14, 0.0 }
 0x5a0   : > { %v3056_v59 = vmax.f32 %v2976_v40, 0.0  ;;  %v3057_v52 = vmax.f32 %v2977_v34, 0.0 }
 0x5a1   : > { %3189 = vmatpush.bf16.msrb.mxu2 %v3096_v49  ;;  %3238 = vmatpush.bf16.msrb.mxu3 %v3097_v57  ;;  %v3091_v61 = vpack.c.bf16 %v3063_v60, %v3061_v41 }
 0x5a2   : > { %v3088_v31 = vpack.c.bf16 %v3058_v55, %v3056_v59  ;;  %v3089_v33 = vpack.c.bf16 %v3059_v20, %v3057_v52  ;;  %v3434_v55 = vperm.slane %v3429_v11, %v6506_v48 }
 0x5a5   : > { %3190 = vmatpush.bf16.msrb.mxu2 %v3094_v56  ;;  %3239 = vmatpush.bf16.msrb.mxu3 %v3095_v47  ;;  %v3420_v15 = vpop.permute.xlu2 %3419  ;;  %v3402_v29 = vpop.permute.xlu1 %3401 }
 0x5a6   : > { %v3393_v4 = vpop.permute.xlu0 %3392  ;;  %v3425_v52 = vperm.slane %v3420_v15, %v6506_v48 }
 0x5a9   : > { %3191 = vmatpush.bf16.msrb.mxu2 %v3092_v9  ;;  %3240 = vmatpush.bf16.msrb.mxu3 %v3093_v46 }
 0x5ad   : > { %3192 = vmatpush.bf16.msrb.mxu2 %v3090_v22  ;;  %3241 = vmatpush.bf16.msrb.mxu3 %v3091_v61  ;;  %v3375_v6 = vpop.permute.xlu2 %3374  ;;  %v3357_v46 = vpop.permute.xlu1 %3356 }
 0x5ae   : > { %v3384_v40 = vpop.permute.xlu0 %3383 }
 0x5af   : > { %v3389_v11 = vperm.slane %v3384_v40, %v6506_v48 }
 0x5b1   : > { %3193 = vmatpush.bf16.msrb.mxu2 %v3088_v31  ;;  %3242 = vmatpush.bf16.msrb.mxu3 %v3089_v33  ;;  %v3380_v31 = vperm.slane %v3375_v6, %v6506_v48 }
 0x5b4   : > { %3194 = vmatmul.bf16.vlgmr.msrb.gmra.mxu2 %v5764_v3  ;;  %3243 = vmatmul.bf16.vlgmr.msrb.gmra.mxu3 %v5764_v3  ;;  %v3416_v3 = vperm.slane %v3411_v28, %v6506_v48 }
 0x5b5   : > { %v3366_v9 = vpop.permute.xlu2 %3365  ;;  %v3348_v22 = vpop.permute.xlu1 %3347 }
 0x5b6   : > { %v3339_v61 = vpop.permute.xlu0 %3338  ;;  %v3371_v33 = vperm.slane %v3366_v9, %v6506_v48  ;;  %v3353_v6 = vperm.slane %v3348_v22, %v6506_v48 }
 0x5bd   : > { %v3321_v34 = vpop.permute.xlu2 %3320 }
 0x5c4   : > { %3199 = vmatmul.bf16.gmra.mxu2 %v5765_v13  ;;  %3248 = vmatmul.bf16.gmra.mxu3 %v5765_v13 }
 0x5c5   : > { %v3312_v13 = vpop.permute.xlu2 %3311 }
 0x5d4   : > { %3204 = vmatmul.bf16.gmra.mxu2 %v5766_v42  ;;  %3253 = vmatmul.bf16.gmra.mxu3 %v5766_v42  ;;  %v3443_v42 = vperm.slane %v3438_v30, %v6506_v48 }
 0x5d6   : > { %v7472_v15 = vunpack.c.l.bf16 %v3443_v42 }
 0x5e4   : > { %3209 = vmatmul.bf16.gmra.mxu2 %v5767_v19  ;;  %3258 = vmatmul.bf16.gmra.mxu3 %v5767_v19  ;;  %v3326_v19 = vperm.slane %v3321_v34, %v6506_v48 }
 0x5e6   : > { %v3478_v28 = vunpack.c.l.bf16 %v3326_v19 }
 0x5f4   : > { %3214 = vmatmul.bf16.gmra.mxu2 %v5768_v27  ;;  %3263 = vmatmul.bf16.gmra.mxu3 %v5768_v27  ;;  %v3407_v27 = vperm.slane %v3402_v29, %v6506_v48  ;;  %v3344_v29 = vperm.slane %v3339_v61, %v6506_v48 }
 0x5f6   : > { %v7474_v30 = vunpack.c.l.bf16 %v3407_v27 }
 0x604   : > { %3219 = vmatmul.bf16.gmra.mxu2 %v5769_v5  ;;  %3268 = vmatmul.bf16.gmra.mxu3 %v5769_v5  ;;  %v7458_v5 = vunpack.c.l.bf16 %v3434_v55 }
 0x614   : > { %3224 = vmatmul.bf16.gmra.mxu2 %v5770_v43  ;;  %3273 = vmatmul.bf16.gmra.mxu3 %v5770_v43  ;;  %v3398_v43 = vperm.slane %v3393_v4, %v6506_v48 }
 0x624   : > { %3229 = vmatmul.bf16.gmra.mxu2 %v5771_v50  ;;  %3278 = vmatmul.bf16.gmra.mxu3 %v5771_v50  ;;  %v3303_v50 = vpop.permute.xlu1 %3302 }
 0x637   : > { %v3195_v54 = vpop.f32.mrf.mxu2  ;;  %v3244_v10 = vpop.f32.mrf.mxu3 }
 0x638   : > { %v7414_v49 = vpack.c.bf16 %v3244_v10, %v3195_v54  ;;  %v7461_v54 = vunpack.c.l.bf16 %v3425_v52  ;;  %v7463_v10 = vunpack.c.l.bf16 %v3380_v31  ;;  %v7486_v52 = vunpack.c.l.bf16 %v3389_v11 }
 0x63a   : > { %v3445_v34 = vunpack.c.h.bf16 %v7414_v49 }
 0x63f   : > { %v3197_v57 = vpop.f32.mrf.mxu2  ;;  %v3246_v0 = vpop.f32.mrf.mxu3 }
 0x647   : > { %v3200_v16 = vpop.f32.mrf.mxu2  ;;  %v3249_v62 = vpop.f32.mrf.mxu3 }
 0x648   : > { %v7416_v8 = vpack.c.bf16 %v3249_v62, %v3200_v16  ;;  %v7465_v16 = vunpack.c.l.bf16 %v3371_v33  ;;  %v3317_v62 = vperm.slane %v3312_v13, %v6506_v48  ;;  %v3480_v13 = vunpack.c.l.bf16 %v3344_v29 }
 0x64a   : > { %v3477_v40 = vunpack.c.l.bf16 %v3317_v62 }
 0x64f   : > { %v7418_v36 = vpop.f32.mrf.mxu2  ;;  %v7420_v35 = vpop.f32.mrf.mxu3 }
 0x650   : > { %v3287_v4 = vpack.c.bf16 %v7420_v35, %v7418_v36  ;;  %v3448_v36 = vunpack.c.l.bf16 %v7416_v8  ;;  %v3449_v35 = vunpack.c.h.bf16 %v7416_v8 }
 0x652   : > { %v3450_v42 = vunpack.c.l.bf16 %v3287_v4  ;;  %v3451_v19 = vunpack.c.h.bf16 %v3287_v4  ;;  %v7506_v11 = vadd.f32 %v3478_v28, %v3448_v36 }
 0x657   : > { %v3205_v39 = vpop.f32.mrf.mxu2  ;;  %v3254_v7 = vpop.f32.mrf.mxu3 }
 0x658   : > { %v7422_v51 = vpack.c.bf16 %v3254_v7, %v3205_v39  ;;  %v7468_v39 = vunpack.c.l.bf16 %v3416_v3  ;;  %v3362_v7 = vperm.slane %v3357_v46, %v6506_v48  ;;  %v3481_v3 = vunpack.c.l.bf16 %v3353_v6 }
 0x65a   : > { %v3482_v55 = vunpack.c.l.bf16 %v3362_v7 }
 0x65f   : > { %v7424_v21 = vpop.f32.mrf.mxu2  ;;  %v7426_v26 = vpop.f32.mrf.mxu3 }
 0x660   : > { %v3289_v22 = vpack.c.bf16 %v7426_v26, %v7424_v21  ;;  %v3453_v21 = vunpack.c.h.bf16 %v7422_v51 }
 0x662   : > { %v3454_v26 = vunpack.c.l.bf16 %v3289_v22  ;;  %v3455_v29 = vunpack.c.h.bf16 %v3289_v22 }
 0x667   : > { %v3210_v17 = vpop.f32.mrf.mxu2  ;;  %v3259_v18 = vpop.f32.mrf.mxu3 }
 0x668   : > { %v7428_v56 = vpack.c.bf16 %v3259_v18, %v3210_v17  ;;  %v3330_v17 = vpop.permute.xlu0 %3329  ;;  %v3285_v18 = vpack.c.bf16 %v3246_v0, %v3197_v57  ;;  %v3444_v0 = vunpack.c.l.bf16 %v7414_v49 }
 0x669   : > { %v3335_v57 = vperm.slane %v3330_v17, %v6506_v48  ;;  %v7508_v17 = vadd.f32 %v3478_v28, %v3449_v35  ;;  %v7521_v28 = vadd.f32 %v3481_v3, %v3454_v26 }
 0x66a   : > { %v3446_v31 = vunpack.c.l.bf16 %v3285_v18  ;;  %v3447_v33 = vunpack.c.h.bf16 %v3285_v18 }
 0x66b   : > { %v3479_v27 = vunpack.c.l.bf16 %v3335_v57 }
 0x66c   : > { %v7497_v62 = vadd.f32 %v3477_v40, %v3446_v31  ;;  %v7504_v8 = vadd.f32 %v3477_v40, %v3447_v33 }
 0x66d   : > { %v7512_v6 = vadd.f32 %v3479_v27, %v3451_v19 }
 0x66f   : > { %v7430_v47 = vpop.f32.mrf.mxu2  ;;  %v7432_v2 = vpop.f32.mrf.mxu3 }
 0x670   : > { %v7502_v7 = vpack.c.bf16 %v7432_v2, %v7430_v47  ;;  %v3456_v47 = vunpack.c.l.bf16 %v7428_v56  ;;  %v3457_v2 = vunpack.c.h.bf16 %v7428_v56 }
 0x672   : > { %v7530_v35 = vadd.f32 %v3482_v55, %v3456_v47 }
 0x677   : > { %v3215_v32 = vpop.f32.mrf.mxu2  ;;  %v3264_v53 = vpop.f32.mrf.mxu3 }
 0x678   : > { %v7434_v45 = vpack.c.bf16 %v3264_v53, %v3215_v32  ;;  %v3308_v32 = vperm.slane %v3303_v50, %v6506_v48  ;;  %v7477_v53 = vunpack.c.l.bf16 %v3398_v43  ;;  %v3452_v50 = vunpack.c.l.bf16 %v7422_v51 }
 0x67a   : > { %v3476_v61 = vunpack.c.l.bf16 %v3308_v32  ;;  %v7510_v32 = vadd.f32 %v3479_v27, %v3450_v42 }
 0x67c   : > { %v7492_v43 = vadd.f32 %v3476_v61, %v3444_v0  ;;  %v7494_v49 = vadd.f32 %v3476_v61, %v3445_v34  ;;  %v7515_v0 = vadd.f32 %v3480_v13, %v3452_v50  ;;  %v7519_v34 = vadd.f32 %v3480_v13, %v3453_v21 }
 0x67d   : > { %v7526_v61 = vadd.f32 %v3481_v3, %v3455_v29  ;;  %v7532_v13 = vadd.f32 %v3482_v55, %v3457_v2 }
 0x67f   : > { %v7436_v24 = vpop.f32.mrf.mxu2  ;;  %v7438_v14 = vpop.f32.mrf.mxu3 }
 0x687   : > { %v7440_v25 = vpop.f32.mrf.mxu2  ;;  %v7442_v60 = vpop.f32.mrf.mxu3 }
 0x688   : > { %v3294_v33 = vpack.c.bf16 %v7442_v60, %v7440_v25  ;;  %v3460_v25 = vunpack.c.l.bf16 %v7434_v45 }
 0x68a   : > { %v3464_v21 = vunpack.c.l.bf16 %v3294_v33  ;;  %v3465_v26 = vunpack.c.h.bf16 %v3294_v33 }
 0x68f   : > { %v7444_v37 = vpop.f32.mrf.mxu2  ;;  %v7446_v41 = vpop.f32.mrf.mxu3 }
 0x697   : > { %v7449_v20 = vpop.f32.mrf.mxu2  ;;  %v3274_v59 = vpop.f32.mrf.mxu3 }
 0x698   : > { %v3296_v4 = vpack.c.bf16 %v3274_v59, %v7449_v20 }
 0x69a   : > { %v3468_v56 = vunpack.c.l.bf16 %v3296_v4  ;;  %v3469_v36 = vunpack.c.h.bf16 %v3296_v4 }
 0x69f   : > { %v3227_v9 = vpop.f32.mrf.mxu2  ;;  %v3276_v46 = vpop.f32.mrf.mxu3 }
 0x6a0   : > { %v3297_v18 = vpack.c.bf16 %v3276_v46, %v3227_v9  ;;  %v3458_v9 = vunpack.c.l.bf16 %v7502_v7  ;;  %v3295_v46 = vpack.c.bf16 %v7446_v41, %v7444_v37  ;;  %v3459_v37 = vunpack.c.h.bf16 %v7502_v7 }
 0x6a1   : > { %v3293_v41 = vpack.c.bf16 %v7438_v14, %v7436_v24  ;;  %v3517_v7 = vadd.f32 %v7468_v39, %v3469_v36  ;;  %v3461_v24 = vunpack.c.h.bf16 %v7434_v45  ;;  %v3508_v45 = vadd.f32 %v7463_v10, %v3460_v25 }
 0x6a2   : > { %v3470_v31 = vunpack.c.l.bf16 %v3297_v18  ;;  %v3471_v20 = vunpack.c.h.bf16 %v3297_v18  ;;  %v3466_v3 = vunpack.c.l.bf16 %v3295_v46  ;;  %v3467_v27 = vunpack.c.h.bf16 %v3295_v46 }
 0x6a3   : > { %v7540_v50 = vadd.f32 %v7465_v16, %v3458_v9  ;;  %v3463_v47 = vunpack.c.h.bf16 %v3293_v41 }
 0x6a4   : > { %v3518_v60 = vadd.f32 %v7461_v54, %v3470_v31  ;;  %v3519_v55 = vadd.f32 %v7461_v54, %v3471_v20  ;;  %v3514_v2 = vadd.f32 %v7474_v30, %v3466_v3  ;;  %v3512_v20 = vadd.f32 %v7477_v53, %v3464_v21 }
 0x6a5   : > { %v3507_v3 = vadd.f32 %v7465_v16, %v3459_v37 }
 0x6a6   : > { %v3598_v54 = vmax.f32 %v3518_v60, 0.0  ;;  %v3599_v9 = vmax.f32 %v3519_v55, 0.0  ;;  %v3509_v55 = vadd.f32 %v7463_v10, %v3461_v24  ;;  %v3592_v21 = vmax.f32 %v3512_v20, 0.0 }
 0x6a7   : > { %v3230_v51 = vpop.f32.mrf.mxu2  ;;  %v3279_v57 = vpop.f32.mrf.mxu3 }
 0x6a8   : > { %v3298_v40 = vpack.c.bf16 %v3279_v57, %v3230_v51  ;;  %v3462_v57 = vunpack.c.l.bf16 %v3293_v41 }
 0x6aa   : > { %v3472_v59 = vunpack.c.l.bf16 %v3298_v40  ;;  %v3473_v22 = vunpack.c.h.bf16 %v3298_v40  ;;  %v3515_v40 = vadd.f32 %v7474_v30, %v3467_v27  ;;  %v3511_v30 = vadd.f32 %v7486_v52, %v3463_v47 }
 0x6ab   : > { %v3617_v27 = vpack.c.bf16 %v3599_v9, %v3598_v54  ;;  %v3589_v47 = vmax.f32 %v3509_v55, 0.0  ;;  %v3578_v55 = vmax.f32 %v7510_v32, 0.0 }
 0x6ac   : > { %v3520_v42 = vadd.f32 %v7458_v5, %v3472_v59  ;;  %v3521_v19 = vadd.f32 %v7458_v5, %v3473_v22  ;;  %v3516_v5 = vadd.f32 %v7468_v39, %v3468_v56  ;;  %v3513_v39 = vadd.f32 %v7477_v53, %v3465_v26 }
 0x6ad   : > { %v3597_v22 = vmax.f32 %v3517_v7, 0.0  ;;  %v3595_v41 = vmax.f32 %v3515_v40, 0.0  ;;  %v3646_v16 = vunpack.c.l.bf16 %v3617_v27  ;;  %v3647_v37 = vunpack.c.h.bf16 %v3617_v27 }
 0x6ae   : > { %v3600_v14 = vmax.f32 %v3520_v42, 0.0  ;;  %v3601_v4 = vmax.f32 %v3521_v19, 0.0  ;;  %v3596_v59 = vmax.f32 %v3516_v5, 0.0  ;;  %v3510_v42 = vadd.f32 %v7486_v52, %v3462_v57 }
 0x6af   : > { %v3232_v18 = vpop.f32.mrf.mxu2  ;;  %v3281_v29 = vpop.f32.mrf.mxu3  ;;  %v3594_v19 = vmax.f32 %v3514_v2, 0.0  ;;  %v3593_v25 = vmax.f32 %v3513_v39, 0.0  ;;  %v3586_v5 = vmax.f32 %v7540_v50, 0.0  ;;  %v3591_v52 = vmax.f32 %v3511_v30, 0.0 }
 0x6b0   : > { %v3299_v51 = vpack.c.bf16 %v3281_v29, %v3232_v18  ;;  %v3618_v33 = vpack.c.bf16 %v3601_v4, %v3600_v14  ;;  %v3616_v26 = vpack.c.bf16 %v3597_v22, %v3596_v59  ;;  %v3588_v29 = vmax.f32 %v3508_v45, 0.0 }
 0x6b1   : > { %v3590_v14 = vmax.f32 %v3510_v42, 0.0  ;;  %v3615_v4 = vpack.c.bf16 %v3595_v41, %v3594_v19  ;;  %v3614_v2 = vpack.c.bf16 %v3593_v25, %v3592_v21  ;;  %v3678_v45 = vadd.f32 %v3646_v16, %v7104_v44  ;;  %v8079_v16 = vld [vmem:[#allocation14_spill] sm:$0xff] }
 0x6b2   : > { %v3474_v46 = vunpack.c.l.bf16 %v3299_v51  ;;  %v3475_v31 = vunpack.c.h.bf16 %v3299_v51  ;;  %v3648_v7 = vunpack.c.l.bf16 %v3618_v33  ;;  %v3644_v40 = vunpack.c.l.bf16 %v3616_v26 }
 0x6b3   : > { %v3645_v10 = vunpack.c.h.bf16 %v3616_v26  ;;  %v3642_v20 = vunpack.c.l.bf16 %v3615_v4  ;;  %v3643_v39 = vunpack.c.h.bf16 %v3615_v4  ;;  %v3640_v30 = vunpack.c.l.bf16 %v3614_v2  ;;  %v8076_v26 = vld [vmem:[#allocation11_spill] sm:$0xff] }
 0x6b4   : > { %v3522_v56 = vadd.f32 %v7472_v15, %v3474_v46  ;;  %v3523_v36 = vadd.f32 %v7472_v15, %v3475_v31  ;;  %v3649_v15 = vunpack.c.h.bf16 %v3618_v33  ;;  %v3680_v24 = vadd.f32 %v3648_v7, %v7088_v23 }
 0x6b5   : > { %v3587_v46 = vmax.f32 %v3507_v3, 0.0  ;;  %v3613_v31 = vpack.c.bf16 %v3591_v52, %v3590_v14  ;;  %v3679_v33 = vadd.f32 %v3647_v37, %v7107_v58  ;;  %v3584_v23 = vmax.f32 %v7530_v35, 0.0 }
 0x6b6   : > { %v3602_v60 = vmax.f32 %v3522_v56, 0.0  ;;  %v3603_v53 = vmax.f32 %v3523_v36, 0.0  ;;  %v3681_v50 = vadd.f32 %v3649_v15, %v7094_v1  ;;  %v3582_v56 = vmax.f32 %v7521_v28, 0.0 }
 0x6b7   : > { %v3612_v36 = vpack.c.bf16 %v3589_v47, %v3588_v29  ;;  %v3676_v1 = vadd.f32 %v3644_v40, %v7113_v63  ;;  %v3641_v19 = vunpack.c.h.bf16 %v3614_v2  ;;  %v3583_v41 = vmax.f32 %v7526_v61, 0.0 }
 0x6b8   : > { %v3619_v18 = vpack.c.bf16 %v3603_v53, %v3602_v60  ;;  %v3611_v44 = vpack.c.bf16 %v3587_v46, %v3586_v5  ;;  %v3638_v3 = vunpack.c.l.bf16 %v3613_v31  ;;  %v3639_v58 = vunpack.c.h.bf16 %v3613_v31  ;;  %v8074_v60 = vld [vmem:[#allocation9_spill] sm:$0xff]  ;;  %v8075_v53 = vld [vmem:[#allocation10_spill] sm:$0xff]  ;;  %v8077_v5 = vld [vmem:[#allocation12_spill] sm:$0xff] }
 0x6b9   : > { %v3713_v27 = vpack.c.bf16 %v3678_v45, %v3676_v1  ;;  %v3674_v35 = vadd.f32 %v3642_v20, %v8074_v60  ;;  %v3580_v21 = vmax.f32 %v7515_v0, 0.0  ;;  %v3581_v63 = vmax.f32 %v7519_v34, 0.0  ;;  %v8083_v45 = vld [vmem:[#allocation18_spill] sm:$0xff]  ;;  %v8085_v1 = vld [vmem:[#allocation20_spill] sm:$0xff] }
 0x6ba   : > { %v3650_v51 = vunpack.c.l.bf16 %v3619_v18  ;;  %v3651_v57 = vunpack.c.h.bf16 %v3619_v18  ;;  %v3672_v61 = vadd.f32 %v3640_v30, %v8076_v26  ;;  %v3673_v7 = vadd.f32 %v3641_v19, %v8077_v5  ;;  %v8090_v5 = vld [vmem:[#allocation25_spill] sm:$0xff] }
 0x6bb   : > { %v3636_v15 = vunpack.c.l.bf16 %v3612_v36  ;;  %v3637_v18 = vunpack.c.h.bf16 %v3612_v36  ;;  %v3579_v29 = vmax.f32 %v7512_v6, 0.0  ;;  %v3609_v14 = vpack.c.bf16 %v3583_v41, %v3582_v56 }
 0x6bc   : > { %v3682_v54 = vadd.f32 %v3650_v51, %v7091_v12  ;;  %v3683_v9 = vadd.f32 %v3651_v57, %v7097_v38  ;;  %v3585_v12 = vmax.f32 %v7532_v13, 0.0  ;;  %v8073_v38 = vld [vmem:[#allocation8_spill] sm:$0xff]  ;;  %v3675_v13 = vadd.f32 %v3643_v39, %v8075_v53  ;;  %v8078_v57 = vld [vmem:[#allocation13_spill] sm:$0xff] }
 0x6bd   : > { %v3677_v42 = vadd.f32 %v3645_v10, %v8073_v38  ;;  %v3634_v52 = vunpack.c.l.bf16 %v3611_v44  ;;  %v3635_v4 = vunpack.c.h.bf16 %v3611_v44  ;;  %v3711_v51 = vpack.c.bf16 %v3674_v35, %v3672_v61  ;;  %v8080_v10 = vld [vmem:[#allocation15_spill] sm:$0xff]  ;;  %v8089_v53 = vld [vmem:[#allocation24_spill] sm:$0xff] }
 0x6be   : > { %v3715_v59 = vpack.c.bf16 %v3682_v54, %v3680_v24  ;;  %v3716_v22 = vpack.c.bf16 %v3683_v9, %v3681_v50  ;;  %v3610_v25 = vpack.c.bf16 %v3585_v12, %v3584_v23  ;;  %v3712_v32 = vpack.c.bf16 %v3675_v13, %v3673_v7  ;;  %v8081_v24 = vld [vmem:[#allocation16_spill] sm:$0xff]  ;;  %v8084_v12 = vld [vmem:[#allocation19_spill] sm:$0xff] }
 0x6bf   : > { %v3714_v28 = vpack.c.bf16 %v3679_v33, %v3677_v42  ;;  %v3670_v0 = vadd.f32 %v3638_v3, %v8078_v57  ;;  %v3671_v34 = vadd.f32 %v3639_v58, %v8079_v16  ;;  %v3574_v37 = vmax.f32 %v7497_v62, 0.0  ;;  %v8086_v58 = vld [vmem:[#allocation21_spill] sm:$0xff] }
 0x6c0   : > { %3782 = vmatpush.bf16.msrb.mxu0 %v3715_v59  ;;  %3831 = vmatpush.bf16.msrb.mxu1 %v3716_v22  ;;  %v3576_v47 = vmax.f32 %v7506_v11, 0.0  ;;  %v3577_v2 = vmax.f32 %v7508_v17, 0.0  ;;  %v3608_v40 = vpack.c.bf16 %v3581_v63, %v3580_v21  ;;  %v3668_v6 = vadd.f32 %v3636_v15, %v8080_v10  ;;  %v8082_v22 = vld [vmem:[#allocation17_spill] sm:$0xff]  ;;  %v8091_v15 = vld [vmem:[#allocation26_spill] sm:$0xff]  ;;  %v8097_v10 = vld [vmem:[#allocation32_spill] sm:$0xff] }
 0x6c1   : > { %v3669_v54 = vadd.f32 %v3637_v18, %v8081_v24  ;;  %v3632_v50 = vunpack.c.l.bf16 %v3610_v25  ;;  %v3633_v9 = vunpack.c.h.bf16 %v3610_v25  ;;  %v3575_v46 = vmax.f32 %v7504_v8, 0.0  ;;  %v8094_v16 = vld [vmem:[#allocation29_spill] sm:$0xff] }
 0x6c2   : > { %v3607_v31 = vpack.c.bf16 %v3579_v29, %v3578_v55  ;;  %v3630_v20 = vunpack.c.l.bf16 %v3609_v14  ;;  %v3631_v39 = vunpack.c.h.bf16 %v3609_v14  ;;  %v3709_v59 = vpack.c.bf16 %v3670_v0, %v3668_v6  ;;  %v8092_v29 = vld [vmem:[#allocation27_spill] sm:$0xff] }
 0x6c3   : > { %v3710_v62 = vpack.c.bf16 %v3671_v34, %v3669_v54  ;;  %v3666_v11 = vadd.f32 %v3634_v52, %v8082_v22  ;;  %v3667_v17 = vadd.f32 %v3635_v4, %v8083_v45  ;;  %v3572_v33 = vmax.f32 %v7492_v43, 0.0  ;;  %v8093_v52 = vld [vmem:[#allocation28_spill] sm:$0xff] }
 0x6c4   : > { %3783 = vmatpush.bf16.msrb.mxu0 %v3713_v27  ;;  %3832 = vmatpush.bf16.msrb.mxu1 %v3714_v28  ;;  %v3573_v56 = vmax.f32 %v7494_v49, 0.0  ;;  %v3606_v23 = vpack.c.bf16 %v3577_v2, %v3576_v47  ;;  %v3664_v36 = vadd.f32 %v3632_v50, %v8084_v12  ;;  %v3665_v8 = vadd.f32 %v3633_v9, %v8085_v1  ;;  %v8087_v28 = vld [vmem:[#allocation22_spill] sm:$0xff]  ;;  %v8088_v49 = vld [vmem:[#allocation23_spill] sm:$0xff]  ;;  %v5772_v50 = vld [vmem:[#allocation2 + $0x140] sm:$0xff] }
 0x6c5   : > { %v3628_v38 = vunpack.c.l.bf16 %v3608_v40  ;;  %v3629_v42 = vunpack.c.h.bf16 %v3608_v40  ;;  %v3605_v30 = vpack.c.bf16 %v3575_v46, %v3574_v37  ;;  %v3626_v19 = vunpack.c.l.bf16 %v3607_v31  ;;  %v8095_v37 = vld [vmem:[#allocation30_spill] sm:$0xff]  ;;  %v8096_v2 = vld [vmem:[#allocation31_spill] sm:$0xff]  ;;  %v5773_v9 = vld [vmem:[#allocation2 + $0x148] sm:$0xff] }
 0x6c6   : > { %v3627_v41 = vunpack.c.h.bf16 %v3607_v31  ;;  %v3707_v44 = vpack.c.bf16 %v3666_v11, %v3664_v36  ;;  %v3708_v3 = vpack.c.bf16 %v3667_v17, %v3665_v8  ;;  %v3662_v27 = vadd.f32 %v3630_v20, %v8086_v58  ;;  %v5774_v46 = vld [vmem:[#allocation2 + $0x150] sm:$0xff]  ;;  %v5775_v31 = vld [vmem:[#allocation2 + $0x158] sm:$0xff]  ;;  %v5776_v20 = vld [vmem:[#allocation2 + $0x160] sm:$0xff] }
 0x6c7   : > { %v3663_v43 = vadd.f32 %v3631_v39, %v8087_v28  ;;  %v3604_v60 = vpack.c.bf16 %v3573_v56, %v3572_v33  ;;  %v3660_v35 = vadd.f32 %v3628_v38, %v8088_v49  ;;  %v3661_v13 = vadd.f32 %v3629_v42, %v8089_v53  ;;  %v5777_v39 = vld [vmem:[#allocation2 + $0x168] sm:$0xff]  ;;  %v4007_v53 = vpop.permute.xlu2 %4006 }
 0x6c8   : > { %3784 = vmatpush.bf16.msrb.mxu0 %v3711_v51  ;;  %3833 = vmatpush.bf16.msrb.mxu1 %v3712_v32  ;;  %v3624_v55 = vunpack.c.l.bf16 %v3606_v23  ;;  %v3625_v21 = vunpack.c.h.bf16 %v3606_v23  ;;  %v3622_v63 = vunpack.c.l.bf16 %v3605_v30  ;;  %v3623_v25 = vunpack.c.h.bf16 %v3605_v30 }
 0x6c9   : > { %v3705_v26 = vpack.c.bf16 %v3662_v27, %v3660_v35  ;;  %v3706_v61 = vpack.c.bf16 %v3663_v43, %v3661_v13  ;;  %v3658_v7 = vadd.f32 %v3626_v19, %v8090_v5  ;;  %v3659_v18 = vadd.f32 %v3627_v41, %v8091_v15 }
 0x6ca   : > { %v3656_v14 = vadd.f32 %v3624_v55, %v8092_v29  ;;  %v3657_v4 = vadd.f32 %v3625_v21, %v8093_v52  ;;  %v3620_v51 = vunpack.c.l.bf16 %v3604_v60  ;;  %v3621_v32 = vunpack.c.h.bf16 %v3604_v60  ;;  %v4034_v21 = vpop.permute.xlu1 %4033 }
 0x6cb   : > { %v3654_v34 = vadd.f32 %v3622_v63, %v8094_v16  ;;  %v3655_v47 = vadd.f32 %v3623_v25, %v8095_v37  ;;  %v4025_v25 = vpop.permute.xlu0 %4024 }
 0x6cc   : > { %3785 = vmatpush.bf16.msrb.mxu0 %v3709_v59  ;;  %3834 = vmatpush.bf16.msrb.mxu1 %v3710_v62  ;;  %v3703_v57 = vpack.c.bf16 %v3658_v7, %v3656_v14  ;;  %v3704_v0 = vpack.c.bf16 %v3659_v18, %v3657_v4  ;;  %v3652_v40 = vadd.f32 %v3620_v51, %v8096_v2  ;;  %v5778_v59 = vld [vmem:[#allocation2 + $0x170] sm:$0xff]  ;;  %v5779_v62 = vld [vmem:[#allocation2 + $0x178] sm:$0xff] }
 0x6cd   : > { %v3653_v6 = vadd.f32 %v3621_v32, %v8097_v10  ;;  %v4030_v2 = vperm.slane %v4025_v25, %v6506_v48 }
 0x6ce   : > { %v3701_v24 = vpack.c.bf16 %v3654_v34, %v3652_v40 }
 0x6cf   : > { %v3702_v54 = vpack.c.bf16 %v3655_v47, %v3653_v6  ;;  %v3998_v63 = vpop.permute.xlu2 %3997  ;;  %v4039_v47 = vperm.slane %v4034_v21, %v6506_v48 }
 0x6d0   : > { %3786 = vmatpush.bf16.msrb.mxu0 %v3707_v44  ;;  %3835 = vmatpush.bf16.msrb.mxu1 %v3708_v3 }
 0x6d2   : > { %v3989_v5 = vpop.permute.xlu1 %3988 }
 0x6d3   : > { %v4016_v15 = vpop.permute.xlu0 %4015 }
 0x6d4   : > { %3787 = vmatpush.bf16.msrb.mxu0 %v3705_v26  ;;  %3836 = vmatpush.bf16.msrb.mxu1 %v3706_v61 }
 0x6d7   : > { %v3953_v7 = vpop.permute.xlu2 %3952 }
 0x6d8   : > { %3788 = vmatpush.bf16.msrb.mxu0 %v3703_v57  ;;  %3837 = vmatpush.bf16.msrb.mxu1 %v3704_v0  ;;  %v4012_v57 = vperm.slane %v4007_v53, %v6506_v48  ;;  %v4003_v0 = vperm.slane %v3998_v63, %v6506_v48  ;;  %v3958_v37 = vperm.slane %v3953_v7, %v6506_v48 }
 0x6da   : > { %v3980_v14 = vpop.permute.xlu1 %3979  ;;  %v4084_v6 = vunpack.c.l.bf16 %v4012_v57 }
 0x6db   : > { %v3971_v51 = vpop.permute.xlu0 %3970 }
 0x6dc   : > { %3789 = vmatpush.bf16.msrb.mxu0 %v3701_v24  ;;  %3838 = vmatpush.bf16.msrb.mxu1 %v3702_v54  ;;  %v3994_v24 = vperm.slane %v3989_v5, %v6506_v48 }
 0x6df   : > { %3790 = vmatmul.bf16.vlgmr.msrb.gmra.mxu0 %v5772_v50  ;;  %3839 = vmatmul.bf16.vlgmr.msrb.gmra.mxu1 %v5772_v50  ;;  %v3944_v32 = vpop.permute.xlu2 %3943 }
 0x6e0   : > { %v3949_v40 = vperm.slane %v3944_v32, %v6506_v48 }
 0x6e2   : > { %v3935_v10 = vpop.permute.xlu1 %3934 }
 0x6e3   : > { %v3962_v54 = vpop.permute.xlu0 %3961 }
 0x6ef   : > { %3795 = vmatmul.bf16.gmra.mxu0 %v5773_v9  ;;  %3844 = vmatmul.bf16.gmra.mxu1 %v5773_v9  ;;  %v4083_v9 = vunpack.c.l.bf16 %v4003_v0 }
 0x6ff   : > { %3800 = vmatmul.bf16.gmra.mxu0 %v5774_v46  ;;  %3849 = vmatmul.bf16.gmra.mxu1 %v5774_v46  ;;  %v4021_v46 = vperm.slane %v4016_v15, %v6506_v48 }
 0x701   : > { %v4085_v53 = vunpack.c.l.bf16 %v4021_v46  ;;  %v3926_v46 = vpop.permute.xlu1 %3925 }
 0x70f   : > { %3805 = vmatmul.bf16.gmra.mxu0 %v5775_v31  ;;  %3854 = vmatmul.bf16.gmra.mxu1 %v5775_v31  ;;  %v7644_v31 = vpop.permute.xlu2 %3898 }
 0x71f   : > { %3810 = vmatmul.bf16.gmra.mxu0 %v5776_v20  ;;  %3859 = vmatmul.bf16.gmra.mxu1 %v5776_v20  ;;  %v3985_v20 = vperm.slane %v3980_v14, %v6506_v48 }
 0x721   : > { %v4081_v21 = vunpack.c.l.bf16 %v3985_v20 }
 0x72f   : > { %3815 = vmatmul.bf16.gmra.mxu0 %v5777_v39  ;;  %3864 = vmatmul.bf16.gmra.mxu1 %v5777_v39  ;;  %v3976_v39 = vperm.slane %v3971_v51, %v6506_v48 }
 0x731   : > { %v7656_v63 = vunpack.c.l.bf16 %v3976_v39 }
 0x73f   : > { %3820 = vmatmul.bf16.gmra.mxu0 %v5778_v59  ;;  %3869 = vmatmul.bf16.gmra.mxu1 %v5778_v59  ;;  %v7648_v59 = vunpack.c.l.bf16 %v3958_v37 }
 0x74f   : > { %3825 = vmatmul.bf16.gmra.mxu0 %v5779_v62  ;;  %3874 = vmatmul.bf16.gmra.mxu1 %v5779_v62  ;;  %v4087_v62 = vunpack.c.l.bf16 %v4039_v47 }
 0x75c   : > { %v3791_v22 = vpop.f32.mrf.mxu0  ;;  %v3840_v11 = vpop.f32.mrf.mxu1 }
 0x75d   : > { %v7606_v45 = vpack.c.bf16 %v3840_v11, %v3791_v22  ;;  %v3940_v22 = vperm.slane %v3935_v10, %v6506_v48 }
 0x75f   : > { %v7658_v15 = vunpack.c.l.bf16 %v3940_v22 }
 0x764   : > { %v7608_v17 = vpop.f32.mrf.mxu0  ;;  %v7610_v33 = vpop.f32.mrf.mxu1 }
 0x76c   : > { %v3796_v56 = vpop.f32.mrf.mxu0  ;;  %v3845_v23 = vpop.f32.mrf.mxu1 }
 0x76d   : > { %v7612_v12 = vpack.c.bf16 %v3845_v23, %v3796_v56  ;;  %v4086_v56 = vunpack.c.l.bf16 %v4030_v2  ;;  %v7651_v23 = vunpack.c.l.bf16 %v3949_v40 }
 0x774   : > { %v7614_v36 = vpop.f32.mrf.mxu0  ;;  %v7616_v1 = vpop.f32.mrf.mxu1 }
 0x77c   : > { %v3801_v8 = vpop.f32.mrf.mxu0  ;;  %v3850_v38 = vpop.f32.mrf.mxu1 }
 0x77d   : > { %v7618_v42 = vpack.c.bf16 %v3850_v38, %v3801_v8  ;;  %v3967_v8 = vperm.slane %v3962_v54, %v6506_v48 }
 0x77f   : > { %v7660_v51 = vunpack.c.l.bf16 %v3967_v8 }
 0x784   : > { %v7620_v30 = vpop.f32.mrf.mxu0  ;;  %v7622_v19 = vpop.f32.mrf.mxu1 }
 0x78c   : > { %v3806_v41 = vpop.f32.mrf.mxu0  ;;  %v3855_v44 = vpop.f32.mrf.mxu1 }
 0x78d   : > { %v7624_v3 = vpack.c.bf16 %v3855_v44, %v3806_v41  ;;  %v4082_v41 = vunpack.c.l.bf16 %v3994_v24  ;;  %v3904_v44 = vperm.slane %v7644_v31, %v6506_v48 }
 0x794   : > { %v7626_v58 = vpop.f32.mrf.mxu0  ;;  %v7628_v27 = vpop.f32.mrf.mxu1 }
 0x795   : > { %v3887_v37 = vpack.c.bf16 %v7628_v27, %v7626_v58 }
 0x79c   : > { %v3811_v28 = vpop.f32.mrf.mxu0  ;;  %v3860_v43 = vpop.f32.mrf.mxu1 }
 0x79d   : > { %v7630_v60 = vpack.c.bf16 %v3860_v43, %v3811_v28 }
 0x7a4   : > { %v7632_v49 = vpop.f32.mrf.mxu0  ;;  %v7634_v35 = vpop.f32.mrf.mxu1 }
 0x7ac   : > { %v3816_v13 = vpop.f32.mrf.mxu0  ;;  %v3865_v55 = vpop.f32.mrf.mxu1 }
 0x7b4   : > { %v3818_v26 = vpop.f32.mrf.mxu0  ;;  %v3867_v61 = vpop.f32.mrf.mxu1 }
 0x7b5   : > { %v3891_v25 = vpack.c.bf16 %v3867_v61, %v3818_v26  ;;  %v3889_v26 = vpack.c.bf16 %v7634_v35, %v7632_v49  ;;  %v3917_v49 = vpop.permute.xlu0 %3916 }
 0x7b7   : > { %v4062_v61 = vunpack.c.l.bf16 %v3891_v25  ;;  %v4063_v47 = vunpack.c.h.bf16 %v3891_v25  ;;  %v4059_v58 = vunpack.c.h.bf16 %v3889_v26  ;;  %v4057_v25 = vunpack.c.h.bf16 %v7630_v60 }
 0x7b9   : > { %v4110_v27 = vadd.f32 %v4083_v9, %v4062_v61  ;;  %v4111_v8 = vadd.f32 %v4083_v9, %v4063_v47  ;;  %v4054_v9 = vunpack.c.l.bf16 %v3887_v37 }
 0x7bc   : > { %v3821_v18 = vpop.f32.mrf.mxu0  ;;  %v3870_v29 = vpop.f32.mrf.mxu1 }
 0x7bd   : > { %v3892_v38 = vpack.c.bf16 %v3870_v29, %v3821_v18  ;;  %v3890_v18 = vpack.c.bf16 %v3865_v55, %v3816_v13 }
 0x7bf   : > { %v4064_v29 = vunpack.c.l.bf16 %v3892_v38  ;;  %v4065_v32 = vunpack.c.h.bf16 %v3892_v38  ;;  %v4060_v54 = vunpack.c.l.bf16 %v3890_v18  ;;  %v4061_v13 = vunpack.c.h.bf16 %v3890_v18 }
 0x7c1   : > { %v4112_v55 = vadd.f32 %v4084_v6, %v4064_v29  ;;  %v4107_v29 = vadd.f32 %v4081_v21, %v4059_v58 }
 0x7c4   : > { %v3823_v52 = vpop.f32.mrf.mxu0  ;;  %v3872_v4 = vpop.f32.mrf.mxu1 }
 0x7c5   : > { %v3893_v11 = vpack.c.bf16 %v3872_v4, %v3823_v52 }
 0x7c7   : > { %v4066_v14 = vunpack.c.l.bf16 %v3893_v11  ;;  %v4067_v52 = vunpack.c.h.bf16 %v3893_v11 }
 0x7c9   : > { %v4114_v2 = vadd.f32 %v4085_v53, %v4066_v14  ;;  %v4115_v40 = vadd.f32 %v4085_v53, %v4067_v52  ;;  %v3885_v53 = vpack.c.bf16 %v7622_v19, %v7620_v30  ;;  %v4192_v14 = vmax.f32 %v4112_v55, 0.0  ;;  %v3908_v55 = vpop.permute.xlu0 %3907 }
 0x7ca   : > { %v3922_v30 = vperm.slane %v3917_v49, %v6506_v48  ;;  %v3883_v19 = vpack.c.bf16 %v7616_v1, %v7614_v36  ;;  %v4187_v36 = vmax.f32 %v4107_v29, 0.0  ;;  %v4044_v49 = vunpack.c.l.bf16 %v7612_v12 }
 0x7cb   : > { %v4194_v35 = vmax.f32 %v4114_v2, 0.0  ;;  %v4195_v38 = vmax.f32 %v4115_v40, 0.0  ;;  %v4051_v47 = vunpack.c.h.bf16 %v3885_v53  ;;  %v4102_v2 = vadd.f32 %v7660_v51, %v4054_v9 }
 0x7cc   : > { %v3826_v16 = vpop.f32.mrf.mxu0  ;;  %v3875_v34 = vpop.f32.mrf.mxu1  ;;  %v4040_v9 = vunpack.c.l.bf16 %v7606_v45 }
 0x7cd   : > { %v3894_v50 = vpack.c.bf16 %v3875_v34, %v3826_v16  ;;  %v4182_v58 = vmax.f32 %v4102_v2, 0.0 }
 0x7cf   : > { %v4068_v28 = vunpack.c.l.bf16 %v3894_v50  ;;  %v4069_v43 = vunpack.c.h.bf16 %v3894_v50  ;;  %v4113_v50 = vadd.f32 %v4084_v6, %v4065_v32  ;;  %v4056_v6 = vunpack.c.l.bf16 %v7630_v60 }
 0x7d0   : > { %v4190_v32 = vmax.f32 %v4110_v27, 0.0  ;;  %v4052_v60 = vunpack.c.l.bf16 %v7624_v3 }
 0x7d1   : > { %v4116_v57 = vadd.f32 %v4086_v56, %v4068_v28  ;;  %v4117_v0 = vadd.f32 %v4086_v56, %v4069_v43  ;;  %v4058_v56 = vunpack.c.l.bf16 %v3889_v26  ;;  %v4193_v52 = vmax.f32 %v4113_v50, 0.0 }
 0x7d2   : > { %v4105_v26 = vadd.f32 %v7656_v63, %v4057_v25  ;;  %v4100_v50 = vadd.f32 %v7648_v59, %v4052_v60 }
 0x7d3   : > { %v4196_v20 = vmax.f32 %v4116_v57, 0.0  ;;  %v4197_v39 = vmax.f32 %v4117_v0, 0.0  ;;  %v4106_v18 = vadd.f32 %v4081_v21, %v4058_v56  ;;  %v4191_v57 = vmax.f32 %v4111_v8, 0.0 }
 0x7d4   : > { %v3828_v5 = vpop.f32.mrf.mxu0  ;;  %v3877_v7 = vpop.f32.mrf.mxu1  ;;  %v4212_v0 = vpack.c.bf16 %v4194_v35, %v4192_v14  ;;  %v4050_v21 = vunpack.c.l.bf16 %v3885_v53  ;;  %v4099_v56 = vadd.f32 %v7651_v23, %v4051_v47  ;;  %v3913_v8 = vperm.slane %v3908_v55, %v6506_v48 }
 0x7d5   : > { %v3895_v4 = vpack.c.bf16 %v3877_v7, %v3828_v5  ;;  %v4108_v5 = vadd.f32 %v4082_v41, %v4060_v54  ;;  %v4109_v7 = vadd.f32 %v4082_v41, %v4061_v13  ;;  %v4053_v41 = vunpack.c.h.bf16 %v7624_v3  ;;  %v7700_v55 = vpop.permute.xlu0 %4522 }
 0x7d6   : > { %v3881_v3 = vpack.c.bf16 %v7610_v33, %v7608_v17  ;;  %v4049_v13 = vunpack.c.h.bf16 %v7618_v42  ;;  %v4179_v14 = vmax.f32 %v4099_v56, 0.0 }
 0x7d7   : > { %v4070_v16 = vunpack.c.l.bf16 %v3895_v4  ;;  %v4071_v34 = vunpack.c.h.bf16 %v3895_v4  ;;  %v4055_v4 = vunpack.c.h.bf16 %v3887_v37  ;;  %v4188_v37 = vmax.f32 %v4108_v5, 0.0 }
 0x7d8   : > { %v4189_v61 = vmax.f32 %v4109_v7, 0.0 }
 0x7d9   : > { %v4118_v10 = vadd.f32 %v4087_v62, %v4070_v16  ;;  %v4119_v24 = vadd.f32 %v4087_v62, %v4071_v34  ;;  %v3931_v62 = vperm.slane %v3926_v46, %v6506_v48  ;;  %v4213_v16 = vpack.c.bf16 %v4195_v38, %v4193_v52 }
 0x7da   : > { %v4104_v34 = vadd.f32 %v7656_v63, %v4056_v6  ;;  %v4103_v40 = vadd.f32 %v7660_v51, %v4055_v4  ;;  %v4210_v1 = vpack.c.bf16 %v4190_v32, %v4188_v37  ;;  %v4048_v63 = vunpack.c.l.bf16 %v7618_v42 }
 0x7db   : > { %v4198_v22 = vmax.f32 %v4118_v10, 0.0  ;;  %v4199_v11 = vmax.f32 %v4119_v24, 0.0  ;;  %v4186_v10 = vmax.f32 %v4106_v18, 0.0  ;;  %v4211_v24 = vpack.c.bf16 %v4191_v57, %v4189_v61 }
 0x7dc   : > { %v4075_v54 = vunpack.c.l.bf16 %v3931_v62  ;;  %v4101_v46 = vadd.f32 %v7648_v59, %v4053_v41  ;;  %v4046_v51 = vunpack.c.l.bf16 %v3883_v19  ;;  %v4183_v27 = vmax.f32 %v4103_v40, 0.0 }
 0x7dd   : > { %v4214_v28 = vpack.c.bf16 %v4198_v22, %v4196_v20  ;;  %v4215_v43 = vpack.c.bf16 %v4199_v11, %v4197_v39  ;;  %v4184_v20 = vmax.f32 %v4104_v34, 0.0  ;;  %v4185_v39 = vmax.f32 %v4105_v26, 0.0 }
 0x7de   : > { %v4047_v22 = vunpack.c.h.bf16 %v3883_v19  ;;  %v4098_v11 = vadd.f32 %v7651_v23, %v4050_v21  ;;  %v4074_v42 = vunpack.c.l.bf16 %v3922_v30  ;;  %v4045_v59 = vunpack.c.h.bf16 %v7612_v12 }
 0x7df   : > { %4298 = vmatpush.bf16.msra.mxu2 %v4214_v28  ;;  %4347 = vmatpush.bf16.msra.mxu3 %v4215_v43  ;;  %v4208_v17 = vpack.c.bf16 %v4186_v10, %v4184_v20  ;;  %v4209_v33 = vpack.c.bf16 %v4187_v36, %v4185_v39  ;;  %v4096_v35 = vadd.f32 %v7658_v15, %v4048_v63  ;;  %v4180_v28 = vmax.f32 %v4100_v50, 0.0  ;;  %v5780_v10 = vld [vmem:[#allocation2 + $0x180] sm:$0xff]  ;;  %v5781_v36 = vld [vmem:[#allocation2 + $0x188] sm:$0xff]  ;;  %v7698_v63 = vpop.permute.xlu1 %4540  ;;  %v5787_v39 = vld [vmem:[#allocation2 + $0x1b8] sm:$0xff] }
 0x7e0   : > { %v4097_v38 = vadd.f32 %v7658_v15, %v4049_v13  ;;  %v4181_v43 = vmax.f32 %v4101_v46, 0.0  ;;  %v4042_v23 = vunpack.c.l.bf16 %v3881_v3  ;;  %v4043_v62 = vunpack.c.h.bf16 %v3881_v3  ;;  %v5785_v3 = vld [vmem:[#allocation2 + $0x1a8] sm:$0xff]  ;;  %v5786_v13 = vld [vmem:[#allocation2 + $0x1b0] sm:$0xff]  ;;  %v7704_v46 = vpop.permute.xlu0 %4513 }
 0x7e1   : > { %v4094_v53 = vadd.f32 %v4075_v54, %v4046_v51  ;;  %v4095_v6 = vadd.f32 %v4075_v54, %v4047_v22  ;;  %v4206_v25 = vpack.c.bf16 %v4182_v58, %v4180_v28  ;;  %v4178_v7 = vmax.f32 %v4098_v11, 0.0  ;;  %v5784_v54 = vld [vmem:[#allocation2 + $0x1a0] sm:$0xff]  ;;  %v7708_v51 = vpop.permute.xlu2 %4549 }
 0x7e2   : > { %v4207_v5 = vpack.c.bf16 %v4183_v27, %v4181_v43  ;;  %v4073_v52 = vunpack.c.l.bf16 %v3913_v8  ;;  %v4041_v12 = vunpack.c.h.bf16 %v7606_v45  ;;  %v4092_v4 = vadd.f32 %v4074_v42, %v4044_v49 }
 0x7e3   : > { %4299 = vmatpush.bf16.msra.mxu2 %v4212_v0  ;;  %4348 = vmatpush.bf16.msra.mxu3 %v4213_v16  ;;  %v4093_v18 = vadd.f32 %v4074_v42, %v4045_v59  ;;  %v4176_v15 = vmax.f32 %v4096_v35, 0.0  ;;  %v4177_v29 = vmax.f32 %v4097_v38, 0.0  ;;  %v4072_v32 = vunpack.c.l.bf16 %v3904_v44 }
 0x7e4   : > { %v4090_v57 = vadd.f32 %v4073_v52, %v4042_v23  ;;  %v4091_v0 = vadd.f32 %v4073_v52, %v4043_v62  ;;  %v4174_v19 = vmax.f32 %v4094_v53, 0.0  ;;  %v4175_v60 = vmax.f32 %v4095_v6, 0.0 }
 0x7e5   : > { %v4204_v16 = vpack.c.bf16 %v4178_v7, %v4176_v15  ;;  %v4205_v30 = vpack.c.bf16 %v4179_v14, %v4177_v29  ;;  %v4088_v41 = vadd.f32 %v4072_v32, %v4040_v9  ;;  %v4089_v34 = vadd.f32 %v4072_v32, %v4041_v12 }
 0x7e6   : > { %v4172_v26 = vmax.f32 %v4092_v4, 0.0  ;;  %v4173_v45 = vmax.f32 %v4093_v18, 0.0  ;;  %v4170_v21 = vmax.f32 %v4090_v57, 0.0  ;;  %v4171_v47 = vmax.f32 %v4091_v0, 0.0 }
 0x7e7   : > { %4300 = vmatpush.bf16.msra.mxu2 %v4210_v1  ;;  %4349 = vmatpush.bf16.msra.mxu3 %v4211_v24  ;;  %v4168_v2 = vmax.f32 %v4088_v41, 0.0  ;;  %v4169_v40 = vmax.f32 %v4089_v34, 0.0  ;;  %v5782_v1 = vld [vmem:[#allocation2 + $0x190] sm:$0xff]  ;;  %v5783_v24 = vld [vmem:[#allocation2 + $0x198] sm:$0xff]  ;;  %v7702_v50 = vpop.permute.xlu1 %4531 }
 0x7e8   : > { %v4202_v37 = vpack.c.bf16 %v4174_v19, %v4172_v26  ;;  %v4203_v61 = vpack.c.bf16 %v4175_v60, %v4173_v45  ;;  %v7710_v22 = vpop.permute.xlu0 %4468 }
 0x7e9   : > { %v4200_v31 = vpack.c.bf16 %v4170_v21, %v4168_v2  ;;  %v4201_v44 = vpack.c.bf16 %v4171_v47, %v4169_v40  ;;  %v7714_v56 = vpop.permute.xlu2 %4504 }
 0x7eb   : > { %4301 = vmatpush.bf16.msra.mxu2 %v4208_v17  ;;  %4350 = vmatpush.bf16.msra.mxu3 %v4209_v33 }
 0x7ef   : > { %4302 = vmatpush.bf16.msra.mxu2 %v4206_v25  ;;  %4351 = vmatpush.bf16.msra.mxu3 %v4207_v5  ;;  %v7706_v20 = vpop.permute.xlu1 %4486 }
 0x7f0   : > { %v7716_v17 = vpop.permute.xlu0 %4459 }
 0x7f1   : > { %v7718_v58 = vpop.permute.xlu2 %4495 }
 0x7f3   : > { %4303 = vmatpush.bf16.msra.mxu2 %v4204_v16  ;;  %4352 = vmatpush.bf16.msra.mxu3 %v4205_v30 }
 0x7f7   : > { %4304 = vmatpush.bf16.msra.mxu2 %v4202_v37  ;;  %4353 = vmatpush.bf16.msra.mxu3 %v4203_v61  ;;  %v7712_v11 = vpop.permute.xlu1 %4477 }
 0x7f8   : > { %v4415_v49 = vpop.permute.xlu0 %4414 }
 0x7f9   : > { %v4420_v35 = vperm.slane %v4415_v49, %v6506_v48  ;;  %v4451_v53 = vpop.permute.xlu2 %4450 }
 0x7fa   : > { %v4456_v49 = vperm.slane %v4451_v53, %v6506_v48 }
 0x7fb   : > { %4305 = vmatpush.bf16.msra.mxu2 %v4200_v31  ;;  %4354 = vmatpush.bf16.msra.mxu3 %v4201_v44  ;;  %v4588_v6 = vunpack.c.l.bf16 %v4420_v35 }
 0x7fe   : > { %4306 = vmatmul.bf16.vlgmr.msra.gmra.mxu2 %v5780_v10  ;;  %4355 = vmatmul.bf16.vlgmr.msra.gmra.mxu3 %v5780_v10 }
 0x7ff   : > { %v4433_v33 = vpop.permute.xlu1 %4432 }
 0x800   : > { %v4438_v41 = vperm.slane %v4433_v33, %v6506_v48 }
 0x801   : > { %v4442_v60 = vpop.permute.xlu2 %4441 }
 0x802   : > { %v4447_v34 = vperm.slane %v4442_v60, %v6506_v48  ;;  %v4590_v21 = vunpack.c.l.bf16 %v4438_v41 }
 0x804   : > { %v4591_v2 = vunpack.c.l.bf16 %v4447_v34 }
 0x807   : > { %v4424_v59 = vpop.permute.xlu1 %4423 }
 0x808   : > { %v4429_v38 = vperm.slane %v4424_v59, %v6506_v48  ;;  %v4465_v59 = vperm.slane %v7716_v17, %v6506_v48 }
 0x80a   : > { %v4589_v5 = vunpack.c.l.bf16 %v4429_v38 }
 0x80e   : > { %4311 = vmatmul.bf16.gmra.mxu2 %v5781_v36  ;;  %4360 = vmatmul.bf16.gmra.mxu3 %v5781_v36 }
 0x81e   : > { %4316 = vmatmul.bf16.gmra.mxu2 %v5782_v1  ;;  %4365 = vmatmul.bf16.gmra.mxu3 %v5782_v1 }
 0x82e   : > { %4321 = vmatmul.bf16.gmra.mxu2 %v5783_v24  ;;  %4370 = vmatmul.bf16.gmra.mxu3 %v5783_v24 }
 0x83e   : > { %4326 = vmatmul.bf16.gmra.mxu2 %v5784_v54  ;;  %4375 = vmatmul.bf16.gmra.mxu3 %v5784_v54 }
 0x84e   : > { %4331 = vmatmul.bf16.gmra.mxu2 %v5785_v3  ;;  %4380 = vmatmul.bf16.gmra.mxu3 %v5785_v3 }
 0x85e   : > { %4336 = vmatmul.bf16.gmra.mxu2 %v5786_v13  ;;  %4385 = vmatmul.bf16.gmra.mxu3 %v5786_v13 }
 0x86e   : > { %4341 = vmatmul.bf16.gmra.mxu2 %v5787_v39  ;;  %4390 = vmatmul.bf16.gmra.mxu3 %v5787_v39 }
 0x881   : > { %v4307_v27 = vpop.f32.mrf.mxu2  ;;  %v4356_v42 = vpop.f32.mrf.mxu3 }
 0x882   : > { %v4396_v8 = vpack.c.bf16 %v4356_v42, %v4307_v27 }
 0x884   : > { %v4556_v28 = vunpack.c.l.bf16 %v4396_v8  ;;  %v4557_v43 = vunpack.c.h.bf16 %v4396_v8 }
 0x886   : > { %v4604_v7 = vadd.f32 %v4588_v6, %v4556_v28  ;;  %v4605_v14 = vadd.f32 %v4588_v6, %v4557_v43  ;;  %v4593_v6 = vunpack.c.l.bf16 %v4465_v59 }
 0x888   : > { %v4684_v18 = vmax.f32 %v4604_v7, 0.0  ;;  %v4685_v15 = vmax.f32 %v4605_v14, 0.0 }
 0x889   : > { %v4309_v23 = vpop.f32.mrf.mxu2  ;;  %v4358_v62 = vpop.f32.mrf.mxu3 }
 0x88a   : > { %v4397_v25 = vpack.c.bf16 %v4358_v62, %v4309_v23  ;;  %v4592_v23 = vunpack.c.l.bf16 %v4456_v49 }
 0x88c   : > { %v4558_v52 = vunpack.c.l.bf16 %v4397_v25  ;;  %v4559_v9 = vunpack.c.h.bf16 %v4397_v25 }
 0x88e   : > { %v4606_v12 = vadd.f32 %v4589_v5, %v4558_v52  ;;  %v4607_v4 = vadd.f32 %v4589_v5, %v4559_v9 }
 0x890   : > { %v4686_v29 = vmax.f32 %v4606_v12, 0.0  ;;  %v4687_v32 = vmax.f32 %v4607_v4, 0.0 }
 0x891   : > { %v4312_v57 = vpop.f32.mrf.mxu2  ;;  %v4361_v0 = vpop.f32.mrf.mxu3 }
 0x892   : > { %v4398_v16 = vpack.c.bf16 %v4361_v0, %v4312_v57  ;;  %v7722_v30 = vpack.c.bf16 %v4686_v29, %v4684_v18  ;;  %v7724_v19 = vpack.c.bf16 %v4687_v32, %v4685_v15  ;;  %v4474_v0 = vperm.slane %v7710_v22, %v6506_v48 }
 0x894   : > { %v4560_v26 = vunpack.c.l.bf16 %v4398_v16  ;;  %v4561_v45 = vunpack.c.h.bf16 %v4398_v16  ;;  %v4483_v16 = vperm.slane %v7712_v11, %v6506_v48 }
 0x896   : > { %v4608_v40 = vadd.f32 %v4590_v21, %v4560_v26  ;;  %v4609_v31 = vadd.f32 %v4590_v21, %v4561_v45  ;;  %v4594_v45 = vunpack.c.l.bf16 %v4474_v0 }
 0x898   : > { %v4688_v24 = vmax.f32 %v4608_v40, 0.0  ;;  %v4689_v54 = vmax.f32 %v4609_v31, 0.0 }
 0x899   : > { %v4314_v37 = vpop.f32.mrf.mxu2  ;;  %v4363_v61 = vpop.f32.mrf.mxu3 }
 0x89a   : > { %v4399_v47 = vpack.c.bf16 %v4363_v61, %v4314_v37  ;;  %v4595_v61 = vunpack.c.l.bf16 %v4483_v16 }
 0x89c   : > { %v4562_v44 = vunpack.c.l.bf16 %v4399_v47  ;;  %v4563_v10 = vunpack.c.h.bf16 %v4399_v47 }
 0x89e   : > { %v4610_v36 = vadd.f32 %v4591_v2, %v4562_v44  ;;  %v4611_v1 = vadd.f32 %v4591_v2, %v4563_v10 }
 0x8a0   : > { %v4690_v3 = vmax.f32 %v4610_v36, 0.0  ;;  %v4691_v13 = vmax.f32 %v4611_v1, 0.0 }
 0x8a1   : > { %v4317_v39 = vpop.f32.mrf.mxu2  ;;  %v4366_v33 = vpop.f32.mrf.mxu3 }
 0x8a2   : > { %v4400_v27 = vpack.c.bf16 %v4366_v33, %v4317_v39  ;;  %v7728_v42 = vpack.c.bf16 %v4690_v3, %v4688_v24  ;;  %v7730_v8 = vpack.c.bf16 %v4691_v13, %v4689_v54 }
 0x8a4   : > { %v4564_v35 = vunpack.c.l.bf16 %v4400_v27  ;;  %v4565_v38 = vunpack.c.h.bf16 %v4400_v27 }
 0x8a6   : > { %v4612_v25 = vadd.f32 %v4592_v23, %v4564_v35  ;;  %v4613_v5 = vadd.f32 %v4592_v23, %v4565_v38 }
 0x8a8   : > { %v4692_v12 = vmax.f32 %v4612_v25, 0.0  ;;  %v4693_v4 = vmax.f32 %v4613_v5, 0.0  ;;  %v4555_v25 = vperm.slane %v7708_v51, %v6506_v48  ;;  %v4510_v5 = vperm.slane %v7714_v56, %v6506_v48 }
 0x8a9   : > { %v4319_v28 = vpop.f32.mrf.mxu2  ;;  %v4368_v43 = vpop.f32.mrf.mxu3  ;;  %v4501_v51 = vperm.slane %v7718_v58, %v6506_v48 }
 0x8aa   : > { %v4401_v62 = vpack.c.bf16 %v4368_v43, %v4319_v28 }
 0x8ac   : > { %v4566_v7 = vunpack.c.l.bf16 %v4401_v62  ;;  %v4567_v14 = vunpack.c.h.bf16 %v4401_v62 }
 0x8ae   : > { %v4614_v52 = vadd.f32 %v4593_v6, %v4566_v7  ;;  %v4615_v9 = vadd.f32 %v4593_v6, %v4567_v14  ;;  %v4546_v14 = vperm.slane %v7698_v63, %v6506_v48  ;;  %v4519_v63 = vperm.slane %v7704_v46, %v6506_v48 }
 0x8b0   : > { %v4694_v18 = vmax.f32 %v4614_v52, 0.0  ;;  %v4695_v53 = vmax.f32 %v4615_v9, 0.0  ;;  %v4537_v52 = vperm.slane %v7702_v50, %v6506_v48  ;;  %v4528_v9 = vperm.slane %v7700_v55, %v6506_v48 }
 0x8b1   : > { %v4322_v15 = vpop.f32.mrf.mxu2  ;;  %v4371_v29 = vpop.f32.mrf.mxu3  ;;  %v4602_v56 = vunpack.c.l.bf16 %v4546_v14 }
 0x8b2   : > { %v4402_v17 = vpack.c.bf16 %v4371_v29, %v4322_v15  ;;  %v7735_v32 = vpack.c.bf16 %v4694_v18, %v4692_v12  ;;  %v7737_v57 = vpack.c.bf16 %v4695_v53, %v4693_v4  ;;  %v4603_v4 = vunpack.c.l.bf16 %v4555_v25 }
 0x8b3   : > { %v4598_v53 = vunpack.c.l.bf16 %v4510_v5  ;;  %v4597_v25 = vunpack.c.l.bf16 %v4501_v51 }
 0x8b4   : > { %v4568_v60 = vunpack.c.l.bf16 %v4402_v17  ;;  %v4569_v41 = vunpack.c.h.bf16 %v4402_v17  ;;  %v4601_v17 = vunpack.c.l.bf16 %v4537_v52 }
 0x8b6   : > { %v4616_v21 = vadd.f32 %v4594_v45, %v4568_v60  ;;  %v4617_v47 = vadd.f32 %v4594_v45, %v4569_v41  ;;  %v4600_v60 = vunpack.c.l.bf16 %v4528_v9 }
 0x8b8   : > { %v4696_v10 = vmax.f32 %v4616_v21, 0.0  ;;  %v4697_v36 = vmax.f32 %v4617_v47, 0.0 }
 0x8b9   : > { %v4324_v34 = vpop.f32.mrf.mxu2  ;;  %v4373_v26 = vpop.f32.mrf.mxu3 }
 0x8ba   : > { %v4403_v37 = vpack.c.bf16 %v4373_v26, %v4324_v34  ;;  %v4492_v26 = vperm.slane %v7706_v20, %v6506_v48 }
 0x8bc   : > { %v4570_v2 = vunpack.c.l.bf16 %v4403_v37  ;;  %v4571_v40 = vunpack.c.h.bf16 %v4403_v37 }
 0x8be   : > { %v4618_v31 = vadd.f32 %v4595_v61, %v4570_v2  ;;  %v4619_v44 = vadd.f32 %v4595_v61, %v4571_v40  ;;  %v4599_v40 = vunpack.c.l.bf16 %v4519_v63 }
 0x8c0   : > { %v4698_v1 = vmax.f32 %v4618_v31, 0.0  ;;  %v4699_v22 = vmax.f32 %v4619_v44, 0.0 }
 0x8c1   : > { %v4327_v24 = vpop.f32.mrf.mxu2  ;;  %v4376_v54 = vpop.f32.mrf.mxu3 }
 0x8c2   : > { %v7743_v11 = vpack.c.bf16 %v4376_v54, %v4327_v24  ;;  %v7745_v3 = vpack.c.bf16 %v4698_v1, %v4696_v10  ;;  %v7747_v13 = vpack.c.bf16 %v4699_v22, %v4697_v36 }
 0x8c4   : > { %v4572_v5 = vunpack.c.l.bf16 %v7743_v11 }
 0x8c9   : > { %v4329_v39 = vpop.f32.mrf.mxu2  ;;  %v4378_v33 = vpop.f32.mrf.mxu3 }
 0x8ca   : > { %v4405_v31 = vpack.c.bf16 %v4378_v33, %v4329_v39 }
 0x8d1   : > { %v4332_v27 = vpop.f32.mrf.mxu2  ;;  %v4381_v49 = vpop.f32.mrf.mxu3 }
 0x8d2   : > { %v4406_v45 = vpack.c.bf16 %v4381_v49, %v4332_v27 }
 0x8d4   : > { %v4576_v24 = vunpack.c.l.bf16 %v4406_v45  ;;  %v4577_v54 = vunpack.c.h.bf16 %v4406_v45 }
 0x8d6   : > { %v4624_v14 = vadd.f32 %v4598_v53, %v4576_v24  ;;  %v4625_v52 = vadd.f32 %v4598_v53, %v4577_v54 }
 0x8d8   : > { %v4704_v51 = vmax.f32 %v4624_v14, 0.0 }
 0x8d9   : > { %v4334_v59 = vpop.f32.mrf.mxu2  ;;  %v4383_v35 = vpop.f32.mrf.mxu3 }
 0x8da   : > { %v4407_v0 = vpack.c.bf16 %v4383_v35, %v4334_v59 }
 0x8dc   : > { %v4578_v46 = vunpack.c.l.bf16 %v4407_v0  ;;  %v4579_v44 = vunpack.c.h.bf16 %v4407_v0 }
 0x8e1   : > { %v4337_v38 = vpop.f32.mrf.mxu2  ;;  %v4386_v28 = vpop.f32.mrf.mxu3 }
 0x8e2   : > { %v4408_v18 = vpack.c.bf16 %v4386_v28, %v4337_v38  ;;  %v4574_v38 = vunpack.c.l.bf16 %v4405_v31  ;;  %v4575_v28 = vunpack.c.h.bf16 %v4405_v31 }
 0x8e4   : > { %v4580_v37 = vunpack.c.l.bf16 %v4408_v18  ;;  %v4581_v58 = vunpack.c.h.bf16 %v4408_v18  ;;  %v4622_v18 = vadd.f32 %v4597_v25, %v4574_v38 }
 0x8e6   : > { %v4628_v59 = vadd.f32 %v4600_v60, %v4580_v37  ;;  %v4629_v35 = vadd.f32 %v4600_v60, %v4581_v58  ;;  %v5724_v37 = vld [vmem:[%s8016_s5] sm:$0xff]  ;;  %v7799_v58 = vpop.permute.xlu0 %4739 }
 0x8e8   : > { %v4708_v9 = vmax.f32 %v4628_v59, 0.0 }
 0x8e9   : > { %v4339_v43 = vpop.f32.mrf.mxu2  ;;  %v4388_v23 = vpop.f32.mrf.mxu3 }
 0x8ea   : > { %v4409_v12 = vpack.c.bf16 %v4388_v23, %v4339_v43  ;;  %v4626_v43 = vadd.f32 %v4599_v40, %v4578_v46  ;;  %v4627_v23 = vadd.f32 %v4599_v40, %v4579_v44 }
 0x8ec   : > { %v4582_v41 = vunpack.c.l.bf16 %v4409_v12  ;;  %v4583_v55 = vunpack.c.h.bf16 %v4409_v12  ;;  %v4709_v12 = vmax.f32 %v4629_v35, 0.0 }
 0x8ee   : > { %v4630_v10 = vadd.f32 %v4601_v17, %v4582_v41  ;;  %v4631_v36 = vadd.f32 %v4601_v17, %v4583_v55 }
 0x8f0   : > { %v4711_v39 = vmax.f32 %v4631_v36, 0.0  ;;  %v7811_v36 = vpop.permute.xlu0 %4754 }
 0x8f1   : > { %v4342_v62 = vpop.f32.mrf.mxu2  ;;  %v4391_v6 = vpop.f32.mrf.mxu3 }
 0x8f2   : > { %v4410_v7 = vpack.c.bf16 %v4391_v6, %v4342_v62  ;;  %v4710_v62 = vmax.f32 %v4630_v10, 0.0  ;;  %v4729_v63 = vpack.c.bf16 %v4711_v39, %v4709_v12 }
 0x8f4   : > { %v4584_v15 = vunpack.c.l.bf16 %v4410_v7  ;;  %v4585_v29 = vunpack.c.h.bf16 %v4410_v7  ;;  %v4573_v7 = vunpack.c.h.bf16 %v7743_v11  ;;  %v4728_v17 = vpack.c.bf16 %v4710_v62, %v4708_v9 }
 0x8f5   : > { %v4702_v11 = vmax.f32 %v4622_v18, 0.0 }
 0x8f6   : > { %v4632_v61 = vadd.f32 %v4602_v56, %v4584_v15  ;;  %v4633_v21 = vadd.f32 %v4602_v56, %v4585_v29  ;;  %v4623_v15 = vadd.f32 %v4597_v25, %v4575_v28  ;;  %v4706_v29 = vmax.f32 %v4626_v43, 0.0 }
 0x8f7   : > { %v4707_v56 = vmax.f32 %v4627_v23, 0.0 }
 0x8f8   : > { %v4712_v48 = vmax.f32 %v4632_v61, 0.0  ;;  %v4713_v20 = vmax.f32 %v4633_v21, 0.0  ;;  %v4703_v60 = vmax.f32 %v4623_v15, 0.0  ;;  %v4726_v53 = vpack.c.bf16 %v4706_v29, %v4704_v51  ;;  %v7801_v61 = vpop.permute.xlu1 %4744  ;;  %v7821_v43 = vpop.permute.xlu0 %4769 }
 0x8f9   : > { %v4344_v16 = vpop.f32.mrf.mxu2  ;;  %v4393_v50 = vpop.f32.mrf.mxu3 }
 0x8fa   : > { %v4411_v34 = vpack.c.bf16 %v4393_v50, %v4344_v16  ;;  %v4705_v50 = vmax.f32 %v4625_v52, 0.0 }
 0x8fc   : > { %v4586_v47 = vunpack.c.l.bf16 %v4411_v34  ;;  %v4587_v2 = vunpack.c.h.bf16 %v4411_v34  ;;  %v4727_v41 = vpack.c.bf16 %v4707_v56, %v4705_v50 }
 0x8fe   : > { %v4634_v1 = vadd.f32 %v4603_v4, %v4586_v47  ;;  %v4635_v22 = vadd.f32 %v4603_v4, %v4587_v2  ;;  %v4596_v4 = vunpack.c.l.bf16 %v4492_v26  ;;  %v6046_v2 = vmov 0.92419624  }
 0x8ff   : > { %5881 = vrcp.f32 %v6046_v2 }
 0x900   : > { %v4714_v27 = vmax.f32 %v4634_v1, 0.0  ;;  %v4715_v49 = vmax.f32 %v4635_v22, 0.0  ;;  %v4620_v0 = vadd.f32 %v4596_v4, %v4572_v5  ;;  %v4621_v16 = vadd.f32 %v4596_v4, %v4573_v7  ;;  %v7813_v54 = vpop.permute.xlu1 %4759 }
 0x902   : > { %v4730_v33 = vpack.c.bf16 %v4714_v27, %v4712_v48  ;;  %v4731_v6 = vpack.c.bf16 %v4715_v49, %v4713_v20  ;;  %v4700_v55 = vmax.f32 %v4620_v0, 0.0  ;;  %v4701_v34 = vmax.f32 %v4621_v16, 0.0  ;;  %v7835_v0 = vpop.permute.xlu0 %4784 }
 0x904   : > { %4860 = vmatpush.bf16.msra.mxu0 %v4730_v33  ;;  %4909 = vmatpush.bf16.msra.mxu1 %v4731_v6  ;;  %v4724_v26 = vpack.c.bf16 %v4702_v11, %v4700_v55  ;;  %v4725_v45 = vpack.c.bf16 %v4703_v60, %v4701_v34 }
 0x905   : > { %v5882_v24 = vpop.eup %5881 }
 0x906   : > { %v4987_v49 = vmul.f32 0.92419624, %v5882_v24  ;;  %vm4991_vm0 = vweird.f32 %v5882_v24 }
 0x908   : > { %4861 = vmatpush.bf16.msra.mxu0 %v4728_v17  ;;  %4910 = vmatpush.bf16.msra.mxu1 %v4729_v63  ;;  %v4988_v38 = vsub.f32 1.0, %v4987_v49  ;;  %v7827_v6 = vpop.permute.xlu1 %4774 }
 0x90a   : > { %v4989_v5 = vmul.f32 %v5882_v24, %v4988_v38 }
 0x90c   : > { %4862 = vmatpush.bf16.msra.mxu0 %v4726_v53  ;;  %4911 = vmatpush.bf16.msra.mxu1 %v4727_v41  ;;  %v4990_v12 = vadd.f32 %v5882_v24, %v4989_v5 }
 0x90e   : > { %v4992_v50 = vsel %vm4991_vm0, %v5882_v24, %v4990_v12 }
 0x910   : > { %4863 = vmatpush.bf16.msra.mxu0 %v4724_v26  ;;  %4912 = vmatpush.bf16.msra.mxu1 %v4725_v45  ;;  %v7837_v53 = vpop.permute.xlu1 %4789 }
 0x914   : > { %4864 = vmatpush.bf16.msra.mxu0 %v7745_v3  ;;  %4913 = vmatpush.bf16.msra.mxu1 %v7747_v13  ;;  %v5731_v3 = vld [vmem:[%s8016_s5 + $0x38] sm:$0xff]  ;;  %v4735_v13 = vpop.permute.xlu2 %4734 }
 0x918   : > { %4865 = vmatpush.bf16.msra.mxu0 %v7735_v32  ;;  %4914 = vmatpush.bf16.msra.mxu1 %v7737_v57  ;;  %v5725_v32 = vld [vmem:[%s8016_s5 + $0x8] sm:$0xff]  ;;  %v5730_v57 = vld [vmem:[%s8016_s5 + $0x30] sm:$0xff] }
 0x91c   : > { %4866 = vmatpush.bf16.msra.mxu0 %v7728_v42  ;;  %4915 = vmatpush.bf16.msra.mxu1 %v7730_v8  ;;  %v5726_v42 = vld [vmem:[%s8016_s5 + $0x10] sm:$0xff]  ;;  %v5729_v8 = vld [vmem:[%s8016_s5 + $0x28] sm:$0xff]  ;;  %v7803_v21 = vpop.permute.xlu2 %4749 }
 0x920   : > { %4867 = vmatpush.bf16.msra.mxu0 %v7722_v30  ;;  %4916 = vmatpush.bf16.msra.mxu1 %v7724_v19  ;;  %v5727_v30 = vld [vmem:[%s8016_s5 + $0x18] sm:$0xff]  ;;  %v5728_v19 = vld [vmem:[%s8016_s5 + $0x20] sm:$0xff] }
 0x923   : > { %4868 = vmatmul.bf16.vlgmr.msra.gmra.mxu0 %v5724_v37  ;;  %4917 = vmatmul.bf16.vlgmr.msra.gmra.mxu1 %v5724_v37 }
 0x924   : > { %v7819_v27 = vpop.permute.xlu2 %4764 }
 0x92c   : > { %v7829_v52 = vpop.permute.xlu2 %4779 }
 0x933   : > { %4873 = vmatmul.bf16.gmra.mxu0 %v5725_v32  ;;  %4922 = vmatmul.bf16.gmra.mxu1 %v5725_v32 }
 0x934   : > { %v7839_v26 = vpop.permute.xlu2 %4794 }
 0x93c   : > { %v7851_v2 = vpop.permute.xlu2 %4809 }
 0x943   : > { %4878 = vmatmul.bf16.gmra.mxu0 %v5726_v42  ;;  %4927 = vmatmul.bf16.gmra.mxu1 %v5726_v42 }
 0x953   : > { %4883 = vmatmul.bf16.gmra.mxu0 %v5727_v30  ;;  %4932 = vmatmul.bf16.gmra.mxu1 %v5727_v30 }
 0x963   : > { %4888 = vmatmul.bf16.gmra.mxu0 %v5728_v19  ;;  %4937 = vmatmul.bf16.gmra.mxu1 %v5728_v19 }
 0x973   : > { %4893 = vmatmul.bf16.gmra.mxu0 %v5729_v8  ;;  %4942 = vmatmul.bf16.gmra.mxu1 %v5729_v8 }
 0x983   : > { %4898 = vmatmul.bf16.gmra.mxu0 %v5730_v57  ;;  %4947 = vmatmul.bf16.gmra.mxu1 %v5730_v57 }
 0x993   : > { %4903 = vmatmul.bf16.gmra.mxu0 %v5731_v3  ;;  %4952 = vmatmul.bf16.gmra.mxu1 %v5731_v3 }
 0x9a0   : > { %v4869_v47 = vpop.f32.mrf.mxu0  ;;  %v4918_v40 = vpop.f32.mrf.mxu1 }
 0x9a1   : > { %v7805_v31 = vadd.f32 %v4869_v47, %v4735_v13  ;;  %v7807_v46 = vadd.f32 %v4918_v40, %v4735_v13  ;;  %v7847_v13 = vpop.permute.xlu0 %4799  ;;  %v7849_v47 = vpop.permute.xlu1 %4804 }
 0x9a3   : > { %v4958_v44 = vmul.f32 0.92419624, %v7805_v31  ;;  %v4959_v10 = vmul.f32 0.92419624, %v7807_v46 }
 0x9a5   : > { %v4962_v1 = vmin.f32 %v4958_v44, 20.0  ;;  %v4963_v22 = vmin.f32 %v4959_v10, 20.0  ;;  %vm4960_vm3 = vcmp.gt.f32.partialorder %v4958_v44, 20.0  ;;  %vm4961_vm4 = vcmp.gt.f32.partialorder %v4959_v10, 20.0 }
 0x9a7   : > { %v4964_v59 = vmul.f32 1.442695, %v4962_v1  ;;  %v4966_v35 = vmul.f32 1.442695, %v4963_v22 }
 0x9a8   : > { %v7815_v48 = vpop.f32.mrf.mxu0  ;;  %v7817_v20 = vpop.f32.mrf.mxu1 }
 0x9a9   : > { %5883 = vpow2.f32 %v4964_v59 }
 0x9aa   : > { %5885 = vpow2.f32 %v4966_v35  ;;  %v5066_v35 = vpop.permute.xlu0 %5065 }
 0x9af   : > { %v5884_v28 = vpop.eup %5883 }
 0x9b0   : > { %v5886_v23 = vpop.eup %5885  ;;  %v4968_v62 = vadd.f32 1.0, %v5884_v28  ;;  %v7823_v39 = vpop.f32.mrf.mxu0  ;;  %v4971_v25 = vmul.f32 -0.5, %v5884_v28  ;;  %v4974_v4 = vand.u32 2147483647, %v5884_v28 }
 0x9b1   : > { %v7825_v33 = vpop.f32.mrf.mxu1  ;;  %v4977_v7 = vadd.f32 1.0, %v5886_v23  ;;  %v4980_v14 = vmul.f32 -0.5, %v5886_v23  ;;  %v4983_v15 = vand.u32 2147483647, %v5886_v23 }
 0x9b2   : > { %5887 = vlog2.f32 %v4968_v62  ;;  %v4972_v9 = vadd.f32 1.0, %v4971_v25  ;;  %vm4975_vm1 = vcmp.lt.f32.partialorder %v4974_v4, 0.0004427343  ;;  %v5071_v25 = vpop.permute.xlu1 %5070  ;;  %v5076_v4 = vpop.permute.xlu2 %5075 }
 0x9b3   : > { %5889 = vlog2.f32 %v4977_v7  ;;  %v4981_v18 = vadd.f32 1.0, %v4980_v14  ;;  %vm4984_vm2 = vcmp.lt.f32.partialorder %v4983_v15, 0.0004427343 }
 0x9b4   : > { %v4973_v51 = vmul.f32 %v5884_v28, %v4972_v9 }
 0x9b5   : > { %v4982_v60 = vmul.f32 %v5886_v23, %v4981_v18 }
 0x9b8   : > { %v5888_v29 = vpop.eup %5887  ;;  %v7831_v56 = vpop.f32.mrf.mxu0 }
 0x9b9   : > { %v7833_v17 = vpop.f32.mrf.mxu1  ;;  %v5890_v63 = vpop.eup %5889  ;;  %v4970_v16 = vmul.f32 0.6931472, %v5888_v29 }
 0x9ba   : > { %v4979_v11 = vmul.f32 0.6931472, %v5890_v63 }
 0x9bb   : > { %v4976_v41 = vsel %vm4975_vm1, %v4973_v51, %v4970_v16 }
 0x9bc   : > { %v4993_v55 = vmul.f32 %v4992_v50, %v4976_v41  ;;  %v4985_v34 = vsel %vm4984_vm2, %v4982_v60, %v4979_v11  ;;  %v4872_v60 = vadd.f32 %v7815_v48, %v7799_v58  ;;  %v4875_v41 = vadd.f32 %v7823_v39, %v7801_v61 }
 0x9bd   : > { %v4994_v45 = vmul.f32 %v4992_v50, %v4985_v34  ;;  %v4921_v34 = vadd.f32 %v7817_v20, %v7799_v58  ;;  %v4877_v48 = vadd.f32 %v7831_v56, %v7803_v21 }
 0x9be   : > { %v4995_v37 = vsel %vm4960_vm3, %v7805_v31, %v4993_v55 }
 0x9bf   : > { %v4997_v32 = vadd.f32 0.25, %v4995_v37  ;;  %v4996_v42 = vsel %vm4961_vm4, %v7807_v46, %v4994_v45  ;;  %v4924_v45 = vadd.f32 %v7825_v33, %v7801_v61  ;;  %v4926_v61 = vadd.f32 %v7833_v17, %v7803_v21 }
 0x9c0   : > { %v4998_v30 = vadd.f32 0.25, %v4996_v42  ;;  %v7843_v19 = vpop.f32.mrf.mxu0 }
 0x9c1   : > { %v7845_v8 = vpop.f32.mrf.mxu1  ;;  %v4999_v57 = vmin.f32 %v4997_v32, 100.0 }
 0x9c2   : > { %v5000_v3 = vmin.f32 %v4998_v30, 100.0  ;;  %v5081_v30 = vpop.permute.xlu0 %5080 }
 0x9c3   : > { %5891 = vrcp.f32 %v4999_v57  ;;  %v5012_v49 = vand.u32 2147483648, %v4999_v57  ;;  %v5010_v23 = vand.u32 2147483647, %v4999_v57  ;;  %vm5006_vm7 = vweird.f32 %v4999_v57 }
 0x9c4   : > { %5893 = vrcp.f32 %v5000_v3  ;;  %v5026_v62 = vand.u32 2147483648, %v5000_v3  ;;  %v5024_v7 = vand.u32 2147483647, %v5000_v3  ;;  %vm5020_vm9 = vweird.f32 %v5000_v3 }
 0x9c5   : > { %v5013_v18 = vor.u32 1.1754944e-38, %v5012_v49  ;;  %vm5011_vm10 = vcmp.eq.f32.partialorder %v5010_v23, 8.507059e+37 }
 0x9c6   : > { %v5027_v63 = vor.u32 1.1754944e-38, %v5026_v62  ;;  %vm5025_vm12 = vcmp.eq.f32.partialorder %v5024_v7, 8.507059e+37 }
 0x9c8   : > { %v7853_v40 = vpop.f32.mrf.mxu0 }
 0x9c9   : > { %v7855_v44 = vpop.f32.mrf.mxu1  ;;  %v5892_v10 = vpop.eup %5891 }
 0x9ca   : > { %v5894_v1 = vpop.eup %5893  ;;  %v5002_v22 = vmul.f32 %v5892_v10, %v4999_v57  ;;  %vm5007_vm5 = vweird.f32 %v5892_v10 }
 0x9cb   : > { %v5016_v24 = vmul.f32 %v5894_v1, %v5000_v3  ;;  %vm5021_vm6 = vweird.f32 %v5894_v1  ;;  %vm5008_vm8 = vmor %vm5006_vm7, %vm5007_vm5  ;;  %v4880_v3 = vadd.f32 %v7843_v19, %v7811_v36  ;;  %v4882_v19 = vadd.f32 %v7853_v40, %v7813_v54 }
 0x9cc   : > { %v5003_v59 = vsub.f32 1.0, %v5002_v22  ;;  %vm5022_vm11 = vmor %vm5020_vm9, %vm5021_vm6 }
 0x9cd   : > { %v5017_v38 = vsub.f32 1.0, %v5016_v24 }
 0x9ce   : > { %v5004_v28 = vmul.f32 %v5892_v10, %v5003_v59  ;;  %v4929_v59 = vadd.f32 %v7845_v8, %v7811_v36  ;;  %v4931_v8 = vadd.f32 %v7855_v44, %v7813_v54 }
 0x9cf   : > { %v5018_v5 = vmul.f32 %v5894_v1, %v5017_v38 }
 0x9d0   : > { %v5005_v14 = vadd.f32 %v5892_v10, %v5004_v28  ;;  %v4884_v9 = vpop.f32.mrf.mxu0 }
 0x9d1   : > { %v4933_v12 = vpop.f32.mrf.mxu1  ;;  %v5019_v15 = vadd.f32 %v5894_v1, %v5018_v5  ;;  %v4885_v23 = vadd.f32 %v4884_v9, %v7819_v27 }
 0x9d2   : > { %v5009_v29 = vsel %vm5008_vm8, %v5892_v10, %v5005_v14  ;;  %v4934_v5 = vadd.f32 %v4933_v12, %v7819_v27  ;;  %v5096_v27 = vpop.permute.xlu0 %5095 }
 0x9d3   : > { %v5014_v16 = vsel %vm5011_vm10, %v5013_v18, %v5009_v29  ;;  %v5023_v51 = vsel %vm5022_vm11, %v5894_v1, %v5019_v15  ;;  %v5086_v1 = vpop.permute.xlu1 %5085 }
 0x9d4   : > { %v7860_v50 = vperm.slane %v5014_v16, 3  ;;  %v5028_v11 = vsel %vm5025_vm12, %v5027_v63, %v5023_v51 }
 0x9d5   : > { %v7866_v55 = vperm.slane %v5028_v11, 3 }
 0x9d6   : > { %v5031_v37 = vmul.f32 %v7860_v50, %v7805_v31  ;;  %v5033_v32 = vmul.f32 %v7860_v50, %v4872_v60  ;;  %v5035_v42 = vmul.f32 %v7860_v50, %v4875_v41  ;;  %v5037_v33 = vmul.f32 %v7860_v50, %v4877_v48 }
 0x9d7   : > { %v5032_v39 = vmul.f32 %v7866_v55, %v7807_v46  ;;  %v5034_v57 = vmul.f32 %v7866_v55, %v4921_v34  ;;  %v5036_v58 = vmul.f32 %v7866_v55, %v4924_v45  ;;  %v5038_v46 = vmul.f32 %v7866_v55, %v4926_v61 }
 0x9d8   : > { %v5143_v20 = vadd.f32 %v5066_v35, %v5031_v37  ;;  %v5145_v31 = vadd.f32 %v5071_v25, %v5033_v32  ;;  %v4886_v10 = vpop.f32.mrf.mxu0  ;;  %v5147_v21 = vadd.f32 %v5076_v4, %v5035_v42  ;;  %v5039_v17 = vmul.f32 %v7860_v50, %v4880_v3 }
 0x9d9   : > { %v4935_v56 = vpop.f32.mrf.mxu1  ;;  %v5144_v22 = vadd.f32 %v5066_v35, %v5032_v39  ;;  %v5146_v24 = vadd.f32 %v5071_v25, %v5034_v57  ;;  %v5091_v35 = vpop.permute.xlu2 %5090  ;;  %v5148_v49 = vadd.f32 %v5076_v4, %v5036_v58  ;;  %v5040_v36 = vmul.f32 %v7866_v55, %v4929_v59 }
 0x9da   : > { %5175 = vst [vmem:[%s7890_s19] sm:$0xff] %v5143_v20  ;;  %v5149_v38 = vadd.f32 %v5081_v30, %v5037_v33  ;;  %v5041_v28 = vmul.f32 %v7860_v50, %v4882_v19  ;;  %v4887_v62 = vadd.f32 %v4886_v10, %v7821_v43  ;;  %v5150_v40 = vadd.f32 %v5081_v30, %v5038_v46  ;;  %v5111_v20 = vpop.permute.xlu0 %5110 }
 0x9db   : > { %5176 = vst [vmem:[%s7890_s19 + $0x8] sm:$0xff] %v5144_v22  ;;  %v5042_v25 = vmul.f32 %v7866_v55, %v4931_v8  ;;  %v4936_v7 = vadd.f32 %v4935_v56, %v7821_v43  ;;  %v5151_v54 = vadd.f32 %v5086_v1, %v5039_v17  ;;  %v5043_v44 = vmul.f32 %v7860_v50, %v4885_v23  ;;  %v5101_v11 = vpop.permute.xlu1 %5100 }
 0x9dc   : > { %5177 = vst [vmem:[%s7890_s19 + $0x10] sm:$0xff] %v5145_v31  ;;  %v5152_v14 = vadd.f32 %v5086_v1, %v5040_v36  ;;  %v5044_v9 = vmul.f32 %v7866_v55, %v4934_v5  ;;  %v5153_v4 = vadd.f32 %v5091_v35, %v5041_v28  ;;  %v5045_v18 = vmul.f32 %v7860_v50, %v4887_v62 }
 0x9dd   : > { %5178 = vst [vmem:[%s7890_s19 + $0x18] sm:$0xff] %v5146_v24  ;;  %v5154_v43 = vadd.f32 %v5091_v35, %v5042_v25  ;;  %v5046_v12 = vmul.f32 %v7866_v55, %v4936_v7  ;;  %v5155_v51 = vadd.f32 %v5096_v27, %v5043_v44 }
 0x9de   : > { %5179 = vst [vmem:[%s7890_s19 + $0x20] sm:$0xff] %v5147_v21  ;;  %v5156_v60 = vadd.f32 %v5096_v27, %v5044_v9  ;;  %v5157_v45 = vadd.f32 %v5101_v11, %v5045_v18 }
 0x9df   : > { %5180 = vst [vmem:[%s7890_s19 + $0x28] sm:$0xff] %v5148_v49  ;;  %v5158_v32 = vadd.f32 %v5101_v11, %v5046_v12 }
 0x9e0   : > { %5181 = vst [vmem:[%s7890_s19 + $0x30] sm:$0xff] %v5149_v38  ;;  %v4889_v15 = vpop.f32.mrf.mxu0 }
 0x9e1   : > { %v4938_v29 = vpop.f32.mrf.mxu1  ;;  %5182 = vst [vmem:[%s7890_s19 + $0x38] sm:$0xff] %v5150_v40  ;;  %v4890_v63 = vadd.f32 %v4889_v15, %v7827_v6  ;;  %v5106_v37 = vpop.permute.xlu2 %5105 }
 0x9e2   : > { %v4939_v16 = vadd.f32 %v4938_v29, %v7827_v6  ;;  %5183 = vst [vmem:[%s7890_s19 + $0x40] sm:$0xff] %v5151_v54  ;;  %v5126_v5 = vpop.permute.xlu0 %5125 }
 0x9e3   : > { %5184 = vst [vmem:[%s7890_s19 + $0x48] sm:$0xff] %v5152_v14  ;;  %v5047_v41 = vmul.f32 %v7860_v50, %v4890_v63  ;;  %v5116_v24 = vpop.permute.xlu1 %5115 }
 0x9e4   : > { %v5048_v34 = vmul.f32 %v7866_v55, %v4939_v16  ;;  %5185 = vst [vmem:[%s7890_s19 + $0x50] sm:$0xff] %v5153_v4 }
 0x9e5   : > { %5186 = vst [vmem:[%s7890_s19 + $0x58] sm:$0xff] %v5154_v43  ;;  %v5159_v6 = vadd.f32 %v5106_v37, %v5047_v41 }
 0x9e6   : > { %5187 = vst [vmem:[%s7890_s19 + $0x60] sm:$0xff] %v5155_v51  ;;  %v5160_v42 = vadd.f32 %v5106_v37, %v5048_v34 }
 0x9e7   : > { %5188 = vst [vmem:[%s7890_s19 + $0x68] sm:$0xff] %v5156_v60 }
 0x9e8   : > { %5189 = vst [vmem:[%s7890_s19 + $0x70] sm:$0xff] %v5157_v45  ;;  %v4891_v48 = vpop.f32.mrf.mxu0 }
 0x9e9   : > { %v4940_v30 = vpop.f32.mrf.mxu1  ;;  %5190 = vst [vmem:[%s7890_s19 + $0x78] sm:$0xff] %v5158_v32  ;;  %v4892_v39 = vadd.f32 %v4891_v48, %v7829_v52  ;;  %v5121_v36 = vpop.permute.xlu2 %5120 }
 0x9ea   : > { %v4941_v57 = vadd.f32 %v4940_v30, %v7829_v52  ;;  %5191 = vst [vmem:[%s7890_s19 + $0x80] sm:$0xff] %v5159_v6 }
 0x9eb   : > { %5192 = vst [vmem:[%s7890_s19 + $0x88] sm:$0xff] %v5160_v42  ;;  %v5049_v58 = vmul.f32 %v7860_v50, %v4892_v39  ;;  %v5131_v15 = vpop.permute.xlu1 %5130  ;;  %v5141_v42 = vpop.permute.xlu0 %5140 }
 0x9ec   : > { %v5050_v61 = vmul.f32 %v7866_v55, %v4941_v57 }
 0x9ed   : > { %v5161_v31 = vadd.f32 %v5111_v20, %v5049_v58 }
 0x9ee   : > { %v5162_v33 = vadd.f32 %v5111_v20, %v5050_v61 }
 0x9ef   : > { %5193 = vst [vmem:[%s7890_s19 + $0x90] sm:$0xff] %v5161_v31 }
 0x9f0   : > { %5194 = vst [vmem:[%s7890_s19 + $0x98] sm:$0xff] %v5162_v33  ;;  %v4894_v3 = vpop.f32.mrf.mxu0 }
 0x9f1   : > { %v4943_v10 = vpop.f32.mrf.mxu1  ;;  %v4895_v56 = vadd.f32 %v4894_v3, %v7835_v0  ;;  %v5136_v11 = vpop.permute.xlu2 %5135 }
 0x9f2   : > { %v4944_v1 = vadd.f32 %v4943_v10, %v7835_v0 }
 0x9f3   : > { %v5051_v52 = vmul.f32 %v7860_v50, %v4895_v56 }
 0x9f4   : > { %v5052_v22 = vmul.f32 %v7866_v55, %v4944_v1 }
 0x9f5   : > { %v5163_v46 = vadd.f32 %v5116_v24, %v5051_v52 }
 0x9f6   : > { %v5164_v59 = vadd.f32 %v5116_v24, %v5052_v22 }
 0x9f7   : > { %5195 = vst [vmem:[%s7890_s19 + $0xa0] sm:$0xff] %v5163_v46 }
 0x9f8   : > { %5196 = vst [vmem:[%s7890_s19 + $0xa8] sm:$0xff] %v5164_v59  ;;  %v4896_v21 = vpop.f32.mrf.mxu0 }
 0x9f9   : > { %v4945_v17 = vpop.f32.mrf.mxu1  ;;  %v4897_v19 = vadd.f32 %v4896_v21, %v7837_v53 }
 0x9fa   : > { %v4946_v35 = vadd.f32 %v4945_v17, %v7837_v53 }
 0x9fb   : > { %v5053_v49 = vmul.f32 %v7860_v50, %v4897_v19 }
 0x9fc   : > { %v5054_v0 = vmul.f32 %v7866_v55, %v4946_v35 }
 0x9fd   : > { %v5165_v8 = vadd.f32 %v5121_v36, %v5053_v49 }
 0x9fe   : > { %v5166_v38 = vadd.f32 %v5121_v36, %v5054_v0 }
 0x9ff   : > { %5197 = vst [vmem:[%s7890_s19 + $0xb0] sm:$0xff] %v5165_v8 }
 0xa00   : > { %5198 = vst [vmem:[%s7890_s19 + $0xb8] sm:$0xff] %v5166_v38  ;;  %v4899_v28 = vpop.f32.mrf.mxu0 }
 0xa01   : > { %v4948_v23 = vpop.f32.mrf.mxu1  ;;  %v4900_v62 = vadd.f32 %v4899_v28, %v7839_v26 }
 0xa02   : > { %v4949_v40 = vadd.f32 %v4948_v23, %v7839_v26 }
 0xa03   : > { %v5055_v25 = vmul.f32 %v7860_v50, %v4900_v62 }
 0xa04   : > { %v5056_v53 = vmul.f32 %v7866_v55, %v4949_v40 }
 0xa05   : > { %v5167_v7 = vadd.f32 %v5126_v5, %v5055_v25 }
 0xa06   : > { %v5168_v54 = vadd.f32 %v5126_v5, %v5056_v53 }
 0xa07   : > { %5199 = vst [vmem:[%s7890_s19 + $0xc0] sm:$0xff] %v5167_v7 }
 0xa08   : > { %5200 = vst [vmem:[%s7890_s19 + $0xc8] sm:$0xff] %v5168_v54  ;;  %v4901_v44 = vpop.f32.mrf.mxu0 }
 0xa09   : > { %v4950_v14 = vpop.f32.mrf.mxu1  ;;  %v4902_v9 = vadd.f32 %v4901_v44, %v7847_v13 }
 0xa0a   : > { %v4951_v4 = vadd.f32 %v4950_v14, %v7847_v13 }
 0xa0b   : > { %v5057_v26 = vmul.f32 %v7860_v50, %v4902_v9 }
 0xa0c   : > { %v5058_v18 = vmul.f32 %v7866_v55, %v4951_v4 }
 0xa0d   : > { %v5169_v29 = vadd.f32 %v5131_v15, %v5057_v26 }
 0xa0e   : > { %v5170_v27 = vadd.f32 %v5131_v15, %v5058_v18 }
 0xa0f   : > { %5201 = vst [vmem:[%s7890_s19 + $0xd0] sm:$0xff] %v5169_v29 }
 0xa10   : > { %5202 = vst [vmem:[%s7890_s19 + $0xd8] sm:$0xff] %v5170_v27  ;;  %v4904_v43 = vpop.f32.mrf.mxu0 }
 0xa11   : > { %v4953_v12 = vpop.f32.mrf.mxu1  ;;  %v4905_v63 = vadd.f32 %v4904_v43, %v7849_v47 }
 0xa12   : > { %v4954_v16 = vadd.f32 %v4953_v12, %v7849_v47 }
 0xa13   : > { %v5059_v13 = vmul.f32 %v7860_v50, %v4905_v63 }
 0xa14   : > { %v5060_v51 = vmul.f32 %v7866_v55, %v4954_v16 }
 0xa15   : > { %v5171_v60 = vadd.f32 %v5136_v11, %v5059_v13 }
 0xa16   : > { %v5172_v41 = vadd.f32 %v5136_v11, %v5060_v51 }
 0xa17   : > { %5203 = vst [vmem:[%s7890_s19 + $0xe0] sm:$0xff] %v5171_v60 }
 0xa18   : > { %5204 = vst [vmem:[%s7890_s19 + $0xe8] sm:$0xff] %v5172_v41  ;;  %v4906_v34 = vpop.f32.mrf.mxu0 }
 0xa19   : > { %v4955_v45 = vpop.f32.mrf.mxu1  ;;  %v4907_v47 = vadd.f32 %v4906_v34, %v7851_v2 }
 0xa1a   : > { %v4956_v37 = vadd.f32 %v4955_v45, %v7851_v2 }
 0xa1b   : > { %v5061_v32 = vmul.f32 %v7860_v50, %v4907_v47 }
 0xa1c   : > { %v5062_v6 = vmul.f32 %v7866_v55, %v4956_v37 }
 0xa1d   : > { %v5173_v48 = vadd.f32 %v5141_v42, %v5061_v32 }
 0xa1e   : > { %v5174_v30 = vadd.f32 %v5141_v42, %v5062_v6 }
 0xa1f   : > { %5205 = vst [vmem:[%s7890_s19 + $0xf0] sm:$0xff] %v5173_v48 }
 0xa20   : > { %5206 = vst [vmem:[%s7890_s19 + $0xf8] sm:$0xff] %v5174_v30 }
 0xa21   : > { %5984 = shalt.err (!%p5981_p9)
}
 0xa22   : > { %s6047_s12 = smov 256   ;;  %s6048_s19 = smov 16  }
 0xa23   : > { %5809 = dma.vmem_to_hbm [thread:$0]  (%p6134_p4), %s5223_s24, 4096, %s5225_s30, %s5208_s16, %s6047_s12, %s6047_s12, %s6048_s19  }
 0xa24 PF: > { %p5821_p10 = scmp.ge.s32.totalorder %s6039_s10, 2  ;;  %s5239_s23 = sand.u32 1, %s6019_s27  }
 0xa25   : > { %s5240_s11 = scalar_lea.sflag [#allocation4], %s5239_s23 }
 0xa26   : > { %p5816_p11 = pnand %p5821_p10, %p6141_p8 }
 0xa28   : > { %p5817_p12 = pneg %p5816_p11 }
 0xa2a   : > { %6014 = dma.done.wait (%p5817_p12), %s5240_s11, 4096  }
 0xa2b   : > { %6016 = vsyncadd (%p5817_p12), %s5240_s11, 4294963200  ;;  %s22_s10 = sadd.s32 1, %s6039_s10   ;;  %s8098_s27 = smov %s6023_s28 }
 0xa2c   : > { %p19_p13 = scmp.ge.s32.totalorder %s22_s10, 4   ;;  %s8099_s28 = smov %s6027_s29 }
 0xa2d   : > { %s8100_s29 = smov %s6147_s18  ;;  %s8101_s30 = smov %s6035_s9 }
 0xa2e   : > { %s8102_s9 = smov %s8104_s13  ;;  %21 = sbr.rel (!%p19_p13) target bundleno = 5 (0x5), region = 104 }
 0xa33   :  { %5246 = vsyncpa [#allocation3], 1 }
 0xa34   :  { %5248 = vsyncpa [#allocation3 + $0x1], 1 }
 0xa35   :  { %5249 = vsyncpa [#allocation4], 1 }
 0xa36   :  { %5251 = vsyncpa [#allocation4 + $0x1], 1 }

</bundles_post_ra>
